<compile_context>
chip_gen: v7x
topology: tpu7x:2x2x1
jax: 0.10.0
libtpu: 0.0.40
codegen_flags: <defaults>
</compile_context>

<pallas_src>
import jax
import jax.numpy as jnp
from jax import lax
from jax.experimental import pallas as pl
from jax.experimental.pallas import tpu as pltpu

# Layer sizes from the PyTorch module.
DIMS = [1536, 512, 256, 128, 64, 1]


def mlp_kernel(x_ref,
               w1_ref, b1_ref,
               w2_ref, b2_ref,
               w3_ref, b3_ref,
               w4_ref, b4_ref,
               w5_ref, b5_ref,
               o_ref):
    """Fused forward: (Linear -> ReLU) x4 -> Linear -> Sigmoid.

    Layers 1-4: bf16 MXU matmuls with f32 accumulation; bias + ReLU in f32 on
    the VPU. Head: transposed-contraction matmul producing a lane-dense
    (1, tile_b) row; exact sigmoid on that row.
    """
    # In-kernel bf16 cast: x stays a single f32 HBM read; the VPU cast hides
    # under the K=1536 layer-1 matmul.
    h = jnp.dot(x_ref[...].astype(jnp.bfloat16), w1_ref[...],
                preferred_element_type=jnp.float32)
    h = jnp.maximum(h + b1_ref[...], 0.0)

    h = jnp.dot(h.astype(jnp.bfloat16), w2_ref[...],
                preferred_element_type=jnp.float32)
    h = jnp.maximum(h + b2_ref[...], 0.0)

    h = jnp.dot(h.astype(jnp.bfloat16), w3_ref[...],
                preferred_element_type=jnp.float32)
    h = jnp.maximum(h + b3_ref[...], 0.0)

    h = jnp.dot(h.astype(jnp.bfloat16), w4_ref[...],
                preferred_element_type=jnp.float32)
    h = jnp.maximum(h + b4_ref[...], 0.0)

    # Head (64 -> 1): contract w5 (1, 64) with h (tile_b, 64) along the
    # feature axis (same pattern as q @ k.T). The result lands directly as a
    # lane-dense (1, tile_b) row, so the output store is an unmasked,
    # full-width store instead of a masked 4-bytes-per-row store.
    z = lax.dot_general(
        w5_ref[...], h.astype(jnp.bfloat16),
        dimension_numbers=(((1,), (1,)), ((), ())),
        preferred_element_type=jnp.float32)           # (1, tile_b)
    z = z + b5_ref[...]                               # (1, 1) broadcast

    # Exact sigmoid: exp on the EUP + one true divide on a single vreg row.
    o_ref[...] = (1.0 / (1.0 + jnp.exp(-z))).astype(o_ref.dtype)


def _choose_tiling(batch):
    """Pick (tile_b, grid_b).

    One fat tile keeps the MXU fed and avoids per-step overhead on the
    single-TensorCore chips (v5e/v6e). Split only when every tile still gets
    >= 256 MXU-saturating rows (so both v7x TensorCores get useful work).
    VMEM is never the constraint at these tile sizes.
    """
    if batch <= 512:
        return batch, 1
    for tb in (512, 256):             # multiples of 16 (packed bf16 sublanes)
        if batch % tb == 0:
            return tb, batch // tb
    # Ragged large batch: cdiv grid with a masked tail block (no padding copy).
    return 256, pl.cdiv(batch, 256)


def mlp_forward(x, params):
    """x: (B, 1536) float32. params: per-layer (weight, bias), see init_params.
    Returns (B, 1) float32 probabilities."""
    batch, d_in = x.shape
    assert d_in == DIMS[0]

    tile_b, grid_b = _choose_tiling(batch)

    in_specs = [pl.BlockSpec((tile_b, DIMS[0]), lambda i: (i, 0))]
    flat_params = []
    for (w, b) in params:
        flat_params.extend([w, b])
        # Grid-invariant blocks (index_map always (0, 0)): Pallas skips the
        # re-DMA across steps; default buffering (~2 MiB total) is fine.
        in_specs.append(pl.BlockSpec(tuple(w.shape), lambda i: (0, 0)))
        in_specs.append(pl.BlockSpec(tuple(b.shape), lambda i: (0, 0)))

    out = pl.pallas_call(
        mlp_kernel,
        out_shape=jax.ShapeDtypeStruct((1, batch), jnp.float32),
        grid_spec=pltpu.PrefetchScalarGridSpec(
            num_scalar_prefetch=0,
            grid=(grid_b,),
            in_specs=in_specs,
            out_specs=pl.BlockSpec((1, tile_b), lambda i: (0, i)),
        ),
        compiler_params=pltpu.CompilerParams(
            dimension_semantics=("parallel",),
            vmem_limit_bytes=32 * 1024 * 1024,
        ),
    )(x, *flat_params)

    # (1, B) -> (B, 1): cheap metadata-level reshape, no HBM transpose pass.
    return out.reshape(batch, 1)


def init_params(key):
    """Deterministic init mimicking PyTorch's default Linear init
    (uniform +/- 1/sqrt(fan_in)).

    Layers 1-4: weight stored transposed (in, out) in bf16 (MXU RHS).
    Layer 5:    weight kept in PyTorch layout (1, 64), bf16 (MXU LHS of the
                transposed-contraction head).
    Biases:     (1, out) f32 rows (f32 epilogue).
    """
    params = []
    for li in range(5):
        fan_in, fan_out = DIMS[li], DIMS[li + 1]
        key, kw, kb = jax.random.split(key, 3)
        bound = 1.0 / jnp.sqrt(fan_in)
        w_t = jax.random.uniform(kw, (fan_in, fan_out), jnp.float32,
                                 minval=-bound, maxval=bound)
        b = jax.random.uniform(kb, (1, fan_out), jnp.float32,
                               minval=-bound, maxval=bound)
        if li < 4:
            w = w_t.astype(jnp.bfloat16)        # (in, out) bf16 MXU operand
        else:
            w = w_t.T.astype(jnp.bfloat16)      # (1, 64) bf16 head weight
        params.append((w, b))
    return params


def mlp_reference(x, params):
    """Pure-JAX reference (f32 math on the same — bf16-rounded — weights)."""
    h = x.astype(jnp.float32)
    for li, (w, b) in enumerate(params):
        if li < 4:
            h = h @ w.astype(jnp.float32) + b
            h = jnp.maximum(h, 0.0)
        else:
            h = h @ w.astype(jnp.float32).T + b
    return jax.nn.sigmoid(h)


if __name__ == "__main__":
    key = jax.random.PRNGKey(0)
    key, kx = jax.random.split(key)
    B = 256  # small, but real MXU tiles for the 1536->512 layer
    x = jax.random.normal(kx, (B, DIMS[0]), jnp.float32)

    params = init_params(key)

    out = jax.block_until_ready(mlp_forward(x, params))
    ref = mlp_reference(x, params)

    assert out.shape == (B, 1)
    max_err = float(jnp.max(jnp.abs(out - ref)))
    # bf16 weights/activations through 5 layers -> relaxed tolerance.
    assert max_err < 2e-2, f"mismatch vs reference (max abs err {max_err})"

    print("KERNEL_OK")
</pallas_src>

<mosaic_0001>
module attributes {stable_mosaic.version = 11 : i64} {
  func.func @mlp_kernel(%arg0: i32, %arg1: memref<256x1536xf32, #tpu.memory_space<vmem>>, %arg2: memref<1536x512xbf16, #tpu.memory_space<vmem>>, %arg3: memref<1x512xf32, #tpu.memory_space<vmem>>, %arg4: memref<512x256xbf16, #tpu.memory_space<vmem>>, %arg5: memref<1x256xf32, #tpu.memory_space<vmem>>, %arg6: memref<256x128xbf16, #tpu.memory_space<vmem>>, %arg7: memref<1x128xf32, #tpu.memory_space<vmem>>, %arg8: memref<128x64xbf16, #tpu.memory_space<vmem>>, %arg9: memref<1x64xf32, #tpu.memory_space<vmem>>, %arg10: memref<1x64xbf16, #tpu.memory_space<vmem>>, %arg11: memref<1x1xf32, #tpu.memory_space<vmem>>, %arg12: memref<1x256xf32, #tpu.memory_space<vmem>>) attributes {dimension_semantics = [#tpu.dimension_semantics<parallel>], iteration_bounds = array<i64: 1>, scalar_prefetch = 0 : i64, scratch_operands = 0 : i64, tpu.core_type = #tpu.core_type<tc>, window_params = [{transform_indices = @transform_0, window_bounds = array<i64: 256, 1536>}, {pipeline_mode = #tpu.pipeline_mode<synchronous>, transform_indices = @transform_1, window_bounds = array<i64: 1536, 512>}, {pipeline_mode = #tpu.pipeline_mode<synchronous>, transform_indices = @transform_2, window_bounds = array<i64: 1, 512>}, {pipeline_mode = #tpu.pipeline_mode<synchronous>, transform_indices = @transform_3, window_bounds = array<i64: 512, 256>}, {pipeline_mode = #tpu.pipeline_mode<synchronous>, transform_indices = @transform_4, window_bounds = array<i64: 1, 256>}, {pipeline_mode = #tpu.pipeline_mode<synchronous>, transform_indices = @transform_5, window_bounds = array<i64: 256, 128>}, {pipeline_mode = #tpu.pipeline_mode<synchronous>, transform_indices = @transform_6, window_bounds = array<i64: 1, 128>}, {pipeline_mode = #tpu.pipeline_mode<synchronous>, transform_indices = @transform_7, window_bounds = array<i64: 128, 64>}, {pipeline_mode = #tpu.pipeline_mode<synchronous>, transform_indices = @transform_8, window_bounds = array<i64: 1, 64>}, {pipeline_mode = #tpu.pipeline_mode<synchronous>, transform_indices = @transform_9, window_bounds = array<i64: 1, 64>}, {pipeline_mode = #tpu.pipeline_mode<synchronous>, transform_indices = @transform_10, window_bounds = array<i64: 1, 1>}, {transform_indices = @transform_11, window_bounds = array<i64: 1, 256>}]} {
    %c0 = arith.constant 0 : index
    %c0_0 = arith.constant 0 : index
    %0 = vector.load %arg1[%c0, %c0_0] : memref<256x1536xf32, #tpu.memory_space<vmem>>, vector<256x1536xf32>
    %1 = arith.truncf %0 : vector<256x1536xf32> to vector<256x1536xbf16>
    %c0_1 = arith.constant 0 : index
    %c0_2 = arith.constant 0 : index
    %2 = vector.load %arg2[%c0_1, %c0_2] : memref<1536x512xbf16, #tpu.memory_space<vmem>>, vector<1536x512xbf16>
    %cst = arith.constant dense<0.000000e+00> : vector<256x512xf32>
    %3 = tpu.matmul %1, %2, %cst {dimension_numbers = #tpu.dot_dimension_numbers<[1], [0], [0], [1], [0, 0, 1, 1], [], []>} : vector<256x1536xbf16>, vector<1536x512xbf16>, vector<256x512xf32> -> vector<256x512xf32>
    %c0_3 = arith.constant 0 : index
    %c0_4 = arith.constant 0 : index
    %4 = vector.load %arg3[%c0_3, %c0_4] : memref<1x512xf32, #tpu.memory_space<vmem>>, vector<1x512xf32>
    %5 = vector.broadcast %4 : vector<1x512xf32> to vector<256x512xf32>
    %6 = arith.addf %3, %5 : vector<256x512xf32>
    %cst_5 = arith.constant 0.000000e+00 : f32
    %7 = vector.broadcast %cst_5 : f32 to vector<256x512xf32>
    %8 = arith.maximumf %6, %7 : vector<256x512xf32>
    %9 = arith.truncf %8 : vector<256x512xf32> to vector<256x512xbf16>
    %c0_6 = arith.constant 0 : index
    %c0_7 = arith.constant 0 : index
    %10 = vector.load %arg4[%c0_6, %c0_7] : memref<512x256xbf16, #tpu.memory_space<vmem>>, vector<512x256xbf16>
    %cst_8 = arith.constant dense<0.000000e+00> : vector<256x256xf32>
    %11 = tpu.matmul %9, %10, %cst_8 {dimension_numbers = #tpu.dot_dimension_numbers<[1], [0], [0], [1], [0, 0, 1, 1], [], []>} : vector<256x512xbf16>, vector<512x256xbf16>, vector<256x256xf32> -> vector<256x256xf32>
    %c0_9 = arith.constant 0 : index
    %c0_10 = arith.constant 0 : index
    %12 = vector.load %arg5[%c0_9, %c0_10] : memref<1x256xf32, #tpu.memory_space<vmem>>, vector<1x256xf32>
    %13 = vector.broadcast %12 : vector<1x256xf32> to vector<256x256xf32>
    %14 = arith.addf %11, %13 : vector<256x256xf32>
    %cst_11 = arith.constant 0.000000e+00 : f32
    %15 = vector.broadcast %cst_11 : f32 to vector<256x256xf32>
    %16 = arith.maximumf %14, %15 : vector<256x256xf32>
    %17 = arith.truncf %16 : vector<256x256xf32> to vector<256x256xbf16>
    %c0_12 = arith.constant 0 : index
    %c0_13 = arith.constant 0 : index
    %18 = vector.load %arg6[%c0_12, %c0_13] : memref<256x128xbf16, #tpu.memory_space<vmem>>, vector<256x128xbf16>
    %cst_14 = arith.constant dense<0.000000e+00> : vector<256x128xf32>
    %19 = tpu.matmul %17, %18, %cst_14 {dimension_numbers = #tpu.dot_dimension_numbers<[1], [0], [0], [1], [0, 0, 1, 1], [], []>} : vector<256x256xbf16>, vector<256x128xbf16>, vector<256x128xf32> -> vector<256x128xf32>
    %c0_15 = arith.constant 0 : index
    %c0_16 = arith.constant 0 : index
    %20 = vector.load %arg7[%c0_15, %c0_16] : memref<1x128xf32, #tpu.memory_space<vmem>>, vector<1x128xf32>
    %21 = vector.broadcast %20 : vector<1x128xf32> to vector<256x128xf32>
    %22 = arith.addf %19, %21 : vector<256x128xf32>
    %cst_17 = arith.constant 0.000000e+00 : f32
    %23 = vector.broadcast %cst_17 : f32 to vector<256x128xf32>
    %24 = arith.maximumf %22, %23 : vector<256x128xf32>
    %25 = arith.truncf %24 : vector<256x128xf32> to vector<256x128xbf16>
    %c0_18 = arith.constant 0 : index
    %c0_19 = arith.constant 0 : index
    %26 = vector.load %arg8[%c0_18, %c0_19] : memref<128x64xbf16, #tpu.memory_space<vmem>>, vector<128x64xbf16>
    %cst_20 = arith.constant dense<0.000000e+00> : vector<256x64xf32>
    %27 = tpu.matmul %25, %26, %cst_20 {dimension_numbers = #tpu.dot_dimension_numbers<[1], [0], [0], [1], [0, 0, 1, 1], [], []>} : vector<256x128xbf16>, vector<128x64xbf16>, vector<256x64xf32> -> vector<256x64xf32>
    %c0_21 = arith.constant 0 : index
    %c0_22 = arith.constant 0 : index
    %28 = vector.load %arg9[%c0_21, %c0_22] : memref<1x64xf32, #tpu.memory_space<vmem>>, vector<1x64xf32>
    %29 = vector.broadcast %28 : vector<1x64xf32> to vector<256x64xf32>
    %30 = arith.addf %27, %29 : vector<256x64xf32>
    %cst_23 = arith.constant 0.000000e+00 : f32
    %31 = vector.broadcast %cst_23 : f32 to vector<256x64xf32>
    %32 = arith.maximumf %30, %31 : vector<256x64xf32>
    %c0_24 = arith.constant 0 : index
    %c0_25 = arith.constant 0 : index
    %33 = vector.load %arg10[%c0_24, %c0_25] : memref<1x64xbf16, #tpu.memory_space<vmem>>, vector<1x64xbf16>
    %34 = arith.truncf %32 : vector<256x64xf32> to vector<256x64xbf16>
    %cst_26 = arith.constant dense<0.000000e+00> : vector<1x256xf32>
    %35 = tpu.matmul %33, %34, %cst_26 {dimension_numbers = #tpu.dot_dimension_numbers<[1], [1], [0], [0], [0, 0, 1, 0], [], []>} : vector<1x64xbf16>, vector<256x64xbf16>, vector<1x256xf32> -> vector<1x256xf32>
    %c0_27 = arith.constant 0 : index
    %c0_28 = arith.constant 0 : index
    %36 = vector.load %arg11[%c0_27, %c0_28] : memref<1x1xf32, #tpu.memory_space<vmem>>, vector<1x1xf32>
    %37 = vector.broadcast %36 : vector<1x1xf32> to vector<1x256xf32>
    %38 = arith.addf %35, %37 : vector<1x256xf32>
    %cst_29 = arith.constant 0.000000e+00 : f32
    %39 = vector.broadcast %cst_29 : f32 to vector<1x256xf32>
    %40 = arith.subf %39, %38 : vector<1x256xf32>
    %41 = math.exp %40 : vector<1x256xf32>
    %cst_30 = arith.constant 1.000000e+00 : f32
    %42 = vector.broadcast %cst_30 : f32 to vector<1x256xf32>
    %43 = arith.addf %42, %41 : vector<1x256xf32>
    %cst_31 = arith.constant 1.000000e+00 : f32
    %44 = vector.broadcast %cst_31 : f32 to vector<1x256xf32>
    %45 = arith.divf %44, %43 : vector<1x256xf32>
    %c0_32 = arith.constant 0 : index
    %c0_33 = arith.constant 0 : index
    %46 = vector.load %arg12[%c0_32, %c0_33] : memref<1x256xf32, #tpu.memory_space<vmem>>, vector<1x256xf32>
    tpu.vector_store %arg12[%c0_32, %c0_33], %45 {strides = array<i32>} : memref<1x256xf32, #tpu.memory_space<vmem>>, vector<1x256xf32>,
    return
  }
  func.func @transform_0(%arg0: i32) -> (i32, i32) {
    %c0_i32 = arith.constant 0 : i32
    %c0_i32_0 = arith.constant 0 : i32
    return %arg0, %c0_i32 : i32, i32
  }
  func.func @transform_1(%arg0: i32) -> (i32, i32) {
    %c0_i32 = arith.constant 0 : i32
    %c0_i32_0 = arith.constant 0 : i32
    %c0_i32_1 = arith.constant 0 : i32
    return %c0_i32, %c0_i32_0 : i32, i32
  }
  func.func @transform_2(%arg0: i32) -> (i32, i32) {
    %c0_i32 = arith.constant 0 : i32
    %c0_i32_0 = arith.constant 0 : i32
    %c0_i32_1 = arith.constant 0 : i32
    return %c0_i32, %c0_i32_0 : i32, i32
  }
  func.func @transform_3(%arg0: i32) -> (i32, i32) {
    %c0_i32 = arith.constant 0 : i32
    %c0_i32_0 = arith.constant 0 : i32
    %c0_i32_1 = arith.constant 0 : i32
    return %c0_i32, %c0_i32_0 : i32, i32
  }
  func.func @transform_4(%arg0: i32) -> (i32, i32) {
    %c0_i32 = arith.constant 0 : i32
    %c0_i32_0 = arith.constant 0 : i32
    %c0_i32_1 = arith.constant 0 : i32
    return %c0_i32, %c0_i32_0 : i32, i32
  }
  func.func @transform_5(%arg0: i32) -> (i32, i32) {
    %c0_i32 = arith.constant 0 : i32
    %c0_i32_0 = arith.constant 0 : i32
    %c0_i32_1 = arith.constant 0 : i32
    return %c0_i32, %c0_i32_0 : i32, i32
  }
  func.func @transform_6(%arg0: i32) -> (i32, i32) {
    %c0_i32 = arith.constant 0 : i32
    %c0_i32_0 = arith.constant 0 : i32
    %c0_i32_1 = arith.constant 0 : i32
    return %c0_i32, %c0_i32_0 : i32, i32
  }
  func.func @transform_7(%arg0: i32) -> (i32, i32) {
    %c0_i32 = arith.constant 0 : i32
    %c0_i32_0 = arith.constant 0 : i32
    %c0_i32_1 = arith.constant 0 : i32
    return %c0_i32, %c0_i32_0 : i32, i32
  }
  func.func @transform_8(%arg0: i32) -> (i32, i32) {
    %c0_i32 = arith.constant 0 : i32
    %c0_i32_0 = arith.constant 0 : i32
    %c0_i32_1 = arith.constant 0 : i32
    return %c0_i32, %c0_i32_0 : i32, i32
  }
  func.func @transform_9(%arg0: i32) -> (i32, i32) {
    %c0_i32 = arith.constant 0 : i32
    %c0_i32_0 = arith.constant 0 : i32
    %c0_i32_1 = arith.constant 0 : i32
    return %c0_i32, %c0_i32_0 : i32, i32
  }
  func.func @transform_10(%arg0: i32) -> (i32, i32) {
    %c0_i32 = arith.constant 0 : i32
    %c0_i32_0 = arith.constant 0 : i32
    %c0_i32_1 = arith.constant 0 : i32
    return %c0_i32, %c0_i32_0 : i32, i32
  }
  func.func @transform_11(%arg0: i32) -> (i32, i32) {
    %c0_i32 = arith.constant 0 : i32
    %c0_i32_0 = arith.constant 0 : i32
    return %c0_i32, %arg0 : i32, i32
  }
}

</mosaic_0001>

<bundles_post_ra>
// kernel: tpu_custom_call.1
= control target key start
LH: loop header
LB: loop body
LE: loop exit
PB: predicated region body
PF: predicated region fallthrough
CT: control target
= control target key end

     0   :  { %s10412_s0 = inlined_call_operand.hbm [shape: f32[256,1536], index: 0, kind: input, shape index: {}]   ;;  %s10413_s1 = inlined_call_operand.hbm [shape: bf16[1536,512], index: 1, kind: input, shape index: {}]   ;;  %s10414_s2 = inlined_call_operand.hbm [shape: f32[1,512], index: 2, kind: input, shape index: {}]   ;;  %s10415_s3 = inlined_call_operand.hbm [shape: bf16[512,256], index: 3, kind: input, shape index: {}]   ;;  %s10416_s4 = inlined_call_operand.hbm [shape: f32[1,256], index: 4, kind: input, shape index: {}]   ;;  %s10417_s5 = inlined_call_operand.hbm [shape: bf16[256,128], index: 5, kind: input, shape index: {}]   ;;  %s10418_s6 = inlined_call_operand.hbm [shape: f32[1,128], index: 6, kind: input, shape index: {}]   ;;  %s10419_s7 = inlined_call_operand.vmem [shape: bf16[128,64], index: 7, kind: input, shape index: {}]   ;;  %s10420_s8 = inlined_call_operand.hbm [shape: f32[1,64], index: 8, kind: input, shape index: {}]   ;;  %s10421_s9 = inlined_call_operand.hbm [shape: bf16[1,64], index: 9, kind: input, shape index: {}]   ;;  %s10422_s10 = inlined_call_operand.<no memory space> [shape: f32[1,1], index: 10, kind: input, shape index: {}]   ;;  %s10423_s11 = inlined_call_operand.hbm [shape: f32[1,256], index: 11, kind: output, shape index: {}]  }
   0x1   :  { %v16_v0 = vstv %s10422_s10 }
   0x2   :  { %17 = vst [vmem:[#allocation2] sm:$0x1] %v16_v0 }
   0x3   :  { %18 = vsyncpa [#allocation4], 0 }
   0x4   :  { %19 = vsyncpa [#allocation7], 0 }
   0x5   :  { %20 = vsyncpa [#allocation10], 0 }
   0x6   :  { %21 = vsyncpa [#allocation13], 0 }
   0x7   :  { %22 = vsyncpa [#allocation16], 0 }
   0x8   :  { %23 = vsyncpa [#allocation5], 0  ;;  %s9762_s19 = smov [#allocation6]   ;;  %s9530_s23 = scalar_lea.hbm %s10413_s1, 49152 }
   0x9   :  { %s41_s20 = sshll.u32 %s9762_s19, 4  ;;  %p9531_p0 = scmp.ne.s32.totalorder %s10413_s1, %s9530_s23  ;;  %s42_s20 = int_to_ptr.vmem [resolvable:$true] %s41_s20 }
   0xa   :  { %p9534_p1 = scmp.lt.u32.totalorder %s9530_s23, %s10413_s1 }
   0xc   :  { %p9536_p2 = pnand %p9534_p1, %p9531_p0 }
   0xe   :  { %9539 = shalt.err (!%p9536_p2)
}
   0xf   :  { %s9540_s27 = scalar_lea.vmem %s42_s20, 49152  ;;  %p9545_p4 = scmp.lt.s32.totalorder %s42_s20, %s42_s20 }
  0x10   :  { %p9541_p3 = scmp.ne.s32.totalorder %s42_s20, %s9540_s27  ;;  %p9546_p5 = scmp.lt.s32.totalorder %s9540_s27, %s9540_s27 }
  0x12   :  { %p9547_p6 = por %p9546_p5, %p9545_p4 }
  0x14   :  { %p9548_p7 = pnand %p9547_p6, %p9541_p3 }
  0x16   :  { %9551 = shalt.err (!%p9548_p7)
}
  0x17   :  { %s9763_s28 = smov 256   ;;  %s9764_s29 = smov 16  }
  0x18   :  { %47 = dma.hbm_to_vmem [thread:$0]  %s10413_s1, 49152, %s42_s20, [#allocation7], %s9763_s28, %s9763_s28, %s9764_s29  }
  0x19   :  { %s9765_s13 = smov [#allocation9]   ;;  %s9552_s17 = scalar_lea.hbm %s10415_s3, 8192 }
  0x1a   :  { %s63_s14 = sshll.u32 %s9765_s13, 4  ;;  %p9553_p8 = scmp.ne.s32.totalorder %s10415_s3, %s9552_s17  ;;  %s64_s14 = int_to_ptr.vmem [resolvable:$true] %s63_s14 }
  0x1b   :  { %p9556_p9 = scmp.lt.u32.totalorder %s9552_s17, %s10415_s3 }
  0x1d   :  { %p9558_p10 = pnand %p9556_p9, %p9553_p8 }
  0x1f   :  { %9561 = shalt.err (!%p9558_p10)
}
  0x20   :  { %s9562_s23 = scalar_lea.vmem %s64_s14, 8192  ;;  %p9567_p12 = scmp.lt.s32.totalorder %s64_s14, %s64_s14 }
  0x21   :  { %p9563_p11 = scmp.ne.s32.totalorder %s64_s14, %s9562_s23  ;;  %p9568_p13 = scmp.lt.s32.totalorder %s9562_s23, %s9562_s23 }
  0x23   :  { %p9569_p0 = por %p9568_p13, %p9567_p12 }
  0x25   :  { %p9570_p1 = pnand %p9569_p0, %p9563_p11 }
  0x27   :  { %9573 = shalt.err (!%p9570_p1)
}
  0x28   :  { %s9766_s1 = smov 128   ;;  %s9767_s20 = smov 8  }
  0x29   :  { %69 = dma.hbm_to_vmem [thread:$0]  %s10415_s3, 8192, %s64_s14, [#allocation10], %s9766_s1, %s9766_s1, %s9767_s20  }
  0x2a   :  { %s9768_s26 = smov [#allocation12]   ;;  %s9574_s29 = scalar_lea.hbm %s10417_s5, 2048 }
  0x2b   :  { %s85_s10 = sshll.u32 %s9768_s26, 4  ;;  %p9575_p2 = scmp.ne.s32.totalorder %s10417_s5, %s9574_s29  ;;  %s86_s10 = int_to_ptr.vmem [resolvable:$true] %s85_s10 }
  0x2c   :  { %p9578_p3 = scmp.lt.u32.totalorder %s9574_s29, %s10417_s5 }
  0x2e   :  { %p9580_p4 = pnand %p9578_p3, %p9575_p2 }
  0x30   :  { %9583 = shalt.err (!%p9580_p4)
}
  0x31   :  { %s9584_s16 = scalar_lea.vmem %s86_s10, 2048  ;;  %p9589_p6 = scmp.lt.s32.totalorder %s86_s10, %s86_s10 }
  0x32   :  { %p9585_p5 = scmp.ne.s32.totalorder %s86_s10, %s9584_s16  ;;  %p9590_p7 = scmp.lt.s32.totalorder %s9584_s16, %s9584_s16 }
  0x34   :  { %p9591_p8 = por %p9590_p7, %p9589_p6 }
  0x36   :  { %p9592_p9 = pnand %p9591_p8, %p9585_p5 }
  0x38   :  { %9595 = shalt.err (!%p9592_p9)
}
  0x39   :  { %s9769_s3 = smov 64   ;;  %s9770_s14 = smov 4  }
  0x3a   :  { %91 = dma.hbm_to_vmem [thread:$0]  %s10417_s5, 2048, %s86_s10, [#allocation13], %s9769_s3, %s9769_s3, %s9770_s14  }
  0x3b   :  { %s9771_s19 = smov [#allocation15]   ;;  %s9772_s22 = smov [#allocation3]  }
  0x3c   :  { %s110_s21 = sshll.u32 %s9771_s19, 4  ;;  %s29_s23 = sshll.u32 %s9772_s22, 4  ;;  %s111_s21 = int_to_ptr.vmem [resolvable:$true] %s110_s21  ;;  %s30_s23 = int_to_ptr.vmem [resolvable:$true] %s29_s23 }
  0x3d   :  { %s9596_s24 = scalar_lea.hbm %s10420_s8, 16 }
  0x3e   :  { %p9597_p10 = scmp.ne.s32.totalorder %s10420_s8, %s9596_s24  ;;  %p9600_p11 = scmp.lt.u32.totalorder %s9596_s24, %s10420_s8 }
  0x40   :  { %p9602_p12 = pnand %p9600_p11, %p9597_p10 }
  0x42   :  { %9605 = shalt.err (!%p9602_p12)
}
  0x43   :  { %s9606_s5 = scalar_lea.vmem %s111_s21, 16  ;;  %s9610_s10 = scalar_lea.vmem %s111_s21, 32 }
  0x44   :  { %p9607_p13 = scmp.ne.s32.totalorder %s111_s21, %s9606_s5  ;;  %p9611_p0 = scmp.lt.s32.totalorder %s111_s21, %s111_s21 }
  0x45   :  { %p9612_p1 = scmp.lt.s32.totalorder %s9610_s10, %s9606_s5 }
  0x47   :  { %p9613_p2 = por %p9612_p1, %p9611_p0 }
  0x49   :  { %p9614_p3 = pnand %p9613_p2, %p9607_p13 }
  0x4b   :  { %9617 = shalt.err (!%p9614_p3)
}
  0x4c   :  { %113 = dma.hbm_to_vmem [thread:$0]  %s10420_s8, 16, %s111_s21, [#allocation16]  }
  0x4d   :  { %s9618_s15 = scalar_lea.hbm %s10412_s0, 49152 }
  0x4e   :  { %p9619_p4 = scmp.ne.s32.totalorder %s10412_s0, %s9618_s15  ;;  %p9622_p5 = scmp.lt.u32.totalorder %s9618_s15, %s10412_s0 }
  0x50   :  { %p9624_p6 = pnand %p9622_p5, %p9619_p4 }
  0x52   :  { %9627 = shalt.err (!%p9624_p6)
}
  0x53   :  { %s9628_s18 = scalar_lea.vmem %s30_s23, 49152  ;;  %p9633_p8 = scmp.lt.s32.totalorder %s30_s23, %s30_s23 }
  0x54   :  { %p9629_p7 = scmp.ne.s32.totalorder %s30_s23, %s9628_s18  ;;  %p9634_p9 = scmp.lt.s32.totalorder %s9628_s18, %s9628_s18 }
  0x56   :  { %p9635_p10 = por %p9634_p9, %p9633_p8 }
  0x58   :  { %p9636_p11 = pnand %p9635_p10, %p9629_p7 }
  0x5a   :  { %9639 = shalt.err (!%p9636_p11)
}
  0x5b   :  { %s9773_s8 = smov 1536   ;;  %s9774_s19 = smov 96  }
  0x5c   :  { %35 = dma.hbm_to_vmem [thread:$0]  %s10412_s0, 49152, %s30_s23, [#allocation4], %s9773_s8, %s9773_s8, %s9774_s19  }
  0x5d   :  { %s9775_s1 = smov [#allocation8]   ;;  %s9776_s24 = smov [#allocation11]  }
  0x5e   :  { %s54_s20 = sshll.u32 %s9775_s1, 4  ;;  %s76_s25 = sshll.u32 %s9776_s24, 4  ;;  %s55_s20 = int_to_ptr.vmem [resolvable:$true] %s54_s20  ;;  %s77_s25 = int_to_ptr.vmem [resolvable:$true] %s76_s25 }
  0x5f   :  { %s9640_s28 = scalar_lea.hbm %s10414_s2, 64 }
  0x60   :  { %p9641_p12 = scmp.ne.s32.totalorder %s10414_s2, %s9640_s28  ;;  %p9644_p13 = scmp.lt.u32.totalorder %s9640_s28, %s10414_s2 }
  0x62   :  { %p9646_p0 = pnand %p9644_p13, %p9641_p12 }
  0x64   :  { %9649 = shalt.err (!%p9646_p0)
}
  0x65   :  { %s9650_s0 = scalar_lea.vmem %s55_s20, 64  ;;  %p9655_p2 = scmp.lt.s32.totalorder %s55_s20, %s55_s20 }
  0x66   :  { %p9651_p1 = scmp.ne.s32.totalorder %s55_s20, %s9650_s0  ;;  %p9656_p3 = scmp.lt.s32.totalorder %s9650_s0, %s9650_s0 }
  0x68   :  { %p9657_p4 = por %p9656_p3, %p9655_p2 }
  0x6a   :  { %p9658_p5 = pnand %p9657_p4, %p9651_p1 }
  0x6c   :  { %9661 = shalt.err (!%p9658_p5)
}
  0x6d   :  { %57 = dma.hbm_to_vmem [thread:$0]  %s10414_s2, 64, %s55_s20, [#allocation7]  }
  0x6e   :  { %s9662_s16 = scalar_lea.hbm %s10416_s4, 32 }
  0x6f   :  { %p9663_p6 = scmp.ne.s32.totalorder %s10416_s4, %s9662_s16  ;;  %p9666_p7 = scmp.lt.u32.totalorder %s9662_s16, %s10416_s4 }
  0x71   :  { %p9668_p8 = pnand %p9666_p7, %p9663_p6 }
  0x73   :  { %9671 = shalt.err (!%p9668_p8)
}
  0x74   :  { %s9672_s8 = scalar_lea.vmem %s77_s25, 32  ;;  %p9677_p10 = scmp.lt.s32.totalorder %s77_s25, %s77_s25 }
  0x75   :  { %p9673_p9 = scmp.ne.s32.totalorder %s77_s25, %s9672_s8  ;;  %p9678_p11 = scmp.lt.s32.totalorder %s9672_s8, %s9672_s8 }
  0x77   :  { %p9679_p12 = por %p9678_p11, %p9677_p10 }
  0x79   :  { %p9680_p13 = pnand %p9679_p12, %p9673_p9 }
  0x7b   :  { %9683 = shalt.err (!%p9680_p13)
}
  0x7c   :  { %79 = dma.hbm_to_vmem [thread:$0]  %s10416_s4, 32, %s77_s25, [#allocation10]  }
  0x7d   :  { %s9777_s21 = smov [#allocation14]   ;;  %s9778_s1 = smov [#allocation17]  }
  0x7e   :  { %s98_s22 = sshll.u32 %s9777_s21, 4  ;;  %s120_s20 = sshll.u32 %s9778_s1, 4  ;;  %s99_s22 = int_to_ptr.vmem [resolvable:$true] %s98_s22  ;;  %s121_s20 = int_to_ptr.vmem [resolvable:$true] %s120_s20 }
  0x7f   :  { %s9684_s27 = scalar_lea.hbm %s10418_s6, 16 }
  0x80   :  { %p9685_p0 = scmp.ne.s32.totalorder %s10418_s6, %s9684_s27  ;;  %p9688_p1 = scmp.lt.u32.totalorder %s9684_s27, %s10418_s6 }
  0x82   :  { %p9690_p2 = pnand %p9688_p1, %p9685_p0 }
  0x84   :  { %9693 = shalt.err (!%p9690_p2)
}
  0x85   :  { %s9694_s4 = scalar_lea.vmem %s99_s22, 16  ;;  %s9698_s25 = scalar_lea.vmem %s99_s22, 32 }
  0x86   :  { %p9695_p3 = scmp.ne.s32.totalorder %s99_s22, %s9694_s4  ;;  %p9699_p4 = scmp.lt.s32.totalorder %s99_s22, %s99_s22 }
  0x87   :  { %p9700_p5 = scmp.lt.s32.totalorder %s9698_s25, %s9694_s4 }
  0x89   :  { %p9701_p6 = por %p9700_p5, %p9699_p4 }
  0x8b   :  { %p9702_p7 = pnand %p9701_p6, %p9695_p3 }
  0x8d   :  { %9705 = shalt.err (!%p9702_p7)
}
  0x8e   :  { %101 = dma.hbm_to_vmem [thread:$0]  %s10418_s6, 16, %s99_s22, [#allocation13]  }
  0x8f   :  { %s9706_s13 = scalar_lea.hbm %s10421_s9, 16 }
  0x90   :  { %p9707_p8 = scmp.ne.s32.totalorder %s10421_s9, %s9706_s13  ;;  %p9710_p9 = scmp.lt.u32.totalorder %s9706_s13, %s10421_s9 }
  0x92   :  { %p9712_p10 = pnand %p9710_p9, %p9707_p8 }
  0x94   :  { %9715 = shalt.err (!%p9712_p10)
}
  0x95   :  { %s9716_s17 = scalar_lea.vmem %s121_s20, 16  ;;  %s9720_s18 = scalar_lea.vmem %s121_s20, 32 }
  0x96   :  { %p9717_p11 = scmp.ne.s32.totalorder %s121_s20, %s9716_s17  ;;  %p9721_p12 = scmp.lt.s32.totalorder %s121_s20, %s121_s20 }
  0x97   :  { %p9722_p13 = scmp.lt.s32.totalorder %s9720_s18, %s9716_s17 }
  0x99   :  { %p9723_p0 = por %p9722_p13, %p9721_p12 }
  0x9b   :  { %p9724_p1 = pnand %p9723_p0, %p9717_p11 }
  0x9d   :  { %9727 = shalt.err (!%p9724_p1)
}
  0x9e   :  { %123 = dma.hbm_to_vmem [thread:$0]  %s10421_s9, 16, %s121_s20, [#allocation16]  }
  0x9f   :  { %9750 = dma.done.wait [#allocation4], 49152  }
  0xa0   :  { %9751 = vsyncadd [#allocation4], 4294918144 }
  0xa1   :  { %9752 = dma.done.wait [#allocation7], 49216  }
  0xa2   :  { %9753 = vsyncadd [#allocation7], 4294918080 }
  0xa3   :  { %9754 = dma.done.wait [#allocation10], 8224  }
  0xa4   :  { %9755 = vsyncadd [#allocation10], 4294959072 }
  0xa5   :  { %9756 = dma.done.wait [#allocation13], 2064  }
  0xa6   :  { %9757 = vsyncadd [#allocation13], 4294965232 }
  0xa7   :  { %9758 = dma.done.wait [#allocation16], 32  }
  0xa8   :  { %9759 = vsyncadd [#allocation16], 4294967264  ;;  %v8826_v1 = vld [vmem:[#allocation6 + $0x4] ss:$16 sps:$4 sm:$0xff]   ;;  %v8828_v2 = vld [vmem:[#allocation6 + $0xc] ss:$16 sps:$4 sm:$0xff]  }
  0xa9   :  { %3056 = vmatprep.subr.bf16.mxu0 %v8826_v1  ;;  %v8830_v3 = vld [vmem:[#allocation6] ss:$16 sps:$4 sm:$0xff]   ;;  %v8831_v4 = vld [vmem:[#allocation6 + $0x8] ss:$16 sps:$4 sm:$0xff]   ;;  %4214 = vmatprep.subr.bf16.mxu1 %v8828_v2  ;;  %v8832_v5 = vld [vmem:[#allocation6 + $0x24] ss:$16 sps:$4 sm:$0xff]  }
  0xaa   :  { %3057 = vmatpush1.bf16.msra.mxu0 %v8830_v3  ;;  %4215 = vmatpush1.bf16.msra.mxu1 %v8831_v4  ;;  %v8834_v6 = vld [vmem:[#allocation6 + $0x2c] ss:$16 sps:$4 sm:$0xff]   ;;  %v8836_v7 = vld [vmem:[#allocation6 + $0x20] ss:$16 sps:$4 sm:$0xff]   ;;  %v8837_v8 = vld [vmem:[#allocation6 + $0x28] ss:$16 sps:$4 sm:$0xff]  }
  0xab   :  { %3058 = vmatprep.subr.bf16.mxu0 %v8832_v5  ;;  %4216 = vmatprep.subr.bf16.mxu1 %v8834_v6  ;;  %v8838_v9 = vld [vmem:[#allocation6 + $0x44] ss:$16 sps:$4 sm:$0xff]   ;;  %v8840_v10 = vld [vmem:[#allocation6 + $0x4c] ss:$16 sps:$4 sm:$0xff]   ;;  %v8842_v11 = vld [vmem:[#allocation6 + $0x40] ss:$16 sps:$4 sm:$0xff]  }
  0xac   :  { %v8843_v12 = vld [vmem:[#allocation6 + $0x48] ss:$16 sps:$4 sm:$0xff]   ;;  %v8844_v13 = vld [vmem:[#allocation6 + $0x64] ss:$16 sps:$4 sm:$0xff]   ;;  %v8846_v14 = vld [vmem:[#allocation6 + $0x6c] ss:$16 sps:$4 sm:$0xff]  }
  0xad   :  { %v8848_v15 = vld [vmem:[#allocation6 + $0x60] ss:$16 sps:$4 sm:$0xff]   ;;  %v8849_v16 = vld [vmem:[#allocation6 + $0x68] ss:$16 sps:$4 sm:$0xff]   ;;  %v8850_v17 = vld [vmem:[#allocation6 + $0x84] ss:$16 sps:$4 sm:$0xff]  }
  0xae   :  { %3059 = vmatpush1.bf16.msra.mxu0 %v8836_v7  ;;  %4217 = vmatpush1.bf16.msra.mxu1 %v8837_v8  ;;  %v8852_v18 = vld [vmem:[#allocation6 + $0x8c] ss:$16 sps:$4 sm:$0xff]   ;;  %v8854_v19 = vld [vmem:[#allocation6 + $0x80] ss:$16 sps:$4 sm:$0xff]   ;;  %v8855_v20 = vld [vmem:[#allocation6 + $0x88] ss:$16 sps:$4 sm:$0xff]  }
  0xaf   :  { %3060 = vmatprep.subr.bf16.mxu0 %v8838_v9  ;;  %4218 = vmatprep.subr.bf16.mxu1 %v8840_v10  ;;  %v8856_v21 = vld [vmem:[#allocation6 + $0xa4] ss:$16 sps:$4 sm:$0xff]   ;;  %v8858_v22 = vld [vmem:[#allocation6 + $0xac] ss:$16 sps:$4 sm:$0xff]   ;;  %v8860_v23 = vld [vmem:[#allocation6 + $0xa0] ss:$16 sps:$4 sm:$0xff]  }
  0xb0   :  { %v8861_v24 = vld [vmem:[#allocation6 + $0xa8] ss:$16 sps:$4 sm:$0xff]   ;;  %v8862_v25 = vld [vmem:[#allocation6 + $0xc4] ss:$16 sps:$4 sm:$0xff]   ;;  %v8864_v26 = vld [vmem:[#allocation6 + $0xcc] ss:$16 sps:$4 sm:$0xff]  }
  0xb1   :  { %v8866_v27 = vld [vmem:[#allocation6 + $0xc0] ss:$16 sps:$4 sm:$0xff]   ;;  %v8867_v28 = vld [vmem:[#allocation6 + $0xc8] ss:$16 sps:$4 sm:$0xff]   ;;  %v8868_v29 = vld [vmem:[#allocation6 + $0xe4] ss:$16 sps:$4 sm:$0xff]  }
  0xb2   :  { %3061 = vmatpush1.bf16.msra.mxu0 %v8842_v11  ;;  %4219 = vmatpush1.bf16.msra.mxu1 %v8843_v12  ;;  %v8870_v30 = vld [vmem:[#allocation6 + $0xec] ss:$16 sps:$4 sm:$0xff]   ;;  %v8872_v31 = vld [vmem:[#allocation6 + $0xe0] ss:$16 sps:$4 sm:$0xff]   ;;  %v8873_v32 = vld [vmem:[#allocation6 + $0xe8] ss:$16 sps:$4 sm:$0xff]  }
  0xb3   :  { %3062 = vmatprep.subr.bf16.mxu0 %v8844_v13  ;;  %4220 = vmatprep.subr.bf16.mxu1 %v8846_v14  ;;  %v8874_v33 = vld [vmem:[#allocation6 + $0x104] ss:$16 sps:$4 sm:$0xff]   ;;  %v8876_v34 = vld [vmem:[#allocation6 + $0x10c] ss:$16 sps:$4 sm:$0xff]   ;;  %v8878_v35 = vld [vmem:[#allocation6 + $0x100] ss:$16 sps:$4 sm:$0xff]  }
  0xb4   :  { %v8879_v36 = vld [vmem:[#allocation6 + $0x108] ss:$16 sps:$4 sm:$0xff]   ;;  %v8880_v37 = vld [vmem:[#allocation6 + $0x124] ss:$16 sps:$4 sm:$0xff]   ;;  %v8882_v38 = vld [vmem:[#allocation6 + $0x12c] ss:$16 sps:$4 sm:$0xff]  }
  0xb5   :  { %v8884_v39 = vld [vmem:[#allocation6 + $0x120] ss:$16 sps:$4 sm:$0xff]   ;;  %v8885_v40 = vld [vmem:[#allocation6 + $0x128] ss:$16 sps:$4 sm:$0xff]   ;;  %v8886_v41 = vld [vmem:[#allocation6 + $0x144] ss:$16 sps:$4 sm:$0xff]  }
  0xb6   :  { %3063 = vmatpush1.bf16.msra.mxu0 %v8848_v15  ;;  %4221 = vmatpush1.bf16.msra.mxu1 %v8849_v16  ;;  %v8888_v42 = vld [vmem:[#allocation6 + $0x14c] ss:$16 sps:$4 sm:$0xff]   ;;  %v8890_v43 = vld [vmem:[#allocation6 + $0x140] ss:$16 sps:$4 sm:$0xff]   ;;  %v8891_v44 = vld [vmem:[#allocation6 + $0x148] ss:$16 sps:$4 sm:$0xff]  }
  0xb7   :  { %3064 = vmatprep.subr.bf16.mxu0 %v8850_v17  ;;  %4222 = vmatprep.subr.bf16.mxu1 %v8852_v18  ;;  %v8892_v45 = vld [vmem:[#allocation6 + $0x164] ss:$16 sps:$4 sm:$0xff]   ;;  %v8894_v46 = vld [vmem:[#allocation6 + $0x16c] ss:$16 sps:$4 sm:$0xff]   ;;  %v8896_v48 = vld [vmem:[#allocation6 + $0x160] ss:$16 sps:$4 sm:$0xff]  }
  0xb8   :  { %v155_v47 = vld [vmem:[#allocation3 + $0x8] sm:$0xff]  ;;  %v8898_v52 = vld [vmem:[#allocation6 + $0x184] ss:$16 sps:$4 sm:$0xff]   ;;  %v8902_v54 = vld [vmem:[#allocation6 + $0x180] ss:$16 sps:$4 sm:$0xff]   ;;  %vm7077_vm0 = vcmask 523264  }
  0xb9   :  { %v167_v49 = vld [vmem:[#allocation3 + $0x68] sm:$0xff]  ;;  %v8904_v56 = vld [vmem:[#allocation6 + $0x1a4] ss:$16 sps:$4 sm:$0xff]   ;;  %v8908_v58 = vld [vmem:[#allocation6 + $0x1a0] ss:$16 sps:$4 sm:$0xff]  }
  0xba   :  { %3065 = vmatpush1.bf16.msra.mxu0 %v8854_v19  ;;  %4223 = vmatpush1.bf16.msra.mxu1 %v8855_v20  ;;  %v8897_v50 = vld [vmem:[#allocation6 + $0x168] ss:$16 sps:$4 sm:$0xff]   ;;  %v539_v51 = vpack.c.bf16 %v167_v49, %v155_v47  ;;  %v8900_v53 = vld [vmem:[#allocation6 + $0x18c] ss:$16 sps:$4 sm:$0xff]   ;;  %v8910_v60 = vld [vmem:[#allocation6 + $0x1c4] ss:$16 sps:$4 sm:$0xff]  }
  0xbb   :  { %3066 = vmatprep.subr.bf16.mxu0 %v8856_v21  ;;  %4224 = vmatprep.subr.bf16.mxu1 %v8858_v22  ;;  %v8903_v55 = vld [vmem:[#allocation6 + $0x188] ss:$16 sps:$4 sm:$0xff]   ;;  %v8906_v57 = vld [vmem:[#allocation6 + $0x1ac] ss:$16 sps:$4 sm:$0xff]   ;;  %v8914_v62 = vld [vmem:[#allocation6 + $0x1c0] ss:$16 sps:$4 sm:$0xff]  }
  0xbc   :  { %3088 = vmatprep.mubr.bf16.mxu0 %v539_v51  ;;  %4246 = vmatprep.mubr.bf16.mxu1 %v539_v51  ;;  %v8909_v59 = vld [vmem:[#allocation6 + $0x1a8] ss:$16 sps:$4 sm:$0xff]   ;;  %v8912_v61 = vld [vmem:[#allocation6 + $0x1cc] ss:$16 sps:$4 sm:$0xff]   ;;  %v8916_v0 = vld [vmem:[#allocation6 + $0x1e4] ss:$16 sps:$4 sm:$0xff]  }
  0xbd   :  { %v8915_v63 = vld [vmem:[#allocation6 + $0x1c8] ss:$16 sps:$4 sm:$0xff]   ;;  %v8918_v1 = vld [vmem:[#allocation6 + $0x1ec] ss:$16 sps:$4 sm:$0xff]   ;;  %v8920_v2 = vld [vmem:[#allocation6 + $0x1e0] ss:$16 sps:$4 sm:$0xff]  }
  0xbe   :  { %3067 = vmatpush1.bf16.msra.mxu0 %v8860_v23  ;;  %4225 = vmatpush1.bf16.msra.mxu1 %v8861_v24  ;;  %v8921_v3 = vld [vmem:[#allocation6 + $0x1e8] ss:$16 sps:$4 sm:$0xff]   ;;  %v154_v4 = vld [vmem:[#allocation3] sm:$0xff]  ;;  %v8951_v17 = vld [vmem:[#allocation6 + $0x20c] ss:$16 sps:$4 sm:$0xff]  }
  0xbf   :  { %3068 = vmatprep.subr.bf16.mxu0 %v8862_v25  ;;  %4226 = vmatprep.subr.bf16.mxu1 %v8864_v26  ;;  %v166_v5 = vld [vmem:[#allocation3 + $0x60] sm:$0xff]  ;;  %v179_v7 = vld [vmem:[#allocation3 + $0xc8] sm:$0xff] }
  0xc0   :  { %v8924_v6 = vld [vmem:[#allocation6 + $0x204] ss:$16 sps:$4 sm:$0xff]   ;;  %v191_v8 = vld [vmem:[#allocation3 + $0x128] sm:$0xff]  ;;  %v538_v9 = vpack.c.bf16 %v166_v5, %v154_v4  ;;  %v8922_v10 = vld [vmem:[#allocation6 + $0x200] ss:$16 sps:$4 sm:$0xff]  }
  0xc1   :  { %v551_v11 = vpack.c.bf16 %v191_v8, %v179_v7  ;;  %v8927_v12 = vld [vmem:[#allocation6 + $0x224] ss:$16 sps:$4 sm:$0xff]   ;;  %v8925_v15 = vld [vmem:[#allocation6 + $0x220] ss:$16 sps:$4 sm:$0xff]   ;;  %v8949_v16 = vld [vmem:[#allocation6 + $0x208] ss:$16 sps:$4 sm:$0xff]  }
  0xc2   :  { %3069 = vmatpush1.bf16.msra.mxu0 %v8866_v27  ;;  %4227 = vmatpush1.bf16.msra.mxu1 %v8867_v28  ;;  %v178_v13 = vld [vmem:[#allocation3 + $0xc0] sm:$0xff]  ;;  %v203_v18 = vld [vmem:[#allocation3 + $0x188] sm:$0xff] }
  0xc3   :  { %3070 = vmatprep.subr.bf16.mxu0 %v8868_v29  ;;  %4228 = vmatprep.subr.bf16.mxu1 %v8870_v30  ;;  %v190_v14 = vld [vmem:[#allocation3 + $0x120] sm:$0xff]  ;;  %v215_v19 = vld [vmem:[#allocation3 + $0x1e8] sm:$0xff] }
  0xc4   :  { %v8930_v20 = vld [vmem:[#allocation6 + $0x244] ss:$16 sps:$4 sm:$0xff]   ;;  %v8954_v21 = vld [vmem:[#allocation6 + $0x22c] ss:$16 sps:$4 sm:$0xff]   ;;  %v550_v22 = vpack.c.bf16 %v190_v14, %v178_v13  ;;  %v563_v23 = vpack.c.bf16 %v215_v19, %v203_v18  ;;  %v8928_v24 = vld [vmem:[#allocation6 + $0x240] ss:$16 sps:$4 sm:$0xff]  }
  0xc5   :  { %v8952_v25 = vld [vmem:[#allocation6 + $0x228] ss:$16 sps:$4 sm:$0xff]   ;;  %v202_v26 = vld [vmem:[#allocation3 + $0x180] sm:$0xff]  ;;  %v8960_v28 = vld [vmem:[#allocation6 + $0x24c] ss:$16 sps:$4 sm:$0xff]  }
  0xc6   :  { %3071 = vmatpush1.bf16.msra.mxu0 %v8872_v31  ;;  %4229 = vmatpush1.bf16.msra.mxu1 %v8873_v32  ;;  %v8933_v27 = vld [vmem:[#allocation6 + $0x264] ss:$16 sps:$4 sm:$0xff]   ;;  %v227_v30 = vld [vmem:[#allocation3 + $0x248] sm:$0xff]  ;;  %v8931_v32 = vld [vmem:[#allocation6 + $0x260] ss:$16 sps:$4 sm:$0xff]  }
  0xc7   :  { %3072 = vmatprep.subr.bf16.mxu0 %v8874_v33  ;;  %4230 = vmatprep.subr.bf16.mxu1 %v8876_v34  ;;  %v214_v29 = vld [vmem:[#allocation3 + $0x1e0] sm:$0xff]  ;;  %v239_v31 = vld [vmem:[#allocation3 + $0x2a8] sm:$0xff] }
  0xc8   :  { %v8958_v33 = vld [vmem:[#allocation6 + $0x248] ss:$16 sps:$4 sm:$0xff]   ;;  %v8936_v34 = vld [vmem:[#allocation6 + $0x284] ss:$16 sps:$4 sm:$0xff]   ;;  %v8972_v49 = vld [vmem:[#allocation6 + $0x2ac] ss:$16 sps:$4 sm:$0xff]  }
  0xc9   :  { %v8967_v47 = vld [vmem:[#allocation6 + $0x288] ss:$16 sps:$4 sm:$0xff]   ;;  %v8957_v4 = vld [vmem:[#allocation6 + $0x324] ss:$16 sps:$4 sm:$0xff]   ;;  %v8987_v5 = vld [vmem:[#allocation6 + $0x30c] ss:$16 sps:$4 sm:$0xff]  }
  0xca   :  { %3073 = vmatpush1.bf16.msra.mxu0 %v8878_v35  ;;  %4231 = vmatpush1.bf16.msra.mxu1 %v8879_v36  ;;  %v8963_v35 = vld [vmem:[#allocation6 + $0x26c] ss:$16 sps:$4 sm:$0xff]   ;;  %v562_v36 = vpack.c.bf16 %v214_v29, %v202_v26  ;;  %v286_v7 = vld [vmem:[#allocation3 + $0x420] sm:$0xff] }
  0xcb   :  { %3074 = vmatprep.subr.bf16.mxu0 %v8880_v37  ;;  %4232 = vmatprep.subr.bf16.mxu1 %v8882_v38  ;;  %v575_v37 = vpack.c.bf16 %v239_v31, %v227_v30  ;;  %v8934_v38 = vld [vmem:[#allocation6 + $0x280] ss:$16 sps:$4 sm:$0xff]   ;;  %v299_v8 = vld [vmem:[#allocation3 + $0x488] sm:$0xff]  ;;  %v8975_v18 = vld [vmem:[#allocation6 + $0x364] ss:$16 sps:$4 sm:$0xff]  }
  0xcc   :  { %v8990_v13 = vld [vmem:[#allocation6 + $0x32c] ss:$16 sps:$4 sm:$0xff]   ;;  %v8984_v26 = vld [vmem:[#allocation6 + $0x384] ss:$16 sps:$4 sm:$0xff]   ;;  %v8982_v30 = vld [vmem:[#allocation6 + $0x380] ss:$16 sps:$4 sm:$0xff]  }
  0xcd   :  { %v8996_v19 = vld [vmem:[#allocation6 + $0x34c] ss:$16 sps:$4 sm:$0xff]   ;;  %v8997_v31 = vld [vmem:[#allocation6 + $0x368] ss:$16 sps:$4 sm:$0xff]  }
  0xce   :  { %3075 = vmatpush1.bf16.msra.mxu0 %v8884_v39  ;;  %4233 = vmatpush1.bf16.msra.mxu1 %v8885_v40  ;;  %v8961_v39 = vld [vmem:[#allocation6 + $0x268] ss:$16 sps:$4 sm:$0xff]   ;;  %v8939_v40 = vld [vmem:[#allocation6 + $0x2a4] ss:$16 sps:$4 sm:$0xff]  }
  0xcf   :  { %3076 = vmatprep.subr.bf16.mxu0 %v8886_v41  ;;  %4234 = vmatprep.subr.bf16.mxu1 %v8888_v42  ;;  %v8969_v41 = vld [vmem:[#allocation6 + $0x28c] ss:$16 sps:$4 sm:$0xff]   ;;  %v226_v42 = vld [vmem:[#allocation3 + $0x240] sm:$0xff] }
  0xd2   :  { %3077 = vmatpush1.bf16.msra.mxu0 %v8890_v43  ;;  %4235 = vmatpush1.bf16.msra.mxu1 %v8891_v44  ;;  %v238_v43 = vld [vmem:[#allocation3 + $0x2a0] sm:$0xff]  ;;  %v251_v44 = vld [vmem:[#allocation3 + $0x308] sm:$0xff] }
  0xd3   :  { %3078 = vmatprep.subr.bf16.mxu0 %v8892_v45  ;;  %4236 = vmatprep.subr.bf16.mxu1 %v8894_v46  ;;  %v263_v45 = vld [vmem:[#allocation3 + $0x368] sm:$0xff]  ;;  %v8937_v46 = vld [vmem:[#allocation6 + $0x2a0] ss:$16 sps:$4 sm:$0xff]  }
  0xd4   :  { %v587_v51 = vpack.c.bf16 %v263_v45, %v251_v44  ;;  %v9000_v44 = vld [vmem:[#allocation6 + $0x3c0] ss:$16 sps:$4 sm:$0xff]   ;;  %v9006_v45 = vld [vmem:[#allocation6 + $0x3a8] ss:$16 sps:$4 sm:$0xff]  }
  0xd6   :  { %3079 = vmatpush1.bf16.msra.mxu0 %v8896_v48  ;;  %4237 = vmatpush1.bf16.msra.mxu1 %v8897_v50  ;;  %v8942_v48 = vld [vmem:[#allocation6 + $0x2c4] ss:$16 sps:$4 sm:$0xff]   ;;  %v574_v50 = vpack.c.bf16 %v238_v43, %v226_v42 }
  0xd7   :  { %3080 = vmatprep.subr.bf16.mxu0 %v8898_v52  ;;  %4238 = vmatprep.subr.bf16.mxu1 %v8900_v53  ;;  %v8940_v52 = vld [vmem:[#allocation6 + $0x2c0] ss:$16 sps:$4 sm:$0xff]   ;;  %v8970_v53 = vld [vmem:[#allocation6 + $0x2a8] ss:$16 sps:$4 sm:$0xff]  }
  0xda   :  { %3081 = vmatpush1.bf16.msra.mxu0 %v8902_v54  ;;  %4239 = vmatpush1.bf16.msra.mxu1 %v8903_v55  ;;  %v250_v54 = vld [vmem:[#allocation3 + $0x300] sm:$0xff] }
  0xdb   :  { %3082 = vmatprep.subr.bf16.mxu0 %v8904_v56  ;;  %4240 = vmatprep.subr.bf16.mxu1 %v8906_v57  ;;  %v8945_v55 = vld [vmem:[#allocation6 + $0x2e4] ss:$16 sps:$4 sm:$0xff]   ;;  %v8978_v56 = vld [vmem:[#allocation6 + $0x2cc] ss:$16 sps:$4 sm:$0xff]  }
  0xdc   :  { %v262_v57 = vld [vmem:[#allocation3 + $0x360] sm:$0xff] }
  0xde   :  { %3083 = vmatpush1.bf16.msra.mxu0 %v8908_v58  ;;  %4241 = vmatpush1.bf16.msra.mxu1 %v8909_v59  ;;  %v275_v58 = vld [vmem:[#allocation3 + $0x3c8] sm:$0xff] }
  0xdf   :  { %3084 = vmatprep.subr.bf16.mxu0 %v8910_v60  ;;  %4242 = vmatprep.subr.bf16.mxu1 %v8912_v61  ;;  %v287_v59 = vld [vmem:[#allocation3 + $0x428] sm:$0xff]  ;;  %v8943_v60 = vld [vmem:[#allocation6 + $0x2e0] ss:$16 sps:$4 sm:$0xff]  }
  0xe0   :  { %v8976_v61 = vld [vmem:[#allocation6 + $0x2c8] ss:$16 sps:$4 sm:$0xff]  }
  0xe2   :  { %3085 = vmatpush1.bf16.msra.mxu0 %v8914_v62  ;;  %4243 = vmatpush1.bf16.msra.mxu1 %v8915_v63  ;;  %v8948_v62 = vld [vmem:[#allocation6 + $0x304] ss:$16 sps:$4 sm:$0xff]   ;;  %v8981_v63 = vld [vmem:[#allocation6 + $0x2ec] ss:$16 sps:$4 sm:$0xff]  }
  0xe3   :  { %3086 = vmatprep.subr.bf16.mxu0 %v8916_v0  ;;  %4244 = vmatprep.subr.bf16.mxu1 %v8918_v1  ;;  %v586_v0 = vpack.c.bf16 %v262_v57, %v250_v54  ;;  %v599_v1 = vpack.c.bf16 %v287_v59, %v275_v58  ;;  %v9017_v54 = vld [vmem:[#allocation6 + $0x3ec] ss:$16 sps:$4 sm:$0xff]   ;;  %v9015_v58 = vld [vmem:[#allocation6 + $0x3e8] ss:$16 sps:$4 sm:$0xff]   ;;  %v370_v59 = vld [vmem:[#allocation3 + $0x6c0] sm:$0xff] }
  0xe6   :  { %3087 = vmatpush1.bf16.msra.mxu0 %v8920_v2  ;;  %4245 = vmatpush1.bf16.msra.mxu1 %v8921_v3  ;;  %v8946_v2 = vld [vmem:[#allocation6 + $0x300] ss:$16 sps:$4 sm:$0xff]   ;;  %v8979_v3 = vld [vmem:[#allocation6 + $0x2e8] ss:$16 sps:$4 sm:$0xff]  }
  0xe7   :  { %3249 = vmatprep.subr.bf16.mxu0 %v8924_v6  ;;  %4407 = vmatprep.subr.bf16.mxu1 %v8951_v17  ;;  %v274_v6 = vld [vmem:[#allocation3 + $0x3c0] sm:$0xff]  ;;  %v8988_v17 = vld [vmem:[#allocation6 + $0x328] ss:$16 sps:$4 sm:$0xff]  }
  0xe8   :  { %v598_v14 = vpack.c.bf16 %v286_v7, %v274_v6 }
  0xe9   :  { %3089 = vmatmul.mubr.bf16.vlgmr.msra.gmra.mrb[0].mxu0 %v538_v9  ;;  %4247 = vmatmul.mubr.bf16.vlgmr.msra.gmra.mrb[0].mxu1 %v538_v9  ;;  %v311_v9 = vld [vmem:[#allocation3 + $0x4e8] sm:$0xff] }
  0xea   :  { %3250 = vmatpush1.bf16.msra.mxu0 %v8922_v10  ;;  %3098 = vmatprep.mubr.bf16.mxu0 %v551_v11  ;;  %v8955_v10 = vld [vmem:[#allocation6 + $0x320] ss:$16 sps:$4 sm:$0xff]  }
  0xeb   :  { %4256 = vmatprep.mubr.bf16.mxu1 %v551_v11  ;;  %3251 = vmatprep.subr.bf16.mxu0 %v8927_v12  ;;  %v8985_v11 = vld [vmem:[#allocation6 + $0x308] ss:$16 sps:$4 sm:$0xff]   ;;  %v8966_v12 = vld [vmem:[#allocation6 + $0x344] ss:$16 sps:$4 sm:$0xff]  }
  0xec   :  { %4408 = vmatpush1.bf16.msra.mxu1 %v8949_v16  ;;  %v8964_v16 = vld [vmem:[#allocation6 + $0x340] ss:$16 sps:$4 sm:$0xff]  }
  0xed   :  { %4409 = vmatprep.subr.bf16.mxu1 %v8954_v21  ;;  %v310_v21 = vld [vmem:[#allocation3 + $0x4e0] sm:$0xff] }
  0xee   :  { %3252 = vmatpush1.bf16.msra.mxu0 %v8925_v15  ;;  %v611_v15 = vpack.c.bf16 %v311_v9, %v299_v8  ;;  %v418_v8 = vld [vmem:[#allocation3 + $0x840] sm:$0xff] }
  0xef   :  { %3253 = vmatprep.subr.bf16.mxu0 %v8930_v20  ;;  %v298_v20 = vld [vmem:[#allocation3 + $0x480] sm:$0xff] }
  0xf0   :  { %4410 = vmatpush1.bf16.msra.mxu1 %v8952_v25  ;;  %v8994_v25 = vld [vmem:[#allocation6 + $0x348] ss:$16 sps:$4 sm:$0xff]   ;;  %v430_v9 = vld [vmem:[#allocation3 + $0x8a0] sm:$0xff] }
  0xf1   :  { %3099 = vmatmul.mubr.bf16.gmra.mrb[4].mxu0 %v550_v22  ;;  %4257 = vmatmul.mubr.bf16.gmra.mrb[4].mxu1 %v550_v22  ;;  %v323_v22 = vld [vmem:[#allocation3 + $0x548] sm:$0xff] }
  0xf2   :  { %3108 = vmatprep.mubr.bf16.mxu0 %v563_v23  ;;  %4266 = vmatprep.mubr.bf16.mxu1 %v563_v23  ;;  %v335_v23 = vld [vmem:[#allocation3 + $0x5a8] sm:$0xff] }
  0xf3   :  { %3254 = vmatpush1.bf16.msra.mxu0 %v8928_v24  ;;  %4411 = vmatprep.subr.bf16.mxu1 %v8960_v28  ;;  %v8973_v24 = vld [vmem:[#allocation6 + $0x360] ss:$16 sps:$4 sm:$0xff]   ;;  %v610_v28 = vpack.c.bf16 %v310_v21, %v298_v20  ;;  %v623_v29 = vpack.c.bf16 %v335_v23, %v323_v22  ;;  %v491_v22 = vld [vmem:[#allocation3 + $0xa88] sm:$0xff] }
  0xf4   :  { %3255 = vmatprep.subr.bf16.mxu0 %v8933_v27  ;;  %4412 = vmatpush1.bf16.msra.mxu1 %v8958_v33  ;;  %v8999_v27 = vld [vmem:[#allocation6 + $0x36c] ss:$16 sps:$4 sm:$0xff]   ;;  %v466_v20 = vld [vmem:[#allocation3 + $0x9c0] sm:$0xff] }
  0xf5   :  { %4413 = vmatprep.subr.bf16.mxu1 %v8963_v35  ;;  %v9005_v33 = vld [vmem:[#allocation6 + $0x38c] ss:$16 sps:$4 sm:$0xff]   ;;  %v334_v35 = vld [vmem:[#allocation3 + $0x5a0] sm:$0xff] }
  0xf6   :  { %v478_v21 = vld [vmem:[#allocation3 + $0xa20] sm:$0xff]  ;;  %v503_v23 = vld [vmem:[#allocation3 + $0xae8] sm:$0xff] }
  0xf7   :  { %3256 = vmatpush1.bf16.msra.mxu0 %v8931_v32  ;;  %v8993_v32 = vld [vmem:[#allocation6 + $0x3a4] ss:$16 sps:$4 sm:$0xff]  }
  0xf8   :  { %3257 = vmatprep.subr.bf16.mxu0 %v8936_v34  ;;  %4414 = vmatpush1.bf16.msra.mxu1 %v8961_v39  ;;  %v322_v34 = vld [vmem:[#allocation3 + $0x540] sm:$0xff]  ;;  %v9003_v39 = vld [vmem:[#allocation6 + $0x388] ss:$16 sps:$4 sm:$0xff]  }
  0xf9   :  { %3109 = vmatmul.mubr.bf16.gmra.mrb[8].mxu0 %v562_v36  ;;  %4267 = vmatmul.mubr.bf16.gmra.mrb[8].mxu1 %v562_v36  ;;  %v347_v36 = vld [vmem:[#allocation3 + $0x608] sm:$0xff]  ;;  %v622_v42 = vpack.c.bf16 %v334_v35, %v322_v34  ;;  %v157_v34 = vld [vmem:[#allocation3 + $0x18] sm:$0xff] }
  0xfa   :  { %3118 = vmatprep.mubr.bf16.mxu0 %v575_v37  ;;  %4276 = vmatprep.mubr.bf16.mxu1 %v575_v37  ;;  %v359_v37 = vld [vmem:[#allocation3 + $0x668] sm:$0xff]  ;;  %v169_v35 = vld [vmem:[#allocation3 + $0x78] sm:$0xff] }
  0xfb   :  { %3258 = vmatpush1.bf16.msra.mxu0 %v8934_v38  ;;  %4415 = vmatprep.subr.bf16.mxu1 %v8969_v41  ;;  %v8991_v38 = vld [vmem:[#allocation6 + $0x3a0] ss:$16 sps:$4 sm:$0xff]   ;;  %v9008_v41 = vld [vmem:[#allocation6 + $0x3ac] ss:$16 sps:$4 sm:$0xff]   ;;  %v635_v43 = vpack.c.bf16 %v359_v37, %v347_v36  ;;  %v541_v37 = vpack.c.bf16 %v169_v35, %v157_v34 }
  0xfc   :  { %3259 = vmatprep.subr.bf16.mxu0 %v8939_v40  ;;  %4416 = vmatpush1.bf16.msra.mxu1 %v8967_v47  ;;  %v9002_v40 = vld [vmem:[#allocation6 + $0x3c4] ss:$16 sps:$4 sm:$0xff]   ;;  %v9014_v47 = vld [vmem:[#allocation6 + $0x3cc] ss:$16 sps:$4 sm:$0xff]   ;;  %v9042_v34 = vld [vmem:[#allocation6 + $0x500] ss:$16 sps:$4 sm:$0xff]  }
  0xfd   :  { %4417 = vmatprep.subr.bf16.mxu1 %v8972_v49  ;;  %v358_v49 = vld [vmem:[#allocation3 + $0x660] sm:$0xff]  ;;  %v9083_v35 = vld [vmem:[#allocation6 + $0x50c] ss:$16 sps:$4 sm:$0xff]  }
  0xff   :  { %3260 = vmatpush1.bf16.msra.mxu0 %v8937_v46  ;;  %v9011_v46 = vld [vmem:[#allocation6 + $0x3e4] ss:$16 sps:$4 sm:$0xff]  }
 0x100   :  { %3261 = vmatprep.subr.bf16.mxu0 %v8942_v48  ;;  %4418 = vmatpush1.bf16.msra.mxu1 %v8970_v53  ;;  %v346_v48 = vld [vmem:[#allocation3 + $0x600] sm:$0xff]  ;;  %v9012_v53 = vld [vmem:[#allocation6 + $0x3c8] ss:$16 sps:$4 sm:$0xff]  }
 0x101   :  { %3119 = vmatmul.mubr.bf16.gmra.mrb[12].mxu0 %v574_v50  ;;  %4277 = vmatmul.mubr.bf16.gmra.mrb[12].mxu1 %v574_v50  ;;  %v371_v50 = vld [vmem:[#allocation3 + $0x6c8] sm:$0xff] }
 0x102   :  { %3128 = vmatprep.mubr.bf16.mxu0 %v587_v51  ;;  %4286 = vmatprep.mubr.bf16.mxu1 %v587_v51  ;;  %v383_v51 = vld [vmem:[#allocation3 + $0x728] sm:$0xff] }
 0x103   :  { %3262 = vmatpush1.bf16.msra.mxu0 %v8940_v52  ;;  %4419 = vmatprep.subr.bf16.mxu1 %v8978_v56  ;;  %v9009_v52 = vld [vmem:[#allocation6 + $0x3e0] ss:$16 sps:$4 sm:$0xff]   ;;  %v634_v56 = vpack.c.bf16 %v358_v49, %v346_v48  ;;  %v647_v57 = vpack.c.bf16 %v383_v51, %v371_v50  ;;  %v9050_v50 = vld [vmem:[#allocation6 + $0x42c] ss:$16 sps:$4 sm:$0xff]  }
 0x104   :  { %3263 = vmatprep.subr.bf16.mxu0 %v8945_v55  ;;  %4420 = vmatpush1.bf16.msra.mxu1 %v8976_v61  ;;  %v9020_v55 = vld [vmem:[#allocation6 + $0x404] ss:$16 sps:$4 sm:$0xff]   ;;  %v9021_v49 = vld [vmem:[#allocation6 + $0x420] ss:$16 sps:$4 sm:$0xff]   ;;  %v205_v51 = vld [vmem:[#allocation3 + $0x198] sm:$0xff] }
 0x105   :  { %4421 = vmatprep.subr.bf16.mxu1 %v8981_v63  ;;  %v382_v61 = vld [vmem:[#allocation3 + $0x720] sm:$0xff]  ;;  %v407_v63 = vld [vmem:[#allocation3 + $0x7e8] sm:$0xff]  ;;  %v192_v48 = vld [vmem:[#allocation3 + $0x130] sm:$0xff] }
 0x107   :  { %3264 = vmatpush1.bf16.msra.mxu0 %v8943_v60  ;;  %v9047_v60 = vld [vmem:[#allocation6 + $0x40c] ss:$16 sps:$4 sm:$0xff]  }
 0x108   :  { %3265 = vmatprep.subr.bf16.mxu0 %v8948_v62  ;;  %4422 = vmatpush1.bf16.msra.mxu1 %v8979_v3  ;;  %v395_v62 = vld [vmem:[#allocation3 + $0x788] sm:$0xff]  ;;  %v406_v3 = vld [vmem:[#allocation3 + $0x7e0] sm:$0xff] }
 0x109   :  { %3129 = vmatmul.mubr.bf16.gmra.mrb[16].mxu0 %v586_v0  ;;  %4287 = vmatmul.mubr.bf16.gmra.mrb[16].mxu1 %v586_v0  ;;  %v646_v0 = vpack.c.bf16 %v382_v61, %v370_v59  ;;  %v9029_v59 = vld [vmem:[#allocation6 + $0x464] ss:$16 sps:$4 sm:$0xff]  }
 0x10a   :  { %3138 = vmatprep.mubr.bf16.mxu0 %v599_v1  ;;  %4296 = vmatprep.mubr.bf16.mxu1 %v599_v1  ;;  %v659_v1 = vpack.c.bf16 %v407_v63, %v395_v62  ;;  %v204_v61 = vld [vmem:[#allocation3 + $0x190] sm:$0xff]  ;;  %v229_v63 = vld [vmem:[#allocation3 + $0x258] sm:$0xff] }
 0x10b   :  { %3266 = vmatpush1.bf16.msra.mxu0 %v8946_v2  ;;  %4423 = vmatprep.subr.bf16.mxu1 %v8987_v5  ;;  %v394_v2 = vld [vmem:[#allocation3 + $0x780] sm:$0xff]  ;;  %v431_v5 = vld [vmem:[#allocation3 + $0x8a8] sm:$0xff]  ;;  %v216_v62 = vld [vmem:[#allocation3 + $0x1f0] sm:$0xff] }
 0x10c   :  { %3267 = vmatprep.subr.bf16.mxu0 %v8957_v4  ;;  %4424 = vmatpush1.bf16.msra.mxu1 %v8985_v11  ;;  %v419_v4 = vld [vmem:[#allocation3 + $0x848] sm:$0xff]  ;;  %v658_v6 = vpack.c.bf16 %v406_v3, %v394_v2  ;;  %v9027_v2 = vld [vmem:[#allocation6 + $0x460] ss:$16 sps:$4 sm:$0xff]   ;;  %v9032_v3 = vld [vmem:[#allocation6 + $0x484] ss:$16 sps:$4 sm:$0xff]  }
 0x10d   :  { %4425 = vmatprep.subr.bf16.mxu1 %v8990_v13  ;;  %v671_v7 = vpack.c.bf16 %v431_v5, %v419_v4  ;;  %v455_v11 = vld [vmem:[#allocation3 + $0x968] sm:$0xff]  ;;  %v564_v5 = vpack.c.bf16 %v216_v62, %v204_v61  ;;  %v9078_v62 = vld [vmem:[#allocation6 + $0x580] ss:$16 sps:$4 sm:$0xff]  }
 0x10e   :  { %v9057_v4 = vld [vmem:[#allocation6 + $0x468] ss:$16 sps:$4 sm:$0xff]  }
 0x10f   :  { %3268 = vmatpush1.bf16.msra.mxu0 %v8955_v10  ;;  %v443_v10 = vld [vmem:[#allocation3 + $0x908] sm:$0xff] }
 0x110   :  { %3269 = vmatprep.subr.bf16.mxu0 %v8966_v12  ;;  %4426 = vmatpush1.bf16.msra.mxu1 %v8988_v17  ;;  %v670_v12 = vpack.c.bf16 %v430_v9, %v418_v8  ;;  %v683_v13 = vpack.c.bf16 %v455_v11, %v443_v10  ;;  %v479_v17 = vld [vmem:[#allocation3 + $0xa28] sm:$0xff]  ;;  %v9035_v9 = vld [vmem:[#allocation6 + $0x4a4] ss:$16 sps:$4 sm:$0xff]  }
 0x111   :  { %3139 = vmatmul.mubr.bf16.gmra.mrb[20].mxu0 %v598_v14  ;;  %4297 = vmatmul.mubr.bf16.gmra.mrb[20].mxu1 %v598_v14  ;;  %v442_v14 = vld [vmem:[#allocation3 + $0x900] sm:$0xff]  ;;  %v9063_v10 = vld [vmem:[#allocation6 + $0x488] ss:$16 sps:$4 sm:$0xff]   ;;  %v228_v11 = vld [vmem:[#allocation3 + $0x250] sm:$0xff] }
 0x112   :  { %3148 = vmatprep.mubr.bf16.mxu0 %v611_v15  ;;  %4306 = vmatprep.mubr.bf16.mxu1 %v611_v15  ;;  %v454_v15 = vld [vmem:[#allocation3 + $0x960] sm:$0xff] }
 0x113   :  { %3270 = vmatpush1.bf16.msra.mxu0 %v8964_v16  ;;  %4427 = vmatprep.subr.bf16.mxu1 %v8996_v19  ;;  %v467_v16 = vld [vmem:[#allocation3 + $0x9c8] sm:$0xff] }
 0x114   :  { %3271 = vmatprep.subr.bf16.mxu0 %v8975_v18  ;;  %4428 = vmatpush1.bf16.msra.mxu1 %v8994_v25  ;;  %v682_v18 = vpack.c.bf16 %v454_v15, %v442_v14  ;;  %v695_v19 = vpack.c.bf16 %v479_v17, %v467_v16  ;;  %v707_v25 = vpack.c.bf16 %v503_v23, %v491_v22  ;;  %v265_v14 = vld [vmem:[#allocation3 + $0x378] sm:$0xff]  ;;  %v9033_v16 = vld [vmem:[#allocation6 + $0x4a0] ss:$16 sps:$4 sm:$0xff]   ;;  %v9038_v17 = vld [vmem:[#allocation6 + $0x4c4] ss:$16 sps:$4 sm:$0xff]  }
 0x115   :  { %4429 = vmatprep.subr.bf16.mxu1 %v8999_v27  ;;  %v502_v27 = vld [vmem:[#allocation3 + $0xae0] sm:$0xff]  ;;  %v9068_v15 = vld [vmem:[#allocation6 + $0x4ac] ss:$16 sps:$4 sm:$0xff]  }
 0x116   :  { %v9041_v23 = vld [vmem:[#allocation6 + $0x4e4] ss:$16 sps:$4 sm:$0xff]  }
 0x117   :  { %3272 = vmatpush1.bf16.msra.mxu0 %v8973_v24  ;;  %v694_v24 = vpack.c.bf16 %v478_v21, %v466_v20  ;;  %v9036_v20 = vld [vmem:[#allocation6 + $0x4c0] ss:$16 sps:$4 sm:$0xff]   ;;  %v9074_v21 = vld [vmem:[#allocation6 + $0x4cc] ss:$16 sps:$4 sm:$0xff]  }
 0x118   :  { %3273 = vmatprep.subr.bf16.mxu0 %v8984_v26  ;;  %4430 = vmatpush1.bf16.msra.mxu1 %v8997_v31  ;;  %v490_v26 = vld [vmem:[#allocation3 + $0xa80] sm:$0xff] }
 0x119   :  { %3149 = vmatmul.mubr.bf16.gmra.mrb[24].mxu0 %v610_v28  ;;  %4307 = vmatmul.mubr.bf16.gmra.mrb[24].mxu1 %v610_v28  ;;  %v515_v28 = vld [vmem:[#allocation3 + $0xb48] sm:$0xff] }
 0x11a   :  { %3158 = vmatprep.mubr.bf16.mxu0 %v623_v29  ;;  %4316 = vmatprep.mubr.bf16.mxu1 %v623_v29  ;;  %v527_v29 = vld [vmem:[#allocation3 + $0xba8] sm:$0xff] }
 0x11b   :  { %3274 = vmatpush1.bf16.msra.mxu0 %v8982_v30  ;;  %4431 = vmatprep.subr.bf16.mxu1 %v9005_v33  ;;  %v706_v30 = vpack.c.bf16 %v502_v27, %v490_v26  ;;  %v719_v31 = vpack.c.bf16 %v527_v29, %v515_v28  ;;  %v526_v33 = vld [vmem:[#allocation3 + $0xba0] sm:$0xff]  ;;  %v264_v26 = vld [vmem:[#allocation3 + $0x370] sm:$0xff]  ;;  %v277_v27 = vld [vmem:[#allocation3 + $0x3d8] sm:$0xff] }
 0x11c   :  { %3275 = vmatprep.subr.bf16.mxu0 %v8993_v32  ;;  %4432 = vmatpush1.bf16.msra.mxu1 %v9003_v39  ;;  %v514_v32 = vld [vmem:[#allocation3 + $0xb40] sm:$0xff]  ;;  %v168_v39 = vld [vmem:[#allocation3 + $0x70] sm:$0xff]  ;;  %v289_v28 = vld [vmem:[#allocation3 + $0x438] sm:$0xff] }
 0x11d   :  { %4433 = vmatprep.subr.bf16.mxu1 %v9008_v41  ;;  %v718_v36 = vpack.c.bf16 %v526_v33, %v514_v32  ;;  %v193_v41 = vld [vmem:[#allocation3 + $0x138] sm:$0xff] }
 0x11e   :  { %v9077_v29 = vld [vmem:[#allocation6 + $0x4ec] ss:$16 sps:$4 sm:$0xff]   ;;  %v9075_v32 = vld [vmem:[#allocation6 + $0x4e8] ss:$16 sps:$4 sm:$0xff]  }
 0x11f   :  { %3276 = vmatpush1.bf16.msra.mxu0 %v8991_v38  ;;  %v156_v38 = vld [vmem:[#allocation3 + $0x10] sm:$0xff] }
 0x120   :  { %3277 = vmatprep.subr.bf16.mxu0 %v9002_v40  ;;  %4434 = vmatpush1.bf16.msra.mxu1 %v9006_v45  ;;  %v181_v40 = vld [vmem:[#allocation3 + $0xd8] sm:$0xff] }
 0x121   :  { %3159 = vmatmul.mubr.bf16.gmra.mrb[28].mxu0 %v622_v42  ;;  %4317 = vmatmul.mubr.bf16.gmra.mrb[28].mxu1 %v622_v42  ;;  %v9018_v42 = vld [vmem:[#allocation6 + $0x400] ss:$16 sps:$4 sm:$0xff]   ;;  %v553_v45 = vpack.c.bf16 %v193_v41, %v181_v40  ;;  %v301_v41 = vld [vmem:[#allocation3 + $0x498] sm:$0xff] }
 0x122   :  { %3168 = vmatprep.mubr.bf16.mxu0 %v635_v43  ;;  %4326 = vmatprep.mubr.bf16.mxu1 %v635_v43  ;;  %v540_v43 = vpack.c.bf16 %v168_v39, %v156_v38  ;;  %v9081_v38 = vld [vmem:[#allocation6 + $0x508] ss:$16 sps:$4 sm:$0xff]   ;;  %v276_v39 = vld [vmem:[#allocation3 + $0x3d0] sm:$0xff] }
 0x123   :  { %3278 = vmatpush1.bf16.msra.mxu0 %v9000_v44  ;;  %4435 = vmatprep.subr.bf16.mxu1 %v9014_v47  ;;  %v9023_v44 = vld [vmem:[#allocation6 + $0x424] ss:$16 sps:$4 sm:$0xff]  }
 0x124   :  { %3279 = vmatprep.subr.bf16.mxu0 %v9011_v46  ;;  %4436 = vmatpush1.bf16.msra.mxu1 %v9012_v53  ;;  %v9045_v46 = vld [vmem:[#allocation6 + $0x408] ss:$16 sps:$4 sm:$0xff]   ;;  %v180_v47 = vld [vmem:[#allocation3 + $0xd0] sm:$0xff] }
 0x125   :  { %4437 = vmatprep.subr.bf16.mxu1 %v9017_v54  ;;  %v9026_v53 = vld [vmem:[#allocation6 + $0x444] ss:$16 sps:$4 sm:$0xff]   ;;  %v9048_v54 = vld [vmem:[#allocation6 + $0x428] ss:$16 sps:$4 sm:$0xff]  }
 0x126   :  { %v288_v40 = vld [vmem:[#allocation3 + $0x430] sm:$0xff] }
 0x127   :  { %3280 = vmatpush1.bf16.msra.mxu0 %v9009_v52  ;;  %v217_v52 = vld [vmem:[#allocation3 + $0x1f8] sm:$0xff] }
 0x128   :  { %3442 = vmatprep.subr.bf16.mxu0 %v9020_v55  ;;  %4438 = vmatpush1.bf16.msra.mxu1 %v9015_v58  ;;  %v552_v55 = vpack.c.bf16 %v192_v48, %v180_v47  ;;  %v565_v58 = vpack.c.bf16 %v217_v52, %v205_v51  ;;  %v600_v47 = vpack.c.bf16 %v288_v40, %v276_v39  ;;  %v9060_v48 = vld [vmem:[#allocation6 + $0x540] ss:$16 sps:$4 sm:$0xff]   ;;  %v9071_v51 = vld [vmem:[#allocation6 + $0x564] ss:$16 sps:$4 sm:$0xff]   ;;  %v9090_v52 = vld [vmem:[#allocation6 + $0x548] ss:$16 sps:$4 sm:$0xff]  }
 0x129   :  { %3169 = vmatmul.mubr.bf16.gmra.mrb[32].mxu0 %v634_v56  ;;  %4327 = vmatmul.mubr.bf16.gmra.mrb[32].mxu1 %v634_v56  ;;  %v9024_v56 = vld [vmem:[#allocation6 + $0x440] ss:$16 sps:$4 sm:$0xff]  }
 0x12a   :  { %3178 = vmatprep.mubr.bf16.mxu0 %v647_v57  ;;  %4336 = vmatprep.mubr.bf16.mxu1 %v647_v57  ;;  %v9056_v57 = vld [vmem:[#allocation6 + $0x44c] ss:$16 sps:$4 sm:$0xff]   ;;  %v420_v40 = vld [vmem:[#allocation3 + $0x850] sm:$0xff] }
 0x12b   :  { %4600 = vmatprep.subr.bf16.mxu1 %v9047_v60  ;;  %v9054_v60 = vld [vmem:[#allocation6 + $0x448] ss:$16 sps:$4 sm:$0xff]  }
 0x131   :  { %3179 = vmatmul.mubr.bf16.gmra.mrb[36].mxu0 %v646_v0  ;;  %4337 = vmatmul.mubr.bf16.gmra.mrb[36].mxu1 %v646_v0  ;;  %v241_v0 = vld [vmem:[#allocation3 + $0x2b8] sm:$0xff] }
 0x132   :  { %3188 = vmatprep.mubr.bf16.mxu0 %v659_v1  ;;  %4346 = vmatprep.mubr.bf16.mxu1 %v659_v1  ;;  %v9059_v1 = vld [vmem:[#allocation6 + $0x46c] ss:$16 sps:$4 sm:$0xff]   ;;  %v577_v8 = vpack.c.bf16 %v241_v0, %v229_v63 }
 0x133   :  { %v9101_v63 = vld [vmem:[#allocation6 + $0x58c] ss:$16 sps:$4 sm:$0xff]  }
 0x139   :  { %3189 = vmatmul.mubr.bf16.gmra.mrb[40].mxu0 %v658_v6  ;;  %4347 = vmatmul.mubr.bf16.gmra.mrb[40].mxu1 %v658_v6  ;;  %v9030_v6 = vld [vmem:[#allocation6 + $0x480] ss:$16 sps:$4 sm:$0xff]  }
 0x13a   :  { %3198 = vmatprep.mubr.bf16.mxu0 %v671_v7  ;;  %4356 = vmatprep.mubr.bf16.mxu1 %v671_v7  ;;  %v9065_v7 = vld [vmem:[#allocation6 + $0x48c] ss:$16 sps:$4 sm:$0xff]  }
 0x141   :  { %3199 = vmatmul.mubr.bf16.gmra.mrb[44].mxu0 %v670_v12  ;;  %4357 = vmatmul.mubr.bf16.gmra.mrb[44].mxu1 %v670_v12  ;;  %v240_v12 = vld [vmem:[#allocation3 + $0x2b0] sm:$0xff] }
 0x142   :  { %3208 = vmatprep.mubr.bf16.mxu0 %v683_v13  ;;  %4366 = vmatprep.mubr.bf16.mxu1 %v683_v13  ;;  %v253_v13 = vld [vmem:[#allocation3 + $0x318] sm:$0xff] }
 0x143   :  { %v589_v22 = vpack.c.bf16 %v265_v14, %v253_v13  ;;  %v9110_v13 = vld [vmem:[#allocation6 + $0x5cc] ss:$16 sps:$4 sm:$0xff]  }
 0x149   :  { %3209 = vmatmul.mubr.bf16.gmra.mrb[48].mxu0 %v682_v18  ;;  %4367 = vmatmul.mubr.bf16.gmra.mrb[48].mxu1 %v682_v18  ;;  %v9066_v18 = vld [vmem:[#allocation6 + $0x4a8] ss:$16 sps:$4 sm:$0xff]  }
 0x14a   :  { %3218 = vmatprep.mubr.bf16.mxu0 %v695_v19  ;;  %4376 = vmatprep.mubr.bf16.mxu1 %v695_v19  ;;  %v576_v19 = vpack.c.bf16 %v240_v12, %v228_v11  ;;  %v9096_v12 = vld [vmem:[#allocation6 + $0x5c0] ss:$16 sps:$4 sm:$0xff]  }
 0x151   :  { %3219 = vmatmul.mubr.bf16.gmra.mrb[52].mxu0 %v694_v24  ;;  %4377 = vmatmul.mubr.bf16.gmra.mrb[52].mxu1 %v694_v24  ;;  %v9072_v24 = vld [vmem:[#allocation6 + $0x4c8] ss:$16 sps:$4 sm:$0xff]  }
 0x152   :  { %3228 = vmatprep.mubr.bf16.mxu0 %v707_v25  ;;  %4386 = vmatprep.mubr.bf16.mxu1 %v707_v25  ;;  %v252_v25 = vld [vmem:[#allocation3 + $0x310] sm:$0xff] }
 0x153   :  { %v588_v33 = vpack.c.bf16 %v264_v26, %v252_v25 }
 0x159   :  { %3229 = vmatmul.mubr.bf16.gmra.mrb[56].mxu0 %v706_v30  ;;  %4387 = vmatmul.mubr.bf16.gmra.mrb[56].mxu1 %v706_v30  ;;  %v9039_v30 = vld [vmem:[#allocation6 + $0x4e0] ss:$16 sps:$4 sm:$0xff]  }
 0x15a   :  { %3238 = vmatprep.mubr.bf16.mxu0 %v719_v31  ;;  %4396 = vmatprep.mubr.bf16.mxu1 %v719_v31  ;;  %v9044_v31 = vld [vmem:[#allocation6 + $0x504] ss:$16 sps:$4 sm:$0xff]  }
 0x161   :  { %3239 = vmatmul.mubr.bf16.gmra.mrb[60].mxu0 %v718_v36  ;;  %4397 = vmatmul.mubr.bf16.gmra.mrb[60].mxu1 %v718_v36  ;;  %v601_v36 = vpack.c.bf16 %v289_v28, %v277_v27  ;;  %v9143_v27 = vld [vmem:[#allocation6 + $0x60c] ss:$16 sps:$4 sm:$0xff]   ;;  %v372_v28 = vld [vmem:[#allocation3 + $0x6d0] sm:$0xff] }
 0x162   :  { %3281 = vmatprep.mubr.bf16.mxu0 %v541_v37  ;;  %4439 = vmatprep.mubr.bf16.mxu1 %v541_v37  ;;  %v9053_v37 = vld [vmem:[#allocation6 + $0x524] ss:$16 sps:$4 sm:$0xff]  }
 0x169   :  { %3282 = vmatmul.mubr.bf16.vlgmr.msra.gmra.mrb[0].mxu0 %v540_v43  ;;  %4440 = vmatmul.mubr.bf16.vlgmr.msra.gmra.mrb[0].mxu1 %v540_v43  ;;  %v9086_v43 = vld [vmem:[#allocation6 + $0x52c] ss:$16 sps:$4 sm:$0xff]  }
 0x16a   :  { %3443 = vmatpush1.bf16.msra.mxu0 %v9018_v42  ;;  %3291 = vmatprep.mubr.bf16.mxu0 %v553_v45  ;;  %v313_v42 = vld [vmem:[#allocation3 + $0x4f8] sm:$0xff] }
 0x16b   :  { %4449 = vmatprep.mubr.bf16.mxu1 %v553_v45  ;;  %3444 = vmatprep.subr.bf16.mxu0 %v9023_v44  ;;  %v9051_v44 = vld [vmem:[#allocation6 + $0x520] ss:$16 sps:$4 sm:$0xff]   ;;  %v9062_v45 = vld [vmem:[#allocation6 + $0x544] ss:$16 sps:$4 sm:$0xff]  }
 0x16c   :  { %4601 = vmatpush1.bf16.msra.mxu1 %v9045_v46  ;;  %v9084_v46 = vld [vmem:[#allocation6 + $0x528] ss:$16 sps:$4 sm:$0xff]  }
 0x16d   :  { %4602 = vmatprep.subr.bf16.mxu1 %v9050_v50  ;;  %v613_v50 = vpack.c.bf16 %v313_v42, %v301_v41  ;;  %v432_v41 = vld [vmem:[#allocation3 + $0x8b0] sm:$0xff]  ;;  %v445_v42 = vld [vmem:[#allocation3 + $0x918] sm:$0xff] }
 0x16e   :  { %3445 = vmatpush1.bf16.msra.mxu0 %v9021_v49  ;;  %v9092_v49 = vld [vmem:[#allocation6 + $0x54c] ss:$16 sps:$4 sm:$0xff]  }
 0x16f   :  { %3446 = vmatprep.subr.bf16.mxu0 %v9026_v53  ;;  %v300_v53 = vld [vmem:[#allocation3 + $0x490] sm:$0xff] }
 0x170   :  { %4603 = vmatpush1.bf16.msra.mxu1 %v9048_v54  ;;  %v312_v54 = vld [vmem:[#allocation3 + $0x4f0] sm:$0xff] }
 0x171   :  { %3292 = vmatmul.mubr.bf16.gmra.mrb[4].mxu0 %v552_v55  ;;  %4450 = vmatmul.mubr.bf16.gmra.mrb[4].mxu1 %v552_v55  ;;  %v325_v55 = vld [vmem:[#allocation3 + $0x558] sm:$0xff]  ;;  %v612_v61 = vpack.c.bf16 %v312_v54, %v300_v53  ;;  %v480_v53 = vld [vmem:[#allocation3 + $0xa30] sm:$0xff] }
 0x172   :  { %3301 = vmatprep.mubr.bf16.mxu0 %v565_v58  ;;  %4459 = vmatprep.mubr.bf16.mxu1 %v565_v58  ;;  %v9069_v58 = vld [vmem:[#allocation6 + $0x560] ss:$16 sps:$4 sm:$0xff]   ;;  %v493_v54 = vld [vmem:[#allocation3 + $0xa98] sm:$0xff] }
 0x173   :  { %3447 = vmatpush1.bf16.msra.mxu0 %v9024_v56  ;;  %4604 = vmatprep.subr.bf16.mxu1 %v9056_v57  ;;  %v337_v56 = vld [vmem:[#allocation3 + $0x5b8] sm:$0xff] }
 0x174   :  { %3448 = vmatprep.subr.bf16.mxu0 %v9029_v59  ;;  %4605 = vmatpush1.bf16.msra.mxu1 %v9054_v60  ;;  %v9095_v57 = vld [vmem:[#allocation6 + $0x56c] ss:$16 sps:$4 sm:$0xff]   ;;  %v9080_v59 = vld [vmem:[#allocation6 + $0x584] ss:$16 sps:$4 sm:$0xff]   ;;  %v9093_v60 = vld [vmem:[#allocation6 + $0x568] ss:$16 sps:$4 sm:$0xff]   ;;  %v625_v0 = vpack.c.bf16 %v337_v56, %v325_v55 }
 0x175   :  { %4606 = vmatprep.subr.bf16.mxu1 %v9059_v1  ;;  %v9089_v1 = vld [vmem:[#allocation6 + $0x5a4] ss:$16 sps:$4 sm:$0xff]   ;;  %v505_v55 = vld [vmem:[#allocation3 + $0xaf8] sm:$0xff] }
 0x177   :  { %3449 = vmatpush1.bf16.msra.mxu0 %v9027_v2  ;;  %v9099_v2 = vld [vmem:[#allocation6 + $0x588] ss:$16 sps:$4 sm:$0xff]  }
 0x178   :  { %3450 = vmatprep.subr.bf16.mxu0 %v9032_v3  ;;  %4607 = vmatpush1.bf16.msra.mxu1 %v9057_v4  ;;  %v324_v3 = vld [vmem:[#allocation3 + $0x550] sm:$0xff] }
 0x179   :  { %3302 = vmatmul.mubr.bf16.gmra.mrb[8].mxu0 %v564_v5  ;;  %4460 = vmatmul.mubr.bf16.gmra.mrb[8].mxu1 %v564_v5  ;;  %v336_v4 = vld [vmem:[#allocation3 + $0x5b0] sm:$0xff]  ;;  %v349_v5 = vld [vmem:[#allocation3 + $0x618] sm:$0xff] }
 0x17a   :  { %3311 = vmatprep.mubr.bf16.mxu0 %v577_v8  ;;  %4469 = vmatprep.mubr.bf16.mxu1 %v577_v8  ;;  %v9087_v8 = vld [vmem:[#allocation6 + $0x5a0] ss:$16 sps:$4 sm:$0xff]   ;;  %v624_v11 = vpack.c.bf16 %v336_v4, %v324_v3  ;;  %v171_v3 = vld [vmem:[#allocation3 + $0x88] sm:$0xff] }
 0x17b   :  { %3451 = vmatpush1.bf16.msra.mxu0 %v9030_v6  ;;  %4608 = vmatprep.subr.bf16.mxu1 %v9065_v7  ;;  %v361_v6 = vld [vmem:[#allocation3 + $0x678] sm:$0xff] }
 0x17c   :  { %3452 = vmatprep.subr.bf16.mxu0 %v9035_v9  ;;  %4609 = vmatpush1.bf16.msra.mxu1 %v9063_v10  ;;  %v9104_v7 = vld [vmem:[#allocation6 + $0x5ac] ss:$16 sps:$4 sm:$0xff]   ;;  %v9098_v9 = vld [vmem:[#allocation6 + $0x5c4] ss:$16 sps:$4 sm:$0xff]   ;;  %v9102_v10 = vld [vmem:[#allocation6 + $0x5a8] ss:$16 sps:$4 sm:$0xff]   ;;  %v637_v14 = vpack.c.bf16 %v361_v6, %v349_v5 }
 0x17d   :  { %4610 = vmatprep.subr.bf16.mxu1 %v9068_v15  ;;  %v9107_v15 = vld [vmem:[#allocation6 + $0x5e4] ss:$16 sps:$4 sm:$0xff]  }
 0x17e   :  { %v158_v6 = vld [vmem:[#allocation3 + $0x20] sm:$0xff] }
 0x17f   :  { %3453 = vmatpush1.bf16.msra.mxu0 %v9033_v16  ;;  %v9108_v16 = vld [vmem:[#allocation6 + $0x5c8] ss:$16 sps:$4 sm:$0xff]  }
 0x180   :  { %3454 = vmatprep.subr.bf16.mxu0 %v9038_v17  ;;  %4611 = vmatpush1.bf16.msra.mxu1 %v9066_v18  ;;  %v348_v17 = vld [vmem:[#allocation3 + $0x610] sm:$0xff] }
 0x181   :  { %3312 = vmatmul.mubr.bf16.gmra.mrb[12].mxu0 %v576_v19  ;;  %4470 = vmatmul.mubr.bf16.gmra.mrb[12].mxu1 %v576_v19  ;;  %v360_v18 = vld [vmem:[#allocation3 + $0x670] sm:$0xff]  ;;  %v373_v19 = vld [vmem:[#allocation3 + $0x6d8] sm:$0xff] }
 0x182   :  { %3321 = vmatprep.mubr.bf16.mxu0 %v589_v22  ;;  %4479 = vmatprep.mubr.bf16.mxu1 %v589_v22  ;;  %v9105_v22 = vld [vmem:[#allocation6 + $0x5e0] ss:$16 sps:$4 sm:$0xff]   ;;  %v636_v25 = vpack.c.bf16 %v360_v18, %v348_v17 }
 0x183   :  { %3455 = vmatpush1.bf16.msra.mxu0 %v9036_v20  ;;  %4612 = vmatprep.subr.bf16.mxu1 %v9074_v21  ;;  %v385_v20 = vld [vmem:[#allocation3 + $0x738] sm:$0xff]  ;;  %v194_v17 = vld [vmem:[#allocation3 + $0x140] sm:$0xff] }
 0x184   :  { %3456 = vmatprep.subr.bf16.mxu0 %v9041_v23  ;;  %4613 = vmatpush1.bf16.msra.mxu1 %v9072_v24  ;;  %v9113_v21 = vld [vmem:[#allocation6 + $0x5ec] ss:$16 sps:$4 sm:$0xff]   ;;  %v9111_v23 = vld [vmem:[#allocation6 + $0x5e8] ss:$16 sps:$4 sm:$0xff]   ;;  %v9116_v24 = vld [vmem:[#allocation6 + $0x604] ss:$16 sps:$4 sm:$0xff]   ;;  %v649_v26 = vpack.c.bf16 %v385_v20, %v373_v19 }
 0x185   :  { %4614 = vmatprep.subr.bf16.mxu1 %v9077_v29  ;;  %v384_v29 = vld [vmem:[#allocation3 + $0x730] sm:$0xff]  ;;  %v207_v19 = vld [vmem:[#allocation3 + $0x1a8] sm:$0xff] }
 0x186   :  { %v9117_v18 = vld [vmem:[#allocation6 + $0x620] ss:$16 sps:$4 sm:$0xff]   ;;  %v219_v20 = vld [vmem:[#allocation3 + $0x208] sm:$0xff] }
 0x187   :  { %3457 = vmatpush1.bf16.msra.mxu0 %v9039_v30  ;;  %v397_v30 = vld [vmem:[#allocation3 + $0x798] sm:$0xff] }
 0x188   :  { %3458 = vmatprep.subr.bf16.mxu0 %v9044_v31  ;;  %4615 = vmatpush1.bf16.msra.mxu1 %v9075_v32  ;;  %v409_v31 = vld [vmem:[#allocation3 + $0x7f8] sm:$0xff]  ;;  %v648_v32 = vpack.c.bf16 %v384_v29, %v372_v28 }
 0x189   :  { %3322 = vmatmul.mubr.bf16.gmra.mrb[16].mxu0 %v588_v33  ;;  %4480 = vmatmul.mubr.bf16.gmra.mrb[16].mxu1 %v588_v33  ;;  %v661_v33 = vpack.c.bf16 %v409_v31, %v397_v30  ;;  %v9150_v28 = vld [vmem:[#allocation6 + $0x648] ss:$16 sps:$4 sm:$0xff]   ;;  %v9155_v29 = vld [vmem:[#allocation6 + $0x66c] ss:$16 sps:$4 sm:$0xff]   ;;  %v206_v30 = vld [vmem:[#allocation3 + $0x1a0] sm:$0xff] }
 0x18a   :  { %3331 = vmatprep.mubr.bf16.mxu0 %v601_v36  ;;  %4489 = vmatprep.mubr.bf16.mxu1 %v601_v36  ;;  %v421_v36 = vld [vmem:[#allocation3 + $0x858] sm:$0xff]  ;;  %v218_v31 = vld [vmem:[#allocation3 + $0x200] sm:$0xff] }
 0x18b   :  { %3459 = vmatpush1.bf16.msra.mxu0 %v9042_v34  ;;  %4616 = vmatprep.subr.bf16.mxu1 %v9083_v35  ;;  %v396_v34 = vld [vmem:[#allocation3 + $0x790] sm:$0xff] }
 0x18c   :  { %3460 = vmatprep.subr.bf16.mxu0 %v9053_v37  ;;  %4617 = vmatpush1.bf16.msra.mxu1 %v9081_v38  ;;  %v408_v35 = vld [vmem:[#allocation3 + $0x7f0] sm:$0xff]  ;;  %v433_v37 = vld [vmem:[#allocation3 + $0x8b8] sm:$0xff] }
 0x18d   :  { %4618 = vmatprep.subr.bf16.mxu1 %v9086_v43  ;;  %v660_v38 = vpack.c.bf16 %v408_v35, %v396_v34  ;;  %v673_v39 = vpack.c.bf16 %v433_v37, %v421_v36  ;;  %v457_v43 = vld [vmem:[#allocation3 + $0x978] sm:$0xff]  ;;  %v9123_v34 = vld [vmem:[#allocation6 + $0x660] ss:$16 sps:$4 sm:$0xff]   ;;  %v9128_v35 = vld [vmem:[#allocation6 + $0x684] ss:$16 sps:$4 sm:$0xff]   ;;  %v566_v37 = vpack.c.bf16 %v218_v31, %v206_v30 }
 0x18e   :  { %v9153_v36 = vld [vmem:[#allocation6 + $0x668] ss:$16 sps:$4 sm:$0xff]   ;;  %v9174_v31 = vld [vmem:[#allocation6 + $0x780] ss:$16 sps:$4 sm:$0xff]  }
 0x18f   :  { %3461 = vmatpush1.bf16.msra.mxu0 %v9051_v44  ;;  %v672_v44 = vpack.c.bf16 %v432_v41, %v420_v40  ;;  %v9161_v40 = vld [vmem:[#allocation6 + $0x68c] ss:$16 sps:$4 sm:$0xff]   ;;  %v9131_v41 = vld [vmem:[#allocation6 + $0x6a4] ss:$16 sps:$4 sm:$0xff]  }
 0x190   :  { %3462 = vmatprep.subr.bf16.mxu0 %v9062_v45  ;;  %4619 = vmatpush1.bf16.msra.mxu1 %v9084_v46  ;;  %v685_v45 = vpack.c.bf16 %v457_v43, %v445_v42  ;;  %v444_v46 = vld [vmem:[#allocation3 + $0x910] sm:$0xff]  ;;  %v9159_v42 = vld [vmem:[#allocation6 + $0x688] ss:$16 sps:$4 sm:$0xff]   ;;  %v9164_v43 = vld [vmem:[#allocation6 + $0x6ac] ss:$16 sps:$4 sm:$0xff]  }
 0x191   :  { %3332 = vmatmul.mubr.bf16.gmra.mrb[20].mxu0 %v600_v47  ;;  %4490 = vmatmul.mubr.bf16.gmra.mrb[20].mxu1 %v600_v47  ;;  %v456_v47 = vld [vmem:[#allocation3 + $0x970] sm:$0xff] }
 0x192   :  { %3341 = vmatprep.mubr.bf16.mxu0 %v613_v50  ;;  %4499 = vmatprep.mubr.bf16.mxu1 %v613_v50  ;;  %v684_v50 = vpack.c.bf16 %v456_v47, %v444_v46  ;;  %v255_v46 = vld [vmem:[#allocation3 + $0x328] sm:$0xff] }
 0x193   :  { %3463 = vmatpush1.bf16.msra.mxu0 %v9060_v48  ;;  %4620 = vmatprep.subr.bf16.mxu1 %v9092_v49  ;;  %v469_v48 = vld [vmem:[#allocation3 + $0x9d8] sm:$0xff]  ;;  %v267_v47 = vld [vmem:[#allocation3 + $0x388] sm:$0xff] }
 0x194   :  { %3464 = vmatprep.subr.bf16.mxu0 %v9071_v51  ;;  %4621 = vmatpush1.bf16.msra.mxu1 %v9090_v52  ;;  %v481_v49 = vld [vmem:[#allocation3 + $0xa38] sm:$0xff]  ;;  %v468_v52 = vld [vmem:[#allocation3 + $0x9d0] sm:$0xff] }
 0x195   :  { %4622 = vmatprep.subr.bf16.mxu1 %v9095_v57  ;;  %v697_v51 = vpack.c.bf16 %v481_v49, %v469_v48  ;;  %v696_v56 = vpack.c.bf16 %v480_v53, %v468_v52  ;;  %v709_v57 = vpack.c.bf16 %v505_v55, %v493_v54  ;;  %v9129_v48 = vld [vmem:[#allocation6 + $0x6a0] ss:$16 sps:$4 sm:$0xff]   ;;  %v9134_v49 = vld [vmem:[#allocation6 + $0x6c4] ss:$16 sps:$4 sm:$0xff]   ;;  %v591_v52 = vpack.c.bf16 %v267_v47, %v255_v46  ;;  %v9170_v54 = vld [vmem:[#allocation6 + $0x6cc] ss:$16 sps:$4 sm:$0xff]  }
 0x196   :  { %v9132_v53 = vld [vmem:[#allocation6 + $0x6c0] ss:$16 sps:$4 sm:$0xff]   ;;  %v9137_v55 = vld [vmem:[#allocation6 + $0x6e4] ss:$16 sps:$4 sm:$0xff]   ;;  %v9206_v46 = vld [vmem:[#allocation6 + $0x7cc] ss:$16 sps:$4 sm:$0xff]  }
 0x197   :  { %3465 = vmatpush1.bf16.msra.mxu0 %v9069_v58  ;;  %v492_v58 = vld [vmem:[#allocation3 + $0xa90] sm:$0xff] }
 0x198   :  { %3466 = vmatprep.subr.bf16.mxu0 %v9080_v59  ;;  %4623 = vmatpush1.bf16.msra.mxu1 %v9093_v60  ;;  %v504_v59 = vld [vmem:[#allocation3 + $0xaf0] sm:$0xff]  ;;  %v517_v60 = vld [vmem:[#allocation3 + $0xb58] sm:$0xff] }
 0x199   :  { %3342 = vmatmul.mubr.bf16.gmra.mrb[24].mxu0 %v612_v61  ;;  %4500 = vmatmul.mubr.bf16.gmra.mrb[24].mxu1 %v612_v61  ;;  %v529_v61 = vld [vmem:[#allocation3 + $0xbb8] sm:$0xff]  ;;  %v9203_v47 = vld [vmem:[#allocation6 + $0x7e4] ss:$16 sps:$4 sm:$0xff]  }
 0x19a   :  { %3351 = vmatprep.mubr.bf16.mxu0 %v625_v0  ;;  %4509 = vmatprep.mubr.bf16.mxu1 %v625_v0  ;;  %v516_v0 = vld [vmem:[#allocation3 + $0xb50] sm:$0xff] }
 0x19b   :  { %3467 = vmatpush1.bf16.msra.mxu0 %v9078_v62  ;;  %4624 = vmatprep.subr.bf16.mxu1 %v9101_v63  ;;  %v708_v62 = vpack.c.bf16 %v504_v59, %v492_v58  ;;  %v721_v63 = vpack.c.bf16 %v529_v61, %v517_v60  ;;  %v254_v58 = vld [vmem:[#allocation3 + $0x320] sm:$0xff]  ;;  %v279_v60 = vld [vmem:[#allocation3 + $0x3e8] sm:$0xff] }
 0x19c   :  { %3468 = vmatprep.subr.bf16.mxu0 %v9089_v1  ;;  %4625 = vmatpush1.bf16.msra.mxu1 %v9099_v2  ;;  %v528_v1 = vld [vmem:[#allocation3 + $0xbb0] sm:$0xff]  ;;  %v159_v2 = vld [vmem:[#allocation3 + $0x28] sm:$0xff]  ;;  %v266_v59 = vld [vmem:[#allocation3 + $0x380] sm:$0xff] }
 0x19d   :  { %4626 = vmatprep.subr.bf16.mxu1 %v9104_v7  ;;  %v720_v4 = vpack.c.bf16 %v528_v1, %v516_v0  ;;  %v543_v5 = vpack.c.bf16 %v171_v3, %v159_v2  ;;  %v170_v7 = vld [vmem:[#allocation3 + $0x80] sm:$0xff]  ;;  %v291_v61 = vld [vmem:[#allocation3 + $0x448] sm:$0xff]  ;;  %v590_v1 = vpack.c.bf16 %v266_v59, %v254_v58 }
 0x19e   :  { %v9171_v0 = vld [vmem:[#allocation6 + $0x6e8] ss:$16 sps:$4 sm:$0xff]   ;;  %v603_v2 = vpack.c.bf16 %v291_v61, %v279_v60  ;;  %v9138_v3 = vld [vmem:[#allocation6 + $0x700] ss:$16 sps:$4 sm:$0xff]   ;;  %v9239_v59 = vld [vmem:[#allocation6 + $0x80c] ss:$16 sps:$4 sm:$0xff]  }
 0x19f   :  { %3469 = vmatpush1.bf16.msra.mxu0 %v9087_v8  ;;  %v183_v8 = vld [vmem:[#allocation3 + $0xe8] sm:$0xff]  ;;  %v374_v60 = vld [vmem:[#allocation3 + $0x6e0] sm:$0xff] }
 0x1a0   :  { %3470 = vmatprep.subr.bf16.mxu0 %v9098_v9  ;;  %4627 = vmatpush1.bf16.msra.mxu1 %v9102_v10  ;;  %v195_v9 = vld [vmem:[#allocation3 + $0x148] sm:$0xff]  ;;  %v542_v10 = vpack.c.bf16 %v170_v7, %v158_v6  ;;  %v386_v61 = vld [vmem:[#allocation3 + $0x740] sm:$0xff] }
 0x1a1   :  { %3352 = vmatmul.mubr.bf16.gmra.mrb[28].mxu0 %v624_v11  ;;  %4510 = vmatmul.mubr.bf16.gmra.mrb[28].mxu1 %v624_v11  ;;  %v9114_v11 = vld [vmem:[#allocation6 + $0x600] ss:$16 sps:$4 sm:$0xff]   ;;  %v9177_v6 = vld [vmem:[#allocation6 + $0x708] ss:$16 sps:$4 sm:$0xff]   ;;  %v9182_v7 = vld [vmem:[#allocation6 + $0x72c] ss:$16 sps:$4 sm:$0xff]  }
 0x1a2   :  { %3361 = vmatprep.mubr.bf16.mxu0 %v637_v14  ;;  %4519 = vmatprep.mubr.bf16.mxu1 %v637_v14  ;;  %v9141_v14 = vld [vmem:[#allocation6 + $0x608] ss:$16 sps:$4 sm:$0xff]  }
 0x1a3   :  { %3471 = vmatpush1.bf16.msra.mxu0 %v9096_v12  ;;  %4628 = vmatprep.subr.bf16.mxu1 %v9110_v13  ;;  %v555_v12 = vpack.c.bf16 %v195_v9, %v183_v8  ;;  %v9119_v13 = vld [vmem:[#allocation6 + $0x624] ss:$16 sps:$4 sm:$0xff]  }
 0x1a4   :  { %3472 = vmatprep.subr.bf16.mxu0 %v9107_v15  ;;  %4629 = vmatpush1.bf16.msra.mxu1 %v9108_v16  ;;  %v9146_v15 = vld [vmem:[#allocation6 + $0x62c] ss:$16 sps:$4 sm:$0xff]   ;;  %v182_v16 = vld [vmem:[#allocation3 + $0xe0] sm:$0xff] }
 0x1a5   :  { %4630 = vmatprep.subr.bf16.mxu1 %v9113_v21  ;;  %v9122_v21 = vld [vmem:[#allocation6 + $0x644] ss:$16 sps:$4 sm:$0xff]  }
 0x1a6   :  { %v278_v8 = vld [vmem:[#allocation3 + $0x3e0] sm:$0xff] }
 0x1a7   :  { %3473 = vmatpush1.bf16.msra.mxu0 %v9105_v22  ;;  %v9144_v22 = vld [vmem:[#allocation6 + $0x628] ss:$16 sps:$4 sm:$0xff]   ;;  %v290_v9 = vld [vmem:[#allocation3 + $0x440] sm:$0xff] }
 0x1a8   :  { %4631 = vmatpush1.bf16.msra.mxu1 %v9111_v23  ;;  %3635 = vmatprep.subr.bf16.mxu0 %v9116_v24  ;;  %v554_v23 = vpack.c.bf16 %v194_v17, %v182_v16  ;;  %v567_v24 = vpack.c.bf16 %v219_v20, %v207_v19  ;;  %v9156_v17 = vld [vmem:[#allocation6 + $0x740] ss:$16 sps:$4 sm:$0xff]   ;;  %v9167_v19 = vld [vmem:[#allocation6 + $0x764] ss:$16 sps:$4 sm:$0xff]   ;;  %v9186_v20 = vld [vmem:[#allocation6 + $0x748] ss:$16 sps:$4 sm:$0xff]  }
 0x1a9   :  { %3362 = vmatmul.mubr.bf16.gmra.mrb[32].mxu0 %v636_v25  ;;  %4520 = vmatmul.mubr.bf16.gmra.mrb[32].mxu1 %v636_v25  ;;  %v9120_v25 = vld [vmem:[#allocation6 + $0x640] ss:$16 sps:$4 sm:$0xff]  }
 0x1aa   :  { %3371 = vmatprep.mubr.bf16.mxu0 %v649_v26  ;;  %4529 = vmatprep.mubr.bf16.mxu1 %v649_v26  ;;  %v9152_v26 = vld [vmem:[#allocation6 + $0x64c] ss:$16 sps:$4 sm:$0xff]  }
 0x1ab   :  { %4793 = vmatprep.subr.bf16.mxu1 %v9143_v27  ;;  %v9125_v27 = vld [vmem:[#allocation6 + $0x664] ss:$16 sps:$4 sm:$0xff]  }
 0x1b1   :  { %3372 = vmatmul.mubr.bf16.gmra.mrb[36].mxu0 %v648_v32  ;;  %4530 = vmatmul.mubr.bf16.gmra.mrb[36].mxu1 %v648_v32  ;;  %v231_v32 = vld [vmem:[#allocation3 + $0x268] sm:$0xff] }
 0x1b2   :  { %3381 = vmatprep.mubr.bf16.mxu0 %v661_v33  ;;  %4539 = vmatprep.mubr.bf16.mxu1 %v661_v33  ;;  %v243_v33 = vld [vmem:[#allocation3 + $0x2c8] sm:$0xff] }
 0x1b9   :  { %3382 = vmatmul.mubr.bf16.gmra.mrb[40].mxu0 %v660_v38  ;;  %4540 = vmatmul.mubr.bf16.gmra.mrb[40].mxu1 %v660_v38  ;;  %v579_v38 = vpack.c.bf16 %v243_v33, %v231_v32  ;;  %v9197_v32 = vld [vmem:[#allocation6 + $0x78c] ss:$16 sps:$4 sm:$0xff]   ;;  %v9185_v33 = vld [vmem:[#allocation6 + $0x7a4] ss:$16 sps:$4 sm:$0xff]  }
 0x1ba   :  { %3391 = vmatprep.mubr.bf16.mxu0 %v673_v39  ;;  %4549 = vmatprep.mubr.bf16.mxu1 %v673_v39  ;;  %v9126_v39 = vld [vmem:[#allocation6 + $0x680] ss:$16 sps:$4 sm:$0xff]  }
 0x1c1   :  { %3392 = vmatmul.mubr.bf16.gmra.mrb[44].mxu0 %v672_v44  ;;  %4550 = vmatmul.mubr.bf16.gmra.mrb[44].mxu1 %v672_v44  ;;  %v230_v44 = vld [vmem:[#allocation3 + $0x260] sm:$0xff] }
 0x1c2   :  { %3401 = vmatprep.mubr.bf16.mxu0 %v685_v45  ;;  %4559 = vmatprep.mubr.bf16.mxu1 %v685_v45  ;;  %v242_v45 = vld [vmem:[#allocation3 + $0x2c0] sm:$0xff] }
 0x1c9   :  { %3402 = vmatmul.mubr.bf16.gmra.mrb[48].mxu0 %v684_v50  ;;  %4560 = vmatmul.mubr.bf16.gmra.mrb[48].mxu1 %v684_v50  ;;  %v9162_v50 = vld [vmem:[#allocation6 + $0x6a8] ss:$16 sps:$4 sm:$0xff]  }
 0x1ca   :  { %3411 = vmatprep.mubr.bf16.mxu0 %v697_v51  ;;  %4569 = vmatprep.mubr.bf16.mxu1 %v697_v51  ;;  %v578_v51 = vpack.c.bf16 %v242_v45, %v230_v44  ;;  %v9192_v45 = vld [vmem:[#allocation6 + $0x7c0] ss:$16 sps:$4 sm:$0xff]  }
 0x1d1   :  { %3412 = vmatmul.mubr.bf16.gmra.mrb[52].mxu0 %v696_v56  ;;  %4570 = vmatmul.mubr.bf16.gmra.mrb[52].mxu1 %v696_v56  ;;  %v9168_v56 = vld [vmem:[#allocation6 + $0x6c8] ss:$16 sps:$4 sm:$0xff]  }
 0x1d2   :  { %3421 = vmatprep.mubr.bf16.mxu0 %v709_v57  ;;  %4579 = vmatprep.mubr.bf16.mxu1 %v709_v57  ;;  %v9173_v57 = vld [vmem:[#allocation6 + $0x6ec] ss:$16 sps:$4 sm:$0xff]  }
 0x1d9   :  { %3422 = vmatmul.mubr.bf16.gmra.mrb[56].mxu0 %v708_v62  ;;  %4580 = vmatmul.mubr.bf16.gmra.mrb[56].mxu1 %v708_v62  ;;  %v9135_v62 = vld [vmem:[#allocation6 + $0x6e0] ss:$16 sps:$4 sm:$0xff]  }
 0x1da   :  { %3431 = vmatprep.mubr.bf16.mxu0 %v721_v63  ;;  %4589 = vmatprep.mubr.bf16.mxu1 %v721_v63  ;;  %v9140_v63 = vld [vmem:[#allocation6 + $0x704] ss:$16 sps:$4 sm:$0xff]  }
 0x1e1   :  { %3432 = vmatmul.mubr.bf16.gmra.mrb[60].mxu0 %v720_v4  ;;  %4590 = vmatmul.mubr.bf16.gmra.mrb[60].mxu1 %v720_v4  ;;  %v9179_v4 = vld [vmem:[#allocation6 + $0x70c] ss:$16 sps:$4 sm:$0xff]  }
 0x1e2   :  { %3474 = vmatprep.mubr.bf16.mxu0 %v543_v5  ;;  %4632 = vmatprep.mubr.bf16.mxu1 %v543_v5  ;;  %v9149_v5 = vld [vmem:[#allocation6 + $0x724] ss:$16 sps:$4 sm:$0xff]  }
 0x1e9   :  { %3475 = vmatmul.mubr.bf16.vlgmr.msra.gmra.mrb[0].mxu0 %v542_v10  ;;  %4633 = vmatmul.mubr.bf16.vlgmr.msra.gmra.mrb[0].mxu1 %v542_v10  ;;  %v303_v10 = vld [vmem:[#allocation3 + $0x4a8] sm:$0xff] }
 0x1ea   :  { %3636 = vmatpush1.bf16.msra.mxu0 %v9114_v11  ;;  %3484 = vmatprep.mubr.bf16.mxu0 %v555_v12  ;;  %v315_v11 = vld [vmem:[#allocation3 + $0x508] sm:$0xff] }
 0x1eb   :  { %4642 = vmatprep.mubr.bf16.mxu1 %v555_v12  ;;  %3637 = vmatprep.subr.bf16.mxu0 %v9119_v13  ;;  %v9147_v12 = vld [vmem:[#allocation6 + $0x720] ss:$16 sps:$4 sm:$0xff]   ;;  %v9158_v13 = vld [vmem:[#allocation6 + $0x744] ss:$16 sps:$4 sm:$0xff]   ;;  %v615_v16 = vpack.c.bf16 %v315_v11, %v303_v10  ;;  %v447_v10 = vld [vmem:[#allocation3 + $0x928] sm:$0xff] }
 0x1ec   :  { %4794 = vmatpush1.bf16.msra.mxu1 %v9141_v14  ;;  %v9180_v14 = vld [vmem:[#allocation6 + $0x728] ss:$16 sps:$4 sm:$0xff]  }
 0x1ed   :  { %4795 = vmatprep.subr.bf16.mxu1 %v9146_v15  ;;  %v602_v15 = vpack.c.bf16 %v290_v9, %v278_v8  ;;  %v422_v8 = vld [vmem:[#allocation3 + $0x860] sm:$0xff]  ;;  %v459_v11 = vld [vmem:[#allocation3 + $0x988] sm:$0xff] }
 0x1ee   :  { %3638 = vmatpush1.bf16.msra.mxu0 %v9117_v18  ;;  %v9188_v18 = vld [vmem:[#allocation6 + $0x74c] ss:$16 sps:$4 sm:$0xff]   ;;  %v434_v9 = vld [vmem:[#allocation3 + $0x8c0] sm:$0xff] }
 0x1ef   :  { %3639 = vmatprep.subr.bf16.mxu0 %v9122_v21  ;;  %v9191_v21 = vld [vmem:[#allocation6 + $0x76c] ss:$16 sps:$4 sm:$0xff]  }
 0x1f0   :  { %4796 = vmatpush1.bf16.msra.mxu1 %v9144_v22  ;;  %v302_v22 = vld [vmem:[#allocation3 + $0x4a0] sm:$0xff] }
 0x1f1   :  { %3485 = vmatmul.mubr.bf16.gmra.mrb[4].mxu0 %v554_v23  ;;  %4643 = vmatmul.mubr.bf16.gmra.mrb[4].mxu1 %v554_v23  ;;  %v314_v23 = vld [vmem:[#allocation3 + $0x500] sm:$0xff] }
 0x1f2   :  { %3494 = vmatprep.mubr.bf16.mxu0 %v567_v24  ;;  %4652 = vmatprep.mubr.bf16.mxu1 %v567_v24  ;;  %v327_v24 = vld [vmem:[#allocation3 + $0x568] sm:$0xff] }
 0x1f3   :  { %3640 = vmatpush1.bf16.msra.mxu0 %v9120_v25  ;;  %4797 = vmatprep.subr.bf16.mxu1 %v9152_v26  ;;  %v339_v25 = vld [vmem:[#allocation3 + $0x5c8] sm:$0xff]  ;;  %v9165_v26 = vld [vmem:[#allocation6 + $0x760] ss:$16 sps:$4 sm:$0xff]  }
 0x1f4   :  { %3641 = vmatprep.subr.bf16.mxu0 %v9125_v27  ;;  %4798 = vmatpush1.bf16.msra.mxu1 %v9150_v28  ;;  %v9176_v27 = vld [vmem:[#allocation6 + $0x784] ss:$16 sps:$4 sm:$0xff]   ;;  %v9189_v28 = vld [vmem:[#allocation6 + $0x768] ss:$16 sps:$4 sm:$0xff]   ;;  %v627_v30 = vpack.c.bf16 %v339_v25, %v327_v24 }
 0x1f5   :  { %4799 = vmatprep.subr.bf16.mxu1 %v9155_v29  ;;  %v614_v29 = vpack.c.bf16 %v314_v23, %v302_v22  ;;  %v495_v22 = vld [vmem:[#allocation3 + $0xaa8] sm:$0xff] }
 0x1f6   :  { %v507_v23 = vld [vmem:[#allocation3 + $0xb08] sm:$0xff] }
 0x1f7   :  { %3642 = vmatpush1.bf16.msra.mxu0 %v9123_v34  ;;  %v9195_v34 = vld [vmem:[#allocation6 + $0x788] ss:$16 sps:$4 sm:$0xff]   ;;  %v711_v25 = vpack.c.bf16 %v507_v23, %v495_v22  ;;  %v9266_v22 = vld [vmem:[#allocation6 + $0x8cc] ss:$16 sps:$4 sm:$0xff]   ;;  %v9233_v23 = vld [vmem:[#allocation6 + $0x8e4] ss:$16 sps:$4 sm:$0xff]  }
 0x1f8   :  { %3643 = vmatprep.subr.bf16.mxu0 %v9128_v35  ;;  %4800 = vmatpush1.bf16.msra.mxu1 %v9153_v36  ;;  %v9200_v35 = vld [vmem:[#allocation6 + $0x7ac] ss:$16 sps:$4 sm:$0xff]   ;;  %v326_v36 = vld [vmem:[#allocation3 + $0x560] sm:$0xff] }
 0x1f9   :  { %3495 = vmatmul.mubr.bf16.gmra.mrb[8].mxu0 %v566_v37  ;;  %4653 = vmatmul.mubr.bf16.gmra.mrb[8].mxu1 %v566_v37  ;;  %v338_v37 = vld [vmem:[#allocation3 + $0x5c0] sm:$0xff] }
 0x1fa   :  { %3504 = vmatprep.mubr.bf16.mxu0 %v579_v38  ;;  %4662 = vmatprep.mubr.bf16.mxu1 %v579_v38  ;;  %v351_v38 = vld [vmem:[#allocation3 + $0x628] sm:$0xff] }
 0x1fb   :  { %3644 = vmatpush1.bf16.msra.mxu0 %v9126_v39  ;;  %4801 = vmatprep.subr.bf16.mxu1 %v9161_v40  ;;  %v363_v39 = vld [vmem:[#allocation3 + $0x688] sm:$0xff]  ;;  %v9183_v40 = vld [vmem:[#allocation6 + $0x7a0] ss:$16 sps:$4 sm:$0xff]  }
 0x1fc   :  { %3645 = vmatprep.subr.bf16.mxu0 %v9131_v41  ;;  %4802 = vmatpush1.bf16.msra.mxu1 %v9159_v42  ;;  %v9194_v41 = vld [vmem:[#allocation6 + $0x7c4] ss:$16 sps:$4 sm:$0xff]   ;;  %v9198_v42 = vld [vmem:[#allocation6 + $0x7a8] ss:$16 sps:$4 sm:$0xff]   ;;  %v639_v44 = vpack.c.bf16 %v363_v39, %v351_v38 }
 0x1fd   :  { %4803 = vmatprep.subr.bf16.mxu1 %v9164_v43  ;;  %v626_v43 = vpack.c.bf16 %v338_v37, %v326_v36  ;;  %v160_v38 = vld [vmem:[#allocation3 + $0x30] sm:$0xff] }
 0x1fe   :  { %v172_v39 = vld [vmem:[#allocation3 + $0x90] sm:$0xff] }
 0x1ff   :  { %3646 = vmatpush1.bf16.msra.mxu0 %v9129_v48  ;;  %v9204_v48 = vld [vmem:[#allocation6 + $0x7c8] ss:$16 sps:$4 sm:$0xff]  }
 0x200   :  { %3647 = vmatprep.subr.bf16.mxu0 %v9134_v49  ;;  %4804 = vmatpush1.bf16.msra.mxu1 %v9162_v50  ;;  %v9209_v49 = vld [vmem:[#allocation6 + $0x7ec] ss:$16 sps:$4 sm:$0xff]   ;;  %v350_v50 = vld [vmem:[#allocation3 + $0x620] sm:$0xff] }
 0x201   :  { %3505 = vmatmul.mubr.bf16.gmra.mrb[12].mxu0 %v578_v51  ;;  %4663 = vmatmul.mubr.bf16.gmra.mrb[12].mxu1 %v578_v51  ;;  %v362_v51 = vld [vmem:[#allocation3 + $0x680] sm:$0xff] }
 0x202   :  { %3514 = vmatprep.mubr.bf16.mxu0 %v591_v52  ;;  %4672 = vmatprep.mubr.bf16.mxu1 %v591_v52  ;;  %v375_v52 = vld [vmem:[#allocation3 + $0x6e8] sm:$0xff] }
 0x203   :  { %3648 = vmatpush1.bf16.msra.mxu0 %v9132_v53  ;;  %4805 = vmatprep.subr.bf16.mxu1 %v9170_v54  ;;  %v387_v53 = vld [vmem:[#allocation3 + $0x748] sm:$0xff]  ;;  %v9201_v54 = vld [vmem:[#allocation6 + $0x7e0] ss:$16 sps:$4 sm:$0xff]  }
 0x204   :  { %3649 = vmatprep.subr.bf16.mxu0 %v9137_v55  ;;  %4806 = vmatpush1.bf16.msra.mxu1 %v9168_v56  ;;  %v9207_v55 = vld [vmem:[#allocation6 + $0x7e8] ss:$16 sps:$4 sm:$0xff]   ;;  %v9212_v56 = vld [vmem:[#allocation6 + $0x804] ss:$16 sps:$4 sm:$0xff]   ;;  %v651_v58 = vpack.c.bf16 %v387_v53, %v375_v52 }
 0x205   :  { %4807 = vmatprep.subr.bf16.mxu1 %v9173_v57  ;;  %v638_v57 = vpack.c.bf16 %v362_v51, %v350_v50  ;;  %v9213_v50 = vld [vmem:[#allocation6 + $0x820] ss:$16 sps:$4 sm:$0xff]   ;;  %v209_v51 = vld [vmem:[#allocation3 + $0x1b8] sm:$0xff]  ;;  %v9218_v53 = vld [vmem:[#allocation6 + $0x844] ss:$16 sps:$4 sm:$0xff]  }
 0x206   :  { %v221_v52 = vld [vmem:[#allocation3 + $0x218] sm:$0xff] }
 0x207   :  { %3650 = vmatpush1.bf16.msra.mxu0 %v9135_v62  ;;  %v399_v62 = vld [vmem:[#allocation3 + $0x7a8] sm:$0xff] }
 0x208   :  { %3651 = vmatprep.subr.bf16.mxu0 %v9140_v63  ;;  %4808 = vmatpush1.bf16.msra.mxu1 %v9171_v0  ;;  %v411_v63 = vld [vmem:[#allocation3 + $0x808] sm:$0xff]  ;;  %v650_v0 = vpack.c.bf16 %v386_v61, %v374_v60 }
 0x209   :  { %3515 = vmatmul.mubr.bf16.gmra.mrb[16].mxu0 %v590_v1  ;;  %4673 = vmatmul.mubr.bf16.gmra.mrb[16].mxu1 %v590_v1  ;;  %v663_v1 = vpack.c.bf16 %v411_v63, %v399_v62  ;;  %v9246_v60 = vld [vmem:[#allocation6 + $0x848] ss:$16 sps:$4 sm:$0xff]   ;;  %v9251_v61 = vld [vmem:[#allocation6 + $0x86c] ss:$16 sps:$4 sm:$0xff]   ;;  %v208_v62 = vld [vmem:[#allocation3 + $0x1b0] sm:$0xff] }
 0x20a   :  { %3524 = vmatprep.mubr.bf16.mxu0 %v603_v2  ;;  %4682 = vmatprep.mubr.bf16.mxu1 %v603_v2  ;;  %v398_v2 = vld [vmem:[#allocation3 + $0x7a0] sm:$0xff]  ;;  %v220_v63 = vld [vmem:[#allocation3 + $0x210] sm:$0xff] }
 0x20b   :  { %3652 = vmatpush1.bf16.msra.mxu0 %v9138_v3  ;;  %4809 = vmatprep.subr.bf16.mxu1 %v9179_v4  ;;  %v410_v3 = vld [vmem:[#allocation3 + $0x800] sm:$0xff]  ;;  %v423_v4 = vld [vmem:[#allocation3 + $0x868] sm:$0xff] }
 0x20c   :  { %3653 = vmatprep.subr.bf16.mxu0 %v9149_v5  ;;  %4810 = vmatpush1.bf16.msra.mxu1 %v9177_v6  ;;  %v435_v5 = vld [vmem:[#allocation3 + $0x8c8] sm:$0xff]  ;;  %v662_v6 = vpack.c.bf16 %v410_v3, %v398_v2  ;;  %v9219_v2 = vld [vmem:[#allocation6 + $0x860] ss:$16 sps:$4 sm:$0xff]   ;;  %v9224_v3 = vld [vmem:[#allocation6 + $0x884] ss:$16 sps:$4 sm:$0xff]  }
 0x20d   :  { %4811 = vmatprep.subr.bf16.mxu1 %v9182_v7  ;;  %v675_v7 = vpack.c.bf16 %v435_v5, %v423_v4  ;;  %v9249_v4 = vld [vmem:[#allocation6 + $0x868] ss:$16 sps:$4 sm:$0xff]   ;;  %v568_v5 = vpack.c.bf16 %v220_v63, %v208_v62  ;;  %v9270_v63 = vld [vmem:[#allocation6 + $0x980] ss:$16 sps:$4 sm:$0xff]  }
 0x20f   :  { %3654 = vmatpush1.bf16.msra.mxu0 %v9147_v12  ;;  %v674_v12 = vpack.c.bf16 %v434_v9, %v422_v8  ;;  %v9257_v8 = vld [vmem:[#allocation6 + $0x88c] ss:$16 sps:$4 sm:$0xff]   ;;  %v9227_v9 = vld [vmem:[#allocation6 + $0x8a4] ss:$16 sps:$4 sm:$0xff]  }
 0x210   :  { %3655 = vmatprep.subr.bf16.mxu0 %v9158_v13  ;;  %4812 = vmatpush1.bf16.msra.mxu1 %v9180_v14  ;;  %v687_v13 = vpack.c.bf16 %v459_v11, %v447_v10  ;;  %v446_v14 = vld [vmem:[#allocation3 + $0x920] sm:$0xff]  ;;  %v9255_v10 = vld [vmem:[#allocation6 + $0x888] ss:$16 sps:$4 sm:$0xff]   ;;  %v9260_v11 = vld [vmem:[#allocation6 + $0x8ac] ss:$16 sps:$4 sm:$0xff]  }
 0x211   :  { %3525 = vmatmul.mubr.bf16.gmra.mrb[20].mxu0 %v602_v15  ;;  %4683 = vmatmul.mubr.bf16.gmra.mrb[20].mxu1 %v602_v15  ;;  %v458_v15 = vld [vmem:[#allocation3 + $0x980] sm:$0xff] }
 0x212   :  { %3534 = vmatprep.mubr.bf16.mxu0 %v615_v16  ;;  %4692 = vmatprep.mubr.bf16.mxu1 %v615_v16  ;;  %v471_v16 = vld [vmem:[#allocation3 + $0x9e8] sm:$0xff] }
 0x213   :  { %3656 = vmatpush1.bf16.msra.mxu0 %v9156_v17  ;;  %4813 = vmatprep.subr.bf16.mxu1 %v9188_v18  ;;  %v483_v17 = vld [vmem:[#allocation3 + $0xa48] sm:$0xff]  ;;  %v686_v18 = vpack.c.bf16 %v458_v15, %v446_v14  ;;  %v257_v14 = vld [vmem:[#allocation3 + $0x338] sm:$0xff] }
 0x214   :  { %3657 = vmatprep.subr.bf16.mxu0 %v9167_v19  ;;  %4814 = vmatpush1.bf16.msra.mxu1 %v9186_v20  ;;  %v699_v19 = vpack.c.bf16 %v483_v17, %v471_v16  ;;  %v470_v20 = vld [vmem:[#allocation3 + $0x9e0] sm:$0xff]  ;;  %v269_v15 = vld [vmem:[#allocation3 + $0x398] sm:$0xff] }
 0x215   :  { %4815 = vmatprep.subr.bf16.mxu1 %v9191_v21  ;;  %v482_v21 = vld [vmem:[#allocation3 + $0xa40] sm:$0xff] }
 0x216   :  { %v698_v24 = vpack.c.bf16 %v482_v21, %v470_v20  ;;  %v9225_v16 = vld [vmem:[#allocation6 + $0x8a0] ss:$16 sps:$4 sm:$0xff]   ;;  %v9230_v17 = vld [vmem:[#allocation6 + $0x8c4] ss:$16 sps:$4 sm:$0xff]   ;;  %v593_v20 = vpack.c.bf16 %v269_v15, %v257_v14  ;;  %v9302_v14 = vld [vmem:[#allocation6 + $0x9cc] ss:$16 sps:$4 sm:$0xff]  }
 0x217   :  { %3658 = vmatpush1.bf16.msra.mxu0 %v9165_v26  ;;  %v494_v26 = vld [vmem:[#allocation3 + $0xaa0] sm:$0xff] }
 0x218   :  { %3659 = vmatprep.subr.bf16.mxu0 %v9176_v27  ;;  %4816 = vmatpush1.bf16.msra.mxu1 %v9189_v28  ;;  %v506_v27 = vld [vmem:[#allocation3 + $0xb00] sm:$0xff]  ;;  %v519_v28 = vld [vmem:[#allocation3 + $0xb68] sm:$0xff] }
 0x219   :  { %3535 = vmatmul.mubr.bf16.gmra.mrb[24].mxu0 %v614_v29  ;;  %4693 = vmatmul.mubr.bf16.gmra.mrb[24].mxu1 %v614_v29  ;;  %v531_v29 = vld [vmem:[#allocation3 + $0xbc8] sm:$0xff]  ;;  %v9228_v21 = vld [vmem:[#allocation6 + $0x8c0] ss:$16 sps:$4 sm:$0xff]   ;;  %v9299_v15 = vld [vmem:[#allocation6 + $0x9e4] ss:$16 sps:$4 sm:$0xff]  }
 0x21a   :  { %3544 = vmatprep.mubr.bf16.mxu0 %v627_v30  ;;  %4702 = vmatprep.mubr.bf16.mxu1 %v627_v30  ;;  %v710_v30 = vpack.c.bf16 %v506_v27, %v494_v26  ;;  %v256_v26 = vld [vmem:[#allocation3 + $0x330] sm:$0xff] }
 0x21b   :  { %3660 = vmatpush1.bf16.msra.mxu0 %v9174_v31  ;;  %4817 = vmatprep.subr.bf16.mxu1 %v9197_v32  ;;  %v723_v31 = vpack.c.bf16 %v531_v29, %v519_v28  ;;  %v518_v32 = vld [vmem:[#allocation3 + $0xb60] sm:$0xff]  ;;  %v268_v27 = vld [vmem:[#allocation3 + $0x390] sm:$0xff]  ;;  %v281_v28 = vld [vmem:[#allocation3 + $0x3f8] sm:$0xff] }
 0x21c   :  { %3661 = vmatprep.subr.bf16.mxu0 %v9185_v33  ;;  %4818 = vmatpush1.bf16.msra.mxu1 %v9195_v34  ;;  %v530_v33 = vld [vmem:[#allocation3 + $0xbc0] sm:$0xff]  ;;  %v161_v34 = vld [vmem:[#allocation3 + $0x38] sm:$0xff] }
 0x21d   :  { %4819 = vmatprep.subr.bf16.mxu1 %v9200_v35  ;;  %v173_v35 = vld [vmem:[#allocation3 + $0x98] sm:$0xff]  ;;  %v722_v36 = vpack.c.bf16 %v530_v33, %v518_v32  ;;  %v592_v33 = vpack.c.bf16 %v268_v27, %v256_v26 }
 0x21e   :  { %v545_v37 = vpack.c.bf16 %v173_v35, %v161_v34  ;;  %v293_v29 = vld [vmem:[#allocation3 + $0x458] sm:$0xff]  ;;  %v9234_v35 = vld [vmem:[#allocation6 + $0x900] ss:$16 sps:$4 sm:$0xff]  }
 0x21f   :  { %3662 = vmatpush1.bf16.msra.mxu0 %v9183_v40  ;;  %v185_v40 = vld [vmem:[#allocation3 + $0xf8] sm:$0xff]  ;;  %v605_v34 = vpack.c.bf16 %v293_v29, %v281_v28  ;;  %v376_v28 = vld [vmem:[#allocation3 + $0x6f0] sm:$0xff] }
 0x220   :  { %3663 = vmatprep.subr.bf16.mxu0 %v9194_v41  ;;  %4820 = vmatpush1.bf16.msra.mxu1 %v9198_v42  ;;  %v197_v41 = vld [vmem:[#allocation3 + $0x158] sm:$0xff]  ;;  %v544_v42 = vpack.c.bf16 %v172_v39, %v160_v38  ;;  %v388_v29 = vld [vmem:[#allocation3 + $0x750] sm:$0xff] }
 0x221   :  { %3545 = vmatmul.mubr.bf16.gmra.mrb[28].mxu0 %v626_v43  ;;  %4703 = vmatmul.mubr.bf16.gmra.mrb[28].mxu1 %v626_v43  ;;  %v9210_v43 = vld [vmem:[#allocation6 + $0x800] ss:$16 sps:$4 sm:$0xff]   ;;  %v9267_v32 = vld [vmem:[#allocation6 + $0x8e8] ss:$16 sps:$4 sm:$0xff]   ;;  %v9278_v39 = vld [vmem:[#allocation6 + $0x92c] ss:$16 sps:$4 sm:$0xff]  }
 0x222   :  { %3554 = vmatprep.mubr.bf16.mxu0 %v639_v44  ;;  %4712 = vmatprep.mubr.bf16.mxu1 %v639_v44  ;;  %v557_v44 = vpack.c.bf16 %v197_v41, %v185_v40  ;;  %v9273_v38 = vld [vmem:[#allocation6 + $0x908] ss:$16 sps:$4 sm:$0xff]   ;;  %v280_v40 = vld [vmem:[#allocation3 + $0x3f0] sm:$0xff]  ;;  %v9335_v27 = vld [vmem:[#allocation6 + $0xa0c] ss:$16 sps:$4 sm:$0xff]  }
 0x223   :  { %3664 = vmatpush1.bf16.msra.mxu0 %v9192_v45  ;;  %4821 = vmatprep.subr.bf16.mxu1 %v9206_v46  ;;  %v9215_v45 = vld [vmem:[#allocation6 + $0x824] ss:$16 sps:$4 sm:$0xff]   ;;  %v9237_v46 = vld [vmem:[#allocation6 + $0x808] ss:$16 sps:$4 sm:$0xff]  }
 0x224   :  { %3665 = vmatprep.subr.bf16.mxu0 %v9203_v47  ;;  %4822 = vmatpush1.bf16.msra.mxu1 %v9204_v48  ;;  %v9242_v47 = vld [vmem:[#allocation6 + $0x82c] ss:$16 sps:$4 sm:$0xff]   ;;  %v184_v48 = vld [vmem:[#allocation3 + $0xf0] sm:$0xff] }
 0x225   :  { %4823 = vmatprep.subr.bf16.mxu1 %v9209_v49  ;;  %v196_v49 = vld [vmem:[#allocation3 + $0x150] sm:$0xff] }
 0x226   :  { %v292_v41 = vld [vmem:[#allocation3 + $0x450] sm:$0xff] }
 0x227   :  { %3666 = vmatpush1.bf16.msra.mxu0 %v9201_v54  ;;  %v9240_v54 = vld [vmem:[#allocation6 + $0x828] ss:$16 sps:$4 sm:$0xff]  }
 0x228   :  { %4824 = vmatpush1.bf16.msra.mxu1 %v9207_v55  ;;  %3828 = vmatprep.subr.bf16.mxu0 %v9212_v56  ;;  %v556_v55 = vpack.c.bf16 %v196_v49, %v184_v48  ;;  %v569_v56 = vpack.c.bf16 %v221_v52, %v209_v51  ;;  %v9252_v49 = vld [vmem:[#allocation6 + $0x940] ss:$16 sps:$4 sm:$0xff]   ;;  %v9263_v51 = vld [vmem:[#allocation6 + $0x964] ss:$16 sps:$4 sm:$0xff]   ;;  %v9282_v52 = vld [vmem:[#allocation6 + $0x948] ss:$16 sps:$4 sm:$0xff]  }
 0x229   :  { %3555 = vmatmul.mubr.bf16.gmra.mrb[32].mxu0 %v638_v57  ;;  %4713 = vmatmul.mubr.bf16.gmra.mrb[32].mxu1 %v638_v57  ;;  %v9216_v57 = vld [vmem:[#allocation6 + $0x840] ss:$16 sps:$4 sm:$0xff]  }
 0x22a   :  { %3564 = vmatprep.mubr.bf16.mxu0 %v651_v58  ;;  %4722 = vmatprep.mubr.bf16.mxu1 %v651_v58  ;;  %v9248_v58 = vld [vmem:[#allocation6 + $0x84c] ss:$16 sps:$4 sm:$0xff]  }
 0x22b   :  { %4986 = vmatprep.subr.bf16.mxu1 %v9239_v59  ;;  %v9221_v59 = vld [vmem:[#allocation6 + $0x864] ss:$16 sps:$4 sm:$0xff]  }
 0x231   :  { %3565 = vmatmul.mubr.bf16.gmra.mrb[36].mxu0 %v650_v0  ;;  %4723 = vmatmul.mubr.bf16.gmra.mrb[36].mxu1 %v650_v0  ;;  %v233_v0 = vld [vmem:[#allocation3 + $0x278] sm:$0xff] }
 0x232   :  { %3574 = vmatprep.mubr.bf16.mxu0 %v663_v1  ;;  %4732 = vmatprep.mubr.bf16.mxu1 %v663_v1  ;;  %v245_v1 = vld [vmem:[#allocation3 + $0x2d8] sm:$0xff] }
 0x239   :  { %3575 = vmatmul.mubr.bf16.gmra.mrb[40].mxu0 %v662_v6  ;;  %4733 = vmatmul.mubr.bf16.gmra.mrb[40].mxu1 %v662_v6  ;;  %v581_v6 = vpack.c.bf16 %v245_v1, %v233_v0  ;;  %v9293_v0 = vld [vmem:[#allocation6 + $0x98c] ss:$16 sps:$4 sm:$0xff]   ;;  %v9281_v1 = vld [vmem:[#allocation6 + $0x9a4] ss:$16 sps:$4 sm:$0xff]  }
 0x23a   :  { %3584 = vmatprep.mubr.bf16.mxu0 %v675_v7  ;;  %4742 = vmatprep.mubr.bf16.mxu1 %v675_v7  ;;  %v9222_v7 = vld [vmem:[#allocation6 + $0x880] ss:$16 sps:$4 sm:$0xff]  }
 0x241   :  { %3585 = vmatmul.mubr.bf16.gmra.mrb[44].mxu0 %v674_v12  ;;  %4743 = vmatmul.mubr.bf16.gmra.mrb[44].mxu1 %v674_v12  ;;  %v232_v12 = vld [vmem:[#allocation3 + $0x270] sm:$0xff] }
 0x242   :  { %3594 = vmatprep.mubr.bf16.mxu0 %v687_v13  ;;  %4752 = vmatprep.mubr.bf16.mxu1 %v687_v13  ;;  %v244_v13 = vld [vmem:[#allocation3 + $0x2d0] sm:$0xff] }
 0x249   :  { %3595 = vmatmul.mubr.bf16.gmra.mrb[48].mxu0 %v686_v18  ;;  %4753 = vmatmul.mubr.bf16.gmra.mrb[48].mxu1 %v686_v18  ;;  %v9258_v18 = vld [vmem:[#allocation6 + $0x8a8] ss:$16 sps:$4 sm:$0xff]  }
 0x24a   :  { %3604 = vmatprep.mubr.bf16.mxu0 %v699_v19  ;;  %4762 = vmatprep.mubr.bf16.mxu1 %v699_v19  ;;  %v580_v19 = vpack.c.bf16 %v244_v13, %v232_v12  ;;  %v9288_v13 = vld [vmem:[#allocation6 + $0x9c0] ss:$16 sps:$4 sm:$0xff]  }
 0x251   :  { %3605 = vmatmul.mubr.bf16.gmra.mrb[52].mxu0 %v698_v24  ;;  %4763 = vmatmul.mubr.bf16.gmra.mrb[52].mxu1 %v698_v24  ;;  %v9264_v24 = vld [vmem:[#allocation6 + $0x8c8] ss:$16 sps:$4 sm:$0xff]  }
 0x252   :  { %3614 = vmatprep.mubr.bf16.mxu0 %v711_v25  ;;  %4772 = vmatprep.mubr.bf16.mxu1 %v711_v25  ;;  %v9269_v25 = vld [vmem:[#allocation6 + $0x8ec] ss:$16 sps:$4 sm:$0xff]  }
 0x259   :  { %3615 = vmatmul.mubr.bf16.gmra.mrb[56].mxu0 %v710_v30  ;;  %4773 = vmatmul.mubr.bf16.gmra.mrb[56].mxu1 %v710_v30  ;;  %v9231_v30 = vld [vmem:[#allocation6 + $0x8e0] ss:$16 sps:$4 sm:$0xff]  }
 0x25a   :  { %3624 = vmatprep.mubr.bf16.mxu0 %v723_v31  ;;  %4782 = vmatprep.mubr.bf16.mxu1 %v723_v31  ;;  %v9236_v31 = vld [vmem:[#allocation6 + $0x904] ss:$16 sps:$4 sm:$0xff]  }
 0x261   :  { %3625 = vmatmul.mubr.bf16.gmra.mrb[60].mxu0 %v722_v36  ;;  %4783 = vmatmul.mubr.bf16.gmra.mrb[60].mxu1 %v722_v36  ;;  %v9275_v36 = vld [vmem:[#allocation6 + $0x90c] ss:$16 sps:$4 sm:$0xff]  }
 0x262   :  { %3667 = vmatprep.mubr.bf16.mxu0 %v545_v37  ;;  %4825 = vmatprep.mubr.bf16.mxu1 %v545_v37  ;;  %v9245_v37 = vld [vmem:[#allocation6 + $0x924] ss:$16 sps:$4 sm:$0xff]  }
 0x269   :  { %3668 = vmatmul.mubr.bf16.vlgmr.msra.gmra.mrb[0].mxu0 %v544_v42  ;;  %4826 = vmatmul.mubr.bf16.vlgmr.msra.gmra.mrb[0].mxu1 %v544_v42  ;;  %v305_v42 = vld [vmem:[#allocation3 + $0x4b8] sm:$0xff] }
 0x26a   :  { %3829 = vmatpush1.bf16.msra.mxu0 %v9210_v43  ;;  %3677 = vmatprep.mubr.bf16.mxu0 %v557_v44  ;;  %v317_v43 = vld [vmem:[#allocation3 + $0x518] sm:$0xff] }
 0x26b   :  { %4835 = vmatprep.mubr.bf16.mxu1 %v557_v44  ;;  %3830 = vmatprep.subr.bf16.mxu0 %v9215_v45  ;;  %v9243_v44 = vld [vmem:[#allocation6 + $0x920] ss:$16 sps:$4 sm:$0xff]   ;;  %v9254_v45 = vld [vmem:[#allocation6 + $0x944] ss:$16 sps:$4 sm:$0xff]   ;;  %v617_v48 = vpack.c.bf16 %v317_v43, %v305_v42  ;;  %v449_v42 = vld [vmem:[#allocation3 + $0x938] sm:$0xff] }
 0x26c   :  { %4987 = vmatpush1.bf16.msra.mxu1 %v9237_v46  ;;  %v9276_v46 = vld [vmem:[#allocation6 + $0x928] ss:$16 sps:$4 sm:$0xff]  }
 0x26d   :  { %4988 = vmatprep.subr.bf16.mxu1 %v9242_v47  ;;  %v604_v47 = vpack.c.bf16 %v292_v41, %v280_v40  ;;  %v424_v40 = vld [vmem:[#allocation3 + $0x870] sm:$0xff]  ;;  %v461_v43 = vld [vmem:[#allocation3 + $0x998] sm:$0xff] }
 0x26e   :  { %3831 = vmatpush1.bf16.msra.mxu0 %v9213_v50  ;;  %v9284_v50 = vld [vmem:[#allocation6 + $0x94c] ss:$16 sps:$4 sm:$0xff]   ;;  %v436_v41 = vld [vmem:[#allocation3 + $0x8d0] sm:$0xff] }
 0x26f   :  { %3832 = vmatprep.subr.bf16.mxu0 %v9218_v53  ;;  %v9287_v53 = vld [vmem:[#allocation6 + $0x96c] ss:$16 sps:$4 sm:$0xff]  }
 0x270   :  { %4989 = vmatpush1.bf16.msra.mxu1 %v9240_v54  ;;  %v304_v54 = vld [vmem:[#allocation3 + $0x4b0] sm:$0xff] }
 0x271   :  { %3678 = vmatmul.mubr.bf16.gmra.mrb[4].mxu0 %v556_v55  ;;  %4836 = vmatmul.mubr.bf16.gmra.mrb[4].mxu1 %v556_v55  ;;  %v316_v55 = vld [vmem:[#allocation3 + $0x510] sm:$0xff] }
 0x272   :  { %3687 = vmatprep.mubr.bf16.mxu0 %v569_v56  ;;  %4845 = vmatprep.mubr.bf16.mxu1 %v569_v56  ;;  %v329_v56 = vld [vmem:[#allocation3 + $0x578] sm:$0xff] }
 0x273   :  { %3833 = vmatpush1.bf16.msra.mxu0 %v9216_v57  ;;  %4990 = vmatprep.subr.bf16.mxu1 %v9248_v58  ;;  %v341_v57 = vld [vmem:[#allocation3 + $0x5d8] sm:$0xff]  ;;  %v9261_v58 = vld [vmem:[#allocation6 + $0x960] ss:$16 sps:$4 sm:$0xff]  }
 0x274   :  { %3834 = vmatprep.subr.bf16.mxu0 %v9221_v59  ;;  %4991 = vmatpush1.bf16.msra.mxu1 %v9246_v60  ;;  %v9272_v59 = vld [vmem:[#allocation6 + $0x984] ss:$16 sps:$4 sm:$0xff]   ;;  %v9285_v60 = vld [vmem:[#allocation6 + $0x968] ss:$16 sps:$4 sm:$0xff]   ;;  %v629_v62 = vpack.c.bf16 %v341_v57, %v329_v56 }
 0x275   :  { %4992 = vmatprep.subr.bf16.mxu1 %v9251_v61  ;;  %v616_v61 = vpack.c.bf16 %v316_v55, %v304_v54  ;;  %v497_v54 = vld [vmem:[#allocation3 + $0xab8] sm:$0xff] }
 0x276   :  { %v509_v55 = vld [vmem:[#allocation3 + $0xb18] sm:$0xff] }
 0x277   :  { %3835 = vmatpush1.bf16.msra.mxu0 %v9219_v2  ;;  %v9291_v2 = vld [vmem:[#allocation6 + $0x988] ss:$16 sps:$4 sm:$0xff]   ;;  %v713_v57 = vpack.c.bf16 %v509_v55, %v497_v54  ;;  %v9362_v54 = vld [vmem:[#allocation6 + $0xacc] ss:$16 sps:$4 sm:$0xff]   ;;  %v9329_v55 = vld [vmem:[#allocation6 + $0xae4] ss:$16 sps:$4 sm:$0xff]  }
 0x278   :  { %3836 = vmatprep.subr.bf16.mxu0 %v9224_v3  ;;  %4993 = vmatpush1.bf16.msra.mxu1 %v9249_v4  ;;  %v9296_v3 = vld [vmem:[#allocation6 + $0x9ac] ss:$16 sps:$4 sm:$0xff]   ;;  %v328_v4 = vld [vmem:[#allocation3 + $0x570] sm:$0xff] }
 0x279   :  { %3688 = vmatmul.mubr.bf16.gmra.mrb[8].mxu0 %v568_v5  ;;  %4846 = vmatmul.mubr.bf16.gmra.mrb[8].mxu1 %v568_v5  ;;  %v340_v5 = vld [vmem:[#allocation3 + $0x5d0] sm:$0xff] }
 0x27a   :  { %3697 = vmatprep.mubr.bf16.mxu0 %v581_v6  ;;  %4855 = vmatprep.mubr.bf16.mxu1 %v581_v6  ;;  %v353_v6 = vld [vmem:[#allocation3 + $0x638] sm:$0xff] }
 0x27b   :  { %3837 = vmatpush1.bf16.msra.mxu0 %v9222_v7  ;;  %4994 = vmatprep.subr.bf16.mxu1 %v9257_v8  ;;  %v365_v7 = vld [vmem:[#allocation3 + $0x698] sm:$0xff]  ;;  %v9279_v8 = vld [vmem:[#allocation6 + $0x9a0] ss:$16 sps:$4 sm:$0xff]  }
 0x27c   :  { %3838 = vmatprep.subr.bf16.mxu0 %v9227_v9  ;;  %4995 = vmatpush1.bf16.msra.mxu1 %v9255_v10  ;;  %v9290_v9 = vld [vmem:[#allocation6 + $0x9c4] ss:$16 sps:$4 sm:$0xff]   ;;  %v9294_v10 = vld [vmem:[#allocation6 + $0x9a8] ss:$16 sps:$4 sm:$0xff]   ;;  %v641_v12 = vpack.c.bf16 %v365_v7, %v353_v6 }
 0x27d   :  { %4996 = vmatprep.subr.bf16.mxu1 %v9260_v11  ;;  %v628_v11 = vpack.c.bf16 %v340_v5, %v328_v4  ;;  %v162_v6 = vld [vmem:[#allocation3 + $0x40] sm:$0xff] }
 0x27e   :  { %v174_v7 = vld [vmem:[#allocation3 + $0xa0] sm:$0xff] }
 0x27f   :  { %3839 = vmatpush1.bf16.msra.mxu0 %v9225_v16  ;;  %v9300_v16 = vld [vmem:[#allocation6 + $0x9c8] ss:$16 sps:$4 sm:$0xff]  }
 0x280   :  { %3840 = vmatprep.subr.bf16.mxu0 %v9230_v17  ;;  %4997 = vmatpush1.bf16.msra.mxu1 %v9258_v18  ;;  %v9305_v17 = vld [vmem:[#allocation6 + $0x9ec] ss:$16 sps:$4 sm:$0xff]   ;;  %v352_v18 = vld [vmem:[#allocation3 + $0x630] sm:$0xff] }
 0x281   :  { %3698 = vmatmul.mubr.bf16.gmra.mrb[12].mxu0 %v580_v19  ;;  %4856 = vmatmul.mubr.bf16.gmra.mrb[12].mxu1 %v580_v19  ;;  %v364_v19 = vld [vmem:[#allocation3 + $0x690] sm:$0xff] }
 0x282   :  { %3707 = vmatprep.mubr.bf16.mxu0 %v593_v20  ;;  %4865 = vmatprep.mubr.bf16.mxu1 %v593_v20  ;;  %v377_v20 = vld [vmem:[#allocation3 + $0x6f8] sm:$0xff] }
 0x283   :  { %3841 = vmatpush1.bf16.msra.mxu0 %v9228_v21  ;;  %4998 = vmatprep.subr.bf16.mxu1 %v9266_v22  ;;  %v389_v21 = vld [vmem:[#allocation3 + $0x758] sm:$0xff]  ;;  %v9297_v22 = vld [vmem:[#allocation6 + $0x9e0] ss:$16 sps:$4 sm:$0xff]  }
 0x284   :  { %3842 = vmatprep.subr.bf16.mxu0 %v9233_v23  ;;  %4999 = vmatpush1.bf16.msra.mxu1 %v9264_v24  ;;  %v9303_v23 = vld [vmem:[#allocation6 + $0x9e8] ss:$16 sps:$4 sm:$0xff]   ;;  %v9308_v24 = vld [vmem:[#allocation6 + $0xa04] ss:$16 sps:$4 sm:$0xff]   ;;  %v653_v26 = vpack.c.bf16 %v389_v21, %v377_v20 }
 0x285   :  { %5000 = vmatprep.subr.bf16.mxu1 %v9269_v25  ;;  %v640_v25 = vpack.c.bf16 %v364_v19, %v352_v18  ;;  %v9309_v18 = vld [vmem:[#allocation6 + $0xa20] ss:$16 sps:$4 sm:$0xff]   ;;  %v211_v19 = vld [vmem:[#allocation3 + $0x1c8] sm:$0xff]  ;;  %v9314_v21 = vld [vmem:[#allocation6 + $0xa44] ss:$16 sps:$4 sm:$0xff]  }
 0x286   :  { %v223_v20 = vld [vmem:[#allocation3 + $0x228] sm:$0xff] }
 0x287   :  { %3843 = vmatpush1.bf16.msra.mxu0 %v9231_v30  ;;  %v401_v30 = vld [vmem:[#allocation3 + $0x7b8] sm:$0xff] }
 0x288   :  { %3844 = vmatprep.subr.bf16.mxu0 %v9236_v31  ;;  %5001 = vmatpush1.bf16.msra.mxu1 %v9267_v32  ;;  %v413_v31 = vld [vmem:[#allocation3 + $0x818] sm:$0xff]  ;;  %v652_v32 = vpack.c.bf16 %v388_v29, %v376_v28 }
 0x289   :  { %3708 = vmatmul.mubr.bf16.gmra.mrb[16].mxu0 %v592_v33  ;;  %4866 = vmatmul.mubr.bf16.gmra.mrb[16].mxu1 %v592_v33  ;;  %v665_v33 = vpack.c.bf16 %v413_v31, %v401_v30  ;;  %v9342_v28 = vld [vmem:[#allocation6 + $0xa48] ss:$16 sps:$4 sm:$0xff]   ;;  %v9347_v29 = vld [vmem:[#allocation6 + $0xa6c] ss:$16 sps:$4 sm:$0xff]   ;;  %v210_v30 = vld [vmem:[#allocation3 + $0x1c0] sm:$0xff] }
 0x28a   :  { %3717 = vmatprep.mubr.bf16.mxu0 %v605_v34  ;;  %4875 = vmatprep.mubr.bf16.mxu1 %v605_v34  ;;  %v400_v34 = vld [vmem:[#allocation3 + $0x7b0] sm:$0xff]  ;;  %v222_v31 = vld [vmem:[#allocation3 + $0x220] sm:$0xff] }
 0x28b   :  { %3845 = vmatpush1.bf16.msra.mxu0 %v9234_v35  ;;  %5002 = vmatprep.subr.bf16.mxu1 %v9275_v36  ;;  %v412_v35 = vld [vmem:[#allocation3 + $0x810] sm:$0xff]  ;;  %v425_v36 = vld [vmem:[#allocation3 + $0x878] sm:$0xff] }
 0x28c   :  { %3846 = vmatprep.subr.bf16.mxu0 %v9245_v37  ;;  %5003 = vmatpush1.bf16.msra.mxu1 %v9273_v38  ;;  %v437_v37 = vld [vmem:[#allocation3 + $0x8d8] sm:$0xff]  ;;  %v664_v38 = vpack.c.bf16 %v412_v35, %v400_v34  ;;  %v9315_v34 = vld [vmem:[#allocation6 + $0xa60] ss:$16 sps:$4 sm:$0xff]   ;;  %v9320_v35 = vld [vmem:[#allocation6 + $0xa84] ss:$16 sps:$4 sm:$0xff]  }
 0x28d   :  { %5004 = vmatprep.subr.bf16.mxu1 %v9278_v39  ;;  %v677_v39 = vpack.c.bf16 %v437_v37, %v425_v36  ;;  %v9345_v36 = vld [vmem:[#allocation6 + $0xa68] ss:$16 sps:$4 sm:$0xff]   ;;  %v570_v37 = vpack.c.bf16 %v222_v31, %v210_v30  ;;  %v9366_v31 = vld [vmem:[#allocation6 + $0xb80] ss:$16 sps:$4 sm:$0xff]  }
 0x28f   :  { %3847 = vmatpush1.bf16.msra.mxu0 %v9243_v44  ;;  %v676_v44 = vpack.c.bf16 %v436_v41, %v424_v40  ;;  %v9353_v40 = vld [vmem:[#allocation6 + $0xa8c] ss:$16 sps:$4 sm:$0xff]   ;;  %v9323_v41 = vld [vmem:[#allocation6 + $0xaa4] ss:$16 sps:$4 sm:$0xff]  }
 0x290   :  { %3848 = vmatprep.subr.bf16.mxu0 %v9254_v45  ;;  %5005 = vmatpush1.bf16.msra.mxu1 %v9276_v46  ;;  %v689_v45 = vpack.c.bf16 %v461_v43, %v449_v42  ;;  %v448_v46 = vld [vmem:[#allocation3 + $0x930] sm:$0xff]  ;;  %v9351_v42 = vld [vmem:[#allocation6 + $0xa88] ss:$16 sps:$4 sm:$0xff]   ;;  %v9356_v43 = vld [vmem:[#allocation6 + $0xaac] ss:$16 sps:$4 sm:$0xff]  }
 0x291   :  { %3718 = vmatmul.mubr.bf16.gmra.mrb[20].mxu0 %v604_v47  ;;  %4876 = vmatmul.mubr.bf16.gmra.mrb[20].mxu1 %v604_v47  ;;  %v460_v47 = vld [vmem:[#allocation3 + $0x990] sm:$0xff] }
 0x292   :  { %3727 = vmatprep.mubr.bf16.mxu0 %v617_v48  ;;  %4885 = vmatprep.mubr.bf16.mxu1 %v617_v48  ;;  %v473_v48 = vld [vmem:[#allocation3 + $0x9f8] sm:$0xff] }
 0x293   :  { %3849 = vmatpush1.bf16.msra.mxu0 %v9252_v49  ;;  %5006 = vmatprep.subr.bf16.mxu1 %v9284_v50  ;;  %v485_v49 = vld [vmem:[#allocation3 + $0xa58] sm:$0xff]  ;;  %v688_v50 = vpack.c.bf16 %v460_v47, %v448_v46  ;;  %v259_v46 = vld [vmem:[#allocation3 + $0x348] sm:$0xff] }
 0x294   :  { %3850 = vmatprep.subr.bf16.mxu0 %v9263_v51  ;;  %5007 = vmatpush1.bf16.msra.mxu1 %v9282_v52  ;;  %v701_v51 = vpack.c.bf16 %v485_v49, %v473_v48  ;;  %v472_v52 = vld [vmem:[#allocation3 + $0x9f0] sm:$0xff]  ;;  %v271_v47 = vld [vmem:[#allocation3 + $0x3a8] sm:$0xff] }
 0x295   :  { %5008 = vmatprep.subr.bf16.mxu1 %v9287_v53  ;;  %v484_v53 = vld [vmem:[#allocation3 + $0xa50] sm:$0xff] }
 0x296   :  { %v700_v56 = vpack.c.bf16 %v484_v53, %v472_v52  ;;  %v9321_v48 = vld [vmem:[#allocation6 + $0xaa0] ss:$16 sps:$4 sm:$0xff]   ;;  %v9326_v49 = vld [vmem:[#allocation6 + $0xac4] ss:$16 sps:$4 sm:$0xff]   ;;  %v595_v52 = vpack.c.bf16 %v271_v47, %v259_v46  ;;  %v9398_v46 = vld [vmem:[#allocation6 + $0xbcc] ss:$16 sps:$4 sm:$0xff]  }
 0x297   :  { %3851 = vmatpush1.bf16.msra.mxu0 %v9261_v58  ;;  %v496_v58 = vld [vmem:[#allocation3 + $0xab0] sm:$0xff] }
 0x298   :  { %3852 = vmatprep.subr.bf16.mxu0 %v9272_v59  ;;  %5009 = vmatpush1.bf16.msra.mxu1 %v9285_v60  ;;  %v508_v59 = vld [vmem:[#allocation3 + $0xb10] sm:$0xff]  ;;  %v521_v60 = vld [vmem:[#allocation3 + $0xb78] sm:$0xff] }
 0x299   :  { %3728 = vmatmul.mubr.bf16.gmra.mrb[24].mxu0 %v616_v61  ;;  %4886 = vmatmul.mubr.bf16.gmra.mrb[24].mxu1 %v616_v61  ;;  %v533_v61 = vld [vmem:[#allocation3 + $0xbd8] sm:$0xff]  ;;  %v9324_v53 = vld [vmem:[#allocation6 + $0xac0] ss:$16 sps:$4 sm:$0xff]   ;;  %v9395_v47 = vld [vmem:[#allocation6 + $0xbe4] ss:$16 sps:$4 sm:$0xff]  }
 0x29a   :  { %3737 = vmatprep.mubr.bf16.mxu0 %v629_v62  ;;  %4895 = vmatprep.mubr.bf16.mxu1 %v629_v62  ;;  %v712_v62 = vpack.c.bf16 %v508_v59, %v496_v58  ;;  %v258_v58 = vld [vmem:[#allocation3 + $0x340] sm:$0xff] }
 0x29b   :  { %3853 = vmatpush1.bf16.msra.mxu0 %v9270_v63  ;;  %5010 = vmatprep.subr.bf16.mxu1 %v9293_v0  ;;  %v725_v63 = vpack.c.bf16 %v533_v61, %v521_v60  ;;  %v520_v0 = vld [vmem:[#allocation3 + $0xb70] sm:$0xff]  ;;  %v270_v59 = vld [vmem:[#allocation3 + $0x3a0] sm:$0xff]  ;;  %v283_v60 = vld [vmem:[#allocation3 + $0x408] sm:$0xff] }
 0x29c   :  { %3854 = vmatprep.subr.bf16.mxu0 %v9281_v1  ;;  %5011 = vmatpush1.bf16.msra.mxu1 %v9291_v2  ;;  %v532_v1 = vld [vmem:[#allocation3 + $0xbd0] sm:$0xff]  ;;  %v163_v2 = vld [vmem:[#allocation3 + $0x48] sm:$0xff] }
 0x29d   :  { %5012 = vmatprep.subr.bf16.mxu1 %v9296_v3  ;;  %v175_v3 = vld [vmem:[#allocation3 + $0xa8] sm:$0xff]  ;;  %v724_v4 = vpack.c.bf16 %v532_v1, %v520_v0  ;;  %v594_v1 = vpack.c.bf16 %v270_v59, %v258_v58  ;;  %v378_v58 = vld [vmem:[#allocation3 + $0x700] sm:$0xff] }
 0x29e   :  { %v547_v5 = vpack.c.bf16 %v175_v3, %v163_v2  ;;  %v295_v61 = vld [vmem:[#allocation3 + $0x468] sm:$0xff]  ;;  %v9330_v3 = vld [vmem:[#allocation6 + $0xb00] ss:$16 sps:$4 sm:$0xff]  }
 0x29f   :  { %3855 = vmatpush1.bf16.msra.mxu0 %v9279_v8  ;;  %v187_v8 = vld [vmem:[#allocation3 + $0x108] sm:$0xff]  ;;  %v607_v2 = vpack.c.bf16 %v295_v61, %v283_v60  ;;  %v390_v59 = vld [vmem:[#allocation3 + $0x760] sm:$0xff] }
 0x2a0   :  { %3856 = vmatprep.subr.bf16.mxu0 %v9290_v9  ;;  %5013 = vmatpush1.bf16.msra.mxu1 %v9294_v10  ;;  %v199_v9 = vld [vmem:[#allocation3 + $0x168] sm:$0xff]  ;;  %v546_v10 = vpack.c.bf16 %v174_v7, %v162_v6 }
 0x2a1   :  { %3738 = vmatmul.mubr.bf16.gmra.mrb[28].mxu0 %v628_v11  ;;  %4896 = vmatmul.mubr.bf16.gmra.mrb[28].mxu1 %v628_v11  ;;  %v9306_v11 = vld [vmem:[#allocation6 + $0xa00] ss:$16 sps:$4 sm:$0xff]   ;;  %v9363_v0 = vld [vmem:[#allocation6 + $0xae8] ss:$16 sps:$4 sm:$0xff]   ;;  %v9374_v7 = vld [vmem:[#allocation6 + $0xb2c] ss:$16 sps:$4 sm:$0xff]  }
 0x2a2   :  { %3747 = vmatprep.mubr.bf16.mxu0 %v641_v12  ;;  %4905 = vmatprep.mubr.bf16.mxu1 %v641_v12  ;;  %v559_v12 = vpack.c.bf16 %v199_v9, %v187_v8  ;;  %v9369_v6 = vld [vmem:[#allocation6 + $0xb08] ss:$16 sps:$4 sm:$0xff]   ;;  %v282_v8 = vld [vmem:[#allocation3 + $0x400] sm:$0xff] }
 0x2a3   :  { %3857 = vmatpush1.bf16.msra.mxu0 %v9288_v13  ;;  %5014 = vmatprep.subr.bf16.mxu1 %v9302_v14  ;;  %v9311_v13 = vld [vmem:[#allocation6 + $0xa24] ss:$16 sps:$4 sm:$0xff]   ;;  %v9333_v14 = vld [vmem:[#allocation6 + $0xa08] ss:$16 sps:$4 sm:$0xff]  }
 0x2a4   :  { %3858 = vmatprep.subr.bf16.mxu0 %v9299_v15  ;;  %5015 = vmatpush1.bf16.msra.mxu1 %v9300_v16  ;;  %v9338_v15 = vld [vmem:[#allocation6 + $0xa2c] ss:$16 sps:$4 sm:$0xff]   ;;  %v186_v16 = vld [vmem:[#allocation3 + $0x100] sm:$0xff] }
 0x2a5   :  { %5016 = vmatprep.subr.bf16.mxu1 %v9305_v17  ;;  %v198_v17 = vld [vmem:[#allocation3 + $0x160] sm:$0xff]  ;;  %v403_v60 = vld [vmem:[#allocation3 + $0x7c8] sm:$0xff] }
 0x2a6   :  { %v294_v9 = vld [vmem:[#allocation3 + $0x460] sm:$0xff]  ;;  %v415_v61 = vld [vmem:[#allocation3 + $0x828] sm:$0xff] }
 0x2a7   :  { %3859 = vmatpush1.bf16.msra.mxu0 %v9297_v22  ;;  %v9336_v22 = vld [vmem:[#allocation6 + $0xa28] ss:$16 sps:$4 sm:$0xff]  }
 0x2a8   :  { %5017 = vmatpush1.bf16.msra.mxu1 %v9303_v23  ;;  %4021 = vmatprep.subr.bf16.mxu0 %v9308_v24  ;;  %v558_v23 = vpack.c.bf16 %v198_v17, %v186_v16  ;;  %v571_v24 = vpack.c.bf16 %v223_v20, %v211_v19  ;;  %v9348_v17 = vld [vmem:[#allocation6 + $0xb40] ss:$16 sps:$4 sm:$0xff]   ;;  %v9359_v19 = vld [vmem:[#allocation6 + $0xb64] ss:$16 sps:$4 sm:$0xff]   ;;  %v9378_v20 = vld [vmem:[#allocation6 + $0xb48] ss:$16 sps:$4 sm:$0xff]  }
 0x2a9   :  { %3748 = vmatmul.mubr.bf16.gmra.mrb[32].mxu0 %v640_v25  ;;  %4906 = vmatmul.mubr.bf16.gmra.mrb[32].mxu1 %v640_v25  ;;  %v9312_v25 = vld [vmem:[#allocation6 + $0xa40] ss:$16 sps:$4 sm:$0xff]  }
 0x2aa   :  { %3757 = vmatprep.mubr.bf16.mxu0 %v653_v26  ;;  %4915 = vmatprep.mubr.bf16.mxu1 %v653_v26  ;;  %v9344_v26 = vld [vmem:[#allocation6 + $0xa4c] ss:$16 sps:$4 sm:$0xff]  }
 0x2ab   :  { %5179 = vmatprep.subr.bf16.mxu1 %v9335_v27  ;;  %v9317_v27 = vld [vmem:[#allocation6 + $0xa64] ss:$16 sps:$4 sm:$0xff]  }
 0x2b1   :  { %3758 = vmatmul.mubr.bf16.gmra.mrb[36].mxu0 %v652_v32  ;;  %4916 = vmatmul.mubr.bf16.gmra.mrb[36].mxu1 %v652_v32  ;;  %v235_v32 = vld [vmem:[#allocation3 + $0x288] sm:$0xff] }
 0x2b2   :  { %3767 = vmatprep.mubr.bf16.mxu0 %v665_v33  ;;  %4925 = vmatprep.mubr.bf16.mxu1 %v665_v33  ;;  %v247_v33 = vld [vmem:[#allocation3 + $0x2e8] sm:$0xff] }
 0x2b9   :  { %3768 = vmatmul.mubr.bf16.gmra.mrb[40].mxu0 %v664_v38  ;;  %4926 = vmatmul.mubr.bf16.gmra.mrb[40].mxu1 %v664_v38  ;;  %v583_v38 = vpack.c.bf16 %v247_v33, %v235_v32  ;;  %v9389_v32 = vld [vmem:[#allocation6 + $0xb8c] ss:$16 sps:$4 sm:$0xff]   ;;  %v9377_v33 = vld [vmem:[#allocation6 + $0xba4] ss:$16 sps:$4 sm:$0xff]  }
 0x2ba   :  { %3777 = vmatprep.mubr.bf16.mxu0 %v677_v39  ;;  %4935 = vmatprep.mubr.bf16.mxu1 %v677_v39  ;;  %v9318_v39 = vld [vmem:[#allocation6 + $0xa80] ss:$16 sps:$4 sm:$0xff]  }
 0x2c1   :  { %3778 = vmatmul.mubr.bf16.gmra.mrb[44].mxu0 %v676_v44  ;;  %4936 = vmatmul.mubr.bf16.gmra.mrb[44].mxu1 %v676_v44  ;;  %v234_v44 = vld [vmem:[#allocation3 + $0x280] sm:$0xff] }
 0x2c2   :  { %3787 = vmatprep.mubr.bf16.mxu0 %v689_v45  ;;  %4945 = vmatprep.mubr.bf16.mxu1 %v689_v45  ;;  %v246_v45 = vld [vmem:[#allocation3 + $0x2e0] sm:$0xff] }
 0x2c9   :  { %3788 = vmatmul.mubr.bf16.gmra.mrb[48].mxu0 %v688_v50  ;;  %4946 = vmatmul.mubr.bf16.gmra.mrb[48].mxu1 %v688_v50  ;;  %v9354_v50 = vld [vmem:[#allocation6 + $0xaa8] ss:$16 sps:$4 sm:$0xff]  }
 0x2ca   :  { %3797 = vmatprep.mubr.bf16.mxu0 %v701_v51  ;;  %4955 = vmatprep.mubr.bf16.mxu1 %v701_v51  ;;  %v582_v51 = vpack.c.bf16 %v246_v45, %v234_v44  ;;  %v9384_v45 = vld [vmem:[#allocation6 + $0xbc0] ss:$16 sps:$4 sm:$0xff]  }
 0x2d1   :  { %3798 = vmatmul.mubr.bf16.gmra.mrb[52].mxu0 %v700_v56  ;;  %4956 = vmatmul.mubr.bf16.gmra.mrb[52].mxu1 %v700_v56  ;;  %v9360_v56 = vld [vmem:[#allocation6 + $0xac8] ss:$16 sps:$4 sm:$0xff]  }
 0x2d2   :  { %3807 = vmatprep.mubr.bf16.mxu0 %v713_v57  ;;  %4965 = vmatprep.mubr.bf16.mxu1 %v713_v57  ;;  %v9365_v57 = vld [vmem:[#allocation6 + $0xaec] ss:$16 sps:$4 sm:$0xff]  }
 0x2d9   :  { %3808 = vmatmul.mubr.bf16.gmra.mrb[56].mxu0 %v712_v62  ;;  %4966 = vmatmul.mubr.bf16.gmra.mrb[56].mxu1 %v712_v62  ;;  %v9327_v62 = vld [vmem:[#allocation6 + $0xae0] ss:$16 sps:$4 sm:$0xff]  }
 0x2da   :  { %3817 = vmatprep.mubr.bf16.mxu0 %v725_v63  ;;  %4975 = vmatprep.mubr.bf16.mxu1 %v725_v63  ;;  %v9332_v63 = vld [vmem:[#allocation6 + $0xb04] ss:$16 sps:$4 sm:$0xff]  }
 0x2e1   :  { %3818 = vmatmul.mubr.bf16.gmra.mrb[60].mxu0 %v724_v4  ;;  %4976 = vmatmul.mubr.bf16.gmra.mrb[60].mxu1 %v724_v4  ;;  %v9371_v4 = vld [vmem:[#allocation6 + $0xb0c] ss:$16 sps:$4 sm:$0xff]  }
 0x2e2   :  { %3860 = vmatprep.mubr.bf16.mxu0 %v547_v5  ;;  %5018 = vmatprep.mubr.bf16.mxu1 %v547_v5  ;;  %v9341_v5 = vld [vmem:[#allocation6 + $0xb24] ss:$16 sps:$4 sm:$0xff]  }
 0x2e9   :  { %3861 = vmatmul.mubr.bf16.vlgmr.msra.gmra.mrb[0].mxu0 %v546_v10  ;;  %5019 = vmatmul.mubr.bf16.vlgmr.msra.gmra.mrb[0].mxu1 %v546_v10  ;;  %v307_v10 = vld [vmem:[#allocation3 + $0x4c8] sm:$0xff] }
 0x2ea   :  { %4022 = vmatpush1.bf16.msra.mxu0 %v9306_v11  ;;  %3870 = vmatprep.mubr.bf16.mxu0 %v559_v12  ;;  %v319_v11 = vld [vmem:[#allocation3 + $0x528] sm:$0xff] }
 0x2eb   :  { %5028 = vmatprep.mubr.bf16.mxu1 %v559_v12  ;;  %4023 = vmatprep.subr.bf16.mxu0 %v9311_v13  ;;  %v9339_v12 = vld [vmem:[#allocation6 + $0xb20] ss:$16 sps:$4 sm:$0xff]   ;;  %v9350_v13 = vld [vmem:[#allocation6 + $0xb44] ss:$16 sps:$4 sm:$0xff]   ;;  %v619_v16 = vpack.c.bf16 %v319_v11, %v307_v10 }
 0x2ec   :  { %5180 = vmatpush1.bf16.msra.mxu1 %v9333_v14  ;;  %v9372_v14 = vld [vmem:[#allocation6 + $0xb28] ss:$16 sps:$4 sm:$0xff]  }
 0x2ed   :  { %5181 = vmatprep.subr.bf16.mxu1 %v9338_v15  ;;  %v606_v15 = vpack.c.bf16 %v294_v9, %v282_v8  ;;  %v451_v8 = vld [vmem:[#allocation3 + $0x948] sm:$0xff] }
 0x2ee   :  { %4024 = vmatpush1.bf16.msra.mxu0 %v9309_v18  ;;  %v9380_v18 = vld [vmem:[#allocation6 + $0xb4c] ss:$16 sps:$4 sm:$0xff]  }
 0x2ef   :  { %4025 = vmatprep.subr.bf16.mxu0 %v9314_v21  ;;  %v9383_v21 = vld [vmem:[#allocation6 + $0xb6c] ss:$16 sps:$4 sm:$0xff]  }
 0x2f0   :  { %5182 = vmatpush1.bf16.msra.mxu1 %v9336_v22  ;;  %v306_v22 = vld [vmem:[#allocation3 + $0x4c0] sm:$0xff]  ;;  %v463_v9 = vld [vmem:[#allocation3 + $0x9a8] sm:$0xff] }
 0x2f1   :  { %3871 = vmatmul.mubr.bf16.gmra.mrb[4].mxu0 %v558_v23  ;;  %5029 = vmatmul.mubr.bf16.gmra.mrb[4].mxu1 %v558_v23  ;;  %v318_v23 = vld [vmem:[#allocation3 + $0x520] sm:$0xff]  ;;  %v691_v11 = vpack.c.bf16 %v463_v9, %v451_v8 }
 0x2f2   :  { %3880 = vmatprep.mubr.bf16.mxu0 %v571_v24  ;;  %5038 = vmatprep.mubr.bf16.mxu1 %v571_v24  ;;  %v331_v24 = vld [vmem:[#allocation3 + $0x588] sm:$0xff] }
 0x2f3   :  { %4026 = vmatpush1.bf16.msra.mxu0 %v9312_v25  ;;  %5183 = vmatprep.subr.bf16.mxu1 %v9344_v26  ;;  %v343_v25 = vld [vmem:[#allocation3 + $0x5e8] sm:$0xff]  ;;  %v9357_v26 = vld [vmem:[#allocation6 + $0xb60] ss:$16 sps:$4 sm:$0xff]  }
 0x2f4   :  { %4027 = vmatprep.subr.bf16.mxu0 %v9317_v27  ;;  %5184 = vmatpush1.bf16.msra.mxu1 %v9342_v28  ;;  %v9368_v27 = vld [vmem:[#allocation6 + $0xb84] ss:$16 sps:$4 sm:$0xff]   ;;  %v9381_v28 = vld [vmem:[#allocation6 + $0xb68] ss:$16 sps:$4 sm:$0xff]   ;;  %v631_v30 = vpack.c.bf16 %v343_v25, %v331_v24 }
 0x2f5   :  { %5185 = vmatprep.subr.bf16.mxu1 %v9347_v29  ;;  %v618_v29 = vpack.c.bf16 %v318_v23, %v306_v22  ;;  %v511_v22 = vld [vmem:[#allocation3 + $0xb28] sm:$0xff]  ;;  %v498_v25 = vld [vmem:[#allocation3 + $0xac0] sm:$0xff] }
 0x2f6   :  { %v9420_v9 = vld [vmem:[#allocation9 + $0x60] ss:$8 sps:$4 sm:$0xff]  }
 0x2f7   :  { %4028 = vmatpush1.bf16.msra.mxu0 %v9315_v34  ;;  %v9387_v34 = vld [vmem:[#allocation6 + $0xb88] ss:$16 sps:$4 sm:$0xff]  }
 0x2f8   :  { %4029 = vmatprep.subr.bf16.mxu0 %v9320_v35  ;;  %5186 = vmatpush1.bf16.msra.mxu1 %v9345_v36  ;;  %v9392_v35 = vld [vmem:[#allocation6 + $0xbac] ss:$16 sps:$4 sm:$0xff]   ;;  %v330_v36 = vld [vmem:[#allocation3 + $0x580] sm:$0xff] }
 0x2f9   :  { %3881 = vmatmul.mubr.bf16.gmra.mrb[8].mxu0 %v570_v37  ;;  %5039 = vmatmul.mubr.bf16.gmra.mrb[8].mxu1 %v570_v37  ;;  %v342_v37 = vld [vmem:[#allocation3 + $0x5e0] sm:$0xff] }
 0x2fa   :  { %3890 = vmatprep.mubr.bf16.mxu0 %v583_v38  ;;  %5048 = vmatprep.mubr.bf16.mxu1 %v583_v38  ;;  %v355_v38 = vld [vmem:[#allocation3 + $0x648] sm:$0xff] }
 0x2fb   :  { %4030 = vmatpush1.bf16.msra.mxu0 %v9318_v39  ;;  %5187 = vmatprep.subr.bf16.mxu1 %v9353_v40  ;;  %v367_v39 = vld [vmem:[#allocation3 + $0x6a8] sm:$0xff]  ;;  %v9375_v40 = vld [vmem:[#allocation6 + $0xba0] ss:$16 sps:$4 sm:$0xff]  }
 0x2fc   :  { %4031 = vmatprep.subr.bf16.mxu0 %v9323_v41  ;;  %5188 = vmatpush1.bf16.msra.mxu1 %v9351_v42  ;;  %v9386_v41 = vld [vmem:[#allocation6 + $0xbc4] ss:$16 sps:$4 sm:$0xff]   ;;  %v9390_v42 = vld [vmem:[#allocation6 + $0xba8] ss:$16 sps:$4 sm:$0xff]   ;;  %v643_v44 = vpack.c.bf16 %v367_v39, %v355_v38 }
 0x2fd   :  { %5189 = vmatprep.subr.bf16.mxu1 %v9356_v43  ;;  %v630_v43 = vpack.c.bf16 %v342_v37, %v330_v36  ;;  %v164_v37 = vld [vmem:[#allocation3 + $0x50] sm:$0xff]  ;;  %v189_v39 = vld [vmem:[#allocation3 + $0x118] sm:$0xff] }
 0x2fe   :  { %v176_v38 = vld [vmem:[#allocation3 + $0xb0] sm:$0xff] }
 0x2ff   :  { %4032 = vmatpush1.bf16.msra.mxu0 %v9321_v48  ;;  %v9396_v48 = vld [vmem:[#allocation6 + $0xbc8] ss:$16 sps:$4 sm:$0xff]  }
 0x300   :  { %4033 = vmatprep.subr.bf16.mxu0 %v9326_v49  ;;  %5190 = vmatpush1.bf16.msra.mxu1 %v9354_v50  ;;  %v9401_v49 = vld [vmem:[#allocation6 + $0xbec] ss:$16 sps:$4 sm:$0xff]   ;;  %v354_v50 = vld [vmem:[#allocation3 + $0x640] sm:$0xff] }
 0x301   :  { %3891 = vmatmul.mubr.bf16.gmra.mrb[12].mxu0 %v582_v51  ;;  %5049 = vmatmul.mubr.bf16.gmra.mrb[12].mxu1 %v582_v51  ;;  %v366_v51 = vld [vmem:[#allocation3 + $0x6a0] sm:$0xff] }
 0x302   :  { %3900 = vmatprep.mubr.bf16.mxu0 %v595_v52  ;;  %5058 = vmatprep.mubr.bf16.mxu1 %v595_v52  ;;  %v379_v52 = vld [vmem:[#allocation3 + $0x708] sm:$0xff] }
 0x303   :  { %4034 = vmatpush1.bf16.msra.mxu0 %v9324_v53  ;;  %5191 = vmatprep.subr.bf16.mxu1 %v9362_v54  ;;  %v391_v53 = vld [vmem:[#allocation3 + $0x768] sm:$0xff]  ;;  %v9393_v54 = vld [vmem:[#allocation6 + $0xbe0] ss:$16 sps:$4 sm:$0xff]  }
 0x304   :  { %4035 = vmatprep.subr.bf16.mxu0 %v9329_v55  ;;  %5192 = vmatpush1.bf16.msra.mxu1 %v9360_v56  ;;  %v9399_v55 = vld [vmem:[#allocation6 + $0xbe8] ss:$16 sps:$4 sm:$0xff]   ;;  %v642_v56 = vpack.c.bf16 %v366_v51, %v354_v50 }
 0x305   :  { %5193 = vmatprep.subr.bf16.mxu1 %v9365_v57  ;;  %v655_v57 = vpack.c.bf16 %v391_v53, %v379_v52  ;;  %v9410_v50 = vld [vmem:[#allocation9 + $0x24] ss:$8 sps:$4 sm:$0xff]   ;;  %v9408_v53 = vld [vmem:[#allocation9 + $0x20] ss:$8 sps:$4 sm:$0xff]  }
 0x307   :  { %4036 = vmatpush1.bf16.msra.mxu0 %v9327_v62  ;;  %v654_v62 = vpack.c.bf16 %v390_v59, %v378_v58  ;;  %v249_v58 = vld [vmem:[#allocation3 + $0x2f8] sm:$0xff] }
 0x308   :  { %4037 = vmatprep.subr.bf16.mxu0 %v9332_v63  ;;  %5194 = vmatpush1.bf16.msra.mxu1 %v9363_v0  ;;  %v667_v63 = vpack.c.bf16 %v415_v61, %v403_v60  ;;  %v402_v0 = vld [vmem:[#allocation3 + $0x7c0] sm:$0xff]  ;;  %v9411_v59 = vld [vmem:[#allocation9 + $0x30] ss:$8 sps:$4 sm:$0xff]   ;;  %v9416_v60 = vld [vmem:[#allocation9 + $0x44] ss:$8 sps:$4 sm:$0xff]  }
 0x309   :  { %3901 = vmatmul.mubr.bf16.gmra.mrb[16].mxu0 %v594_v1  ;;  %5059 = vmatmul.mubr.bf16.gmra.mrb[16].mxu1 %v594_v1  ;;  %v414_v1 = vld [vmem:[#allocation3 + $0x820] sm:$0xff] }
 0x30a   :  { %3910 = vmatprep.mubr.bf16.mxu0 %v607_v2  ;;  %5068 = vmatprep.mubr.bf16.mxu1 %v607_v2  ;;  %v427_v2 = vld [vmem:[#allocation3 + $0x888] sm:$0xff] }
 0x30b   :  { %4038 = vmatpush1.bf16.msra.mxu0 %v9330_v3  ;;  %5195 = vmatprep.subr.bf16.mxu1 %v9371_v4  ;;  %v439_v3 = vld [vmem:[#allocation3 + $0x8e8] sm:$0xff]  ;;  %v666_v4 = vpack.c.bf16 %v414_v1, %v402_v0  ;;  %v9419_v0 = vld [vmem:[#allocation9 + $0x54] ss:$8 sps:$4 sm:$0xff]   ;;  %v236_v1 = vld [vmem:[#allocation3 + $0x290] sm:$0xff] }
 0x30c   :  { %4039 = vmatprep.subr.bf16.mxu0 %v9341_v5  ;;  %5196 = vmatpush1.bf16.msra.mxu1 %v9369_v6  ;;  %v679_v5 = vpack.c.bf16 %v439_v3, %v427_v2  ;;  %v426_v6 = vld [vmem:[#allocation3 + $0x880] sm:$0xff]  ;;  %v248_v2 = vld [vmem:[#allocation3 + $0x2f0] sm:$0xff]  ;;  %v261_v3 = vld [vmem:[#allocation3 + $0x358] sm:$0xff] }
 0x30d   :  { %5197 = vmatprep.subr.bf16.mxu1 %v9374_v7  ;;  %v438_v7 = vld [vmem:[#allocation3 + $0x8e0] sm:$0xff] }
 0x30e   :  { %v678_v10 = vpack.c.bf16 %v438_v7, %v426_v6  ;;  %v9422_v6 = vld [vmem:[#allocation9 + $0x64] ss:$8 sps:$4 sm:$0xff]   ;;  %v584_v7 = vpack.c.bf16 %v248_v2, %v236_v1  ;;  %v441_v1 = vld [vmem:[#allocation3 + $0x8f8] sm:$0xff] }
 0x30f   :  { %4040 = vmatpush1.bf16.msra.mxu0 %v9339_v12  ;;  %v9404_v12 = vld [vmem:[#allocation9 + $0x4] ss:$8 sps:$4 sm:$0xff]  }
 0x310   :  { %4041 = vmatprep.subr.bf16.mxu0 %v9350_v13  ;;  %5198 = vmatpush1.bf16.msra.mxu1 %v9372_v14  ;;  %v450_v13 = vld [vmem:[#allocation3 + $0x940] sm:$0xff] }
 0x311   :  { %3911 = vmatmul.mubr.bf16.gmra.mrb[20].mxu0 %v606_v15  ;;  %5069 = vmatmul.mubr.bf16.gmra.mrb[20].mxu1 %v606_v15  ;;  %v462_v14 = vld [vmem:[#allocation3 + $0x9a0] sm:$0xff]  ;;  %v475_v15 = vld [vmem:[#allocation3 + $0xa08] sm:$0xff] }
 0x312   :  { %3920 = vmatprep.mubr.bf16.mxu0 %v619_v16  ;;  %5078 = vmatprep.mubr.bf16.mxu1 %v619_v16  ;;  %v487_v16 = vld [vmem:[#allocation3 + $0xa68] sm:$0xff] }
 0x313   :  { %4042 = vmatpush1.bf16.msra.mxu0 %v9348_v17  ;;  %5199 = vmatprep.subr.bf16.mxu1 %v9380_v18  ;;  %v690_v17 = vpack.c.bf16 %v462_v14, %v450_v13  ;;  %v703_v18 = vpack.c.bf16 %v487_v16, %v475_v15  ;;  %v285_v13 = vld [vmem:[#allocation3 + $0x418] sm:$0xff]  ;;  %v9428_v16 = vld [vmem:[#allocation9 + $0x84] ss:$8 sps:$4 sm:$0xff]  }
 0x314   :  { %4043 = vmatprep.subr.bf16.mxu0 %v9359_v19  ;;  %5200 = vmatpush1.bf16.msra.mxu1 %v9378_v20  ;;  %v474_v19 = vld [vmem:[#allocation3 + $0xa00] sm:$0xff]  ;;  %v297_v14 = vld [vmem:[#allocation3 + $0x478] sm:$0xff] }
 0x315   :  { %5201 = vmatprep.subr.bf16.mxu1 %v9383_v21  ;;  %v486_v20 = vld [vmem:[#allocation3 + $0xa60] sm:$0xff]  ;;  %v499_v21 = vld [vmem:[#allocation3 + $0xac8] sm:$0xff]  ;;  %v9423_v15 = vld [vmem:[#allocation9 + $0x70] ss:$8 sps:$4 sm:$0xff]  }
 0x316   :  { %v702_v23 = vpack.c.bf16 %v486_v20, %v474_v19  ;;  %v715_v24 = vpack.c.bf16 %v511_v22, %v499_v21  ;;  %v9426_v19 = vld [vmem:[#allocation9 + $0x80] ss:$8 sps:$4 sm:$0xff]   ;;  %v9431_v20 = vld [vmem:[#allocation9 + $0x94] ss:$8 sps:$4 sm:$0xff]   ;;  %v284_v21 = vld [vmem:[#allocation3 + $0x410] sm:$0xff] }
 0x317   :  { %4044 = vmatpush1.bf16.msra.mxu0 %v9357_v26  ;;  %v510_v26 = vld [vmem:[#allocation3 + $0xb20] sm:$0xff]  ;;  %v296_v22 = vld [vmem:[#allocation3 + $0x470] sm:$0xff] }
 0x318   :  { %4045 = vmatprep.subr.bf16.mxu0 %v9368_v27  ;;  %5202 = vmatpush1.bf16.msra.mxu1 %v9381_v28  ;;  %v523_v27 = vld [vmem:[#allocation3 + $0xb88] sm:$0xff] }
 0x319   :  { %3921 = vmatmul.mubr.bf16.gmra.mrb[24].mxu0 %v618_v29  ;;  %5079 = vmatmul.mubr.bf16.gmra.mrb[24].mxu1 %v618_v29  ;;  %v535_v28 = vld [vmem:[#allocation3 + $0xbe8] sm:$0xff]  ;;  %v714_v29 = vpack.c.bf16 %v510_v26, %v498_v25  ;;  %v9429_v25 = vld [vmem:[#allocation9 + $0x90] ss:$8 sps:$4 sm:$0xff]  }
 0x31a   :  { %3930 = vmatprep.mubr.bf16.mxu0 %v631_v30  ;;  %5088 = vmatprep.mubr.bf16.mxu1 %v631_v30  ;;  %v727_v30 = vpack.c.bf16 %v535_v28, %v523_v27  ;;  %v9434_v26 = vld [vmem:[#allocation9 + $0xa4] ss:$8 sps:$4 sm:$0xff]   ;;  %v608_v27 = vpack.c.bf16 %v296_v22, %v284_v21  ;;  %v513_v21 = vld [vmem:[#allocation3 + $0xb38] sm:$0xff] }
 0x31b   :  { %4046 = vmatpush1.bf16.msra.mxu0 %v9366_v31  ;;  %5203 = vmatprep.subr.bf16.mxu1 %v9389_v32  ;;  %v522_v31 = vld [vmem:[#allocation3 + $0xb80] sm:$0xff]  ;;  %v9452_v22 = vld [vmem:[#allocation9 + $0x104] ss:$8 sps:$4 sm:$0xff]  }
 0x31c   :  { %4047 = vmatprep.subr.bf16.mxu0 %v9377_v33  ;;  %5204 = vmatpush1.bf16.msra.mxu1 %v9387_v34  ;;  %v534_v32 = vld [vmem:[#allocation3 + $0xbe0] sm:$0xff]  ;;  %v165_v33 = vld [vmem:[#allocation3 + $0x58] sm:$0xff] }
 0x31d   :  { %5205 = vmatprep.subr.bf16.mxu1 %v9392_v35  ;;  %v177_v34 = vld [vmem:[#allocation3 + $0xb8] sm:$0xff]  ;;  %v726_v35 = vpack.c.bf16 %v534_v32, %v522_v31  ;;  %v308_v31 = vld [vmem:[#allocation3 + $0x4d0] sm:$0xff] }
 0x31e   :  { %v549_v36 = vpack.c.bf16 %v177_v34, %v165_v33  ;;  %v320_v32 = vld [vmem:[#allocation3 + $0x530] sm:$0xff]  ;;  %v333_v33 = vld [vmem:[#allocation3 + $0x598] sm:$0xff] }
 0x31f   :  { %4048 = vmatpush1.bf16.msra.mxu0 %v9375_v40  ;;  %v201_v40 = vld [vmem:[#allocation3 + $0x178] sm:$0xff] }
 0x320   :  { %4049 = vmatprep.subr.bf16.mxu0 %v9386_v41  ;;  %5206 = vmatpush1.bf16.msra.mxu1 %v9390_v42  ;;  %v548_v41 = vpack.c.bf16 %v176_v38, %v164_v37  ;;  %v561_v42 = vpack.c.bf16 %v201_v40, %v189_v39  ;;  %v345_v34 = vld [vmem:[#allocation3 + $0x5f8] sm:$0xff]  ;;  %v620_v37 = vpack.c.bf16 %v320_v32, %v308_v31  ;;  %v9438_v39 = vld [vmem:[#allocation9 + $0xc0] ss:$8 sps:$4 sm:$0xff]   ;;  %v524_v31 = vld [vmem:[#allocation3 + $0xb90] sm:$0xff] }
 0x321   :  { %3931 = vmatmul.mubr.bf16.gmra.mrb[28].mxu0 %v630_v43  ;;  %5089 = vmatmul.mubr.bf16.gmra.mrb[28].mxu1 %v630_v43  ;;  %v9402_v43 = vld [vmem:[#allocation9] ss:$8 sps:$4 sm:$0xff]   ;;  %v633_v38 = vpack.c.bf16 %v345_v34, %v333_v33  ;;  %v9443_v40 = vld [vmem:[#allocation9 + $0xd4] ss:$8 sps:$4 sm:$0xff]   ;;  %v536_v32 = vld [vmem:[#allocation3 + $0xbf0] sm:$0xff]  ;;  %v1116_v34 = vlaneseq }
 0x322   :  { %3940 = vmatprep.mubr.bf16.mxu0 %v643_v44  ;;  %5098 = vmatprep.mubr.bf16.mxu1 %v643_v44  ;;  %v9407_v44 = vld [vmem:[#allocation9 + $0x14] ss:$8 sps:$4 sm:$0xff]   ;;  %v728_v33 = vpack.c.bf16 %v536_v32, %v524_v31  ;;  %v9458_v32 = vld [vmem:[#allocation9 + $0x124] ss:$8 sps:$4 sm:$0xff]  }
 0x323   :  { %4050 = vmatpush1.bf16.msra.mxu0 %v9384_v45  ;;  %5207 = vmatprep.subr.bf16.mxu1 %v9398_v46  ;;  %v188_v45 = vld [vmem:[#allocation3 + $0x110] sm:$0xff]  ;;  %vm7202_vm1 = vcmp.lt.s32.totalorder %v1116_v34, 256 }
 0x324   :  { %4051 = vmatprep.subr.bf16.mxu0 %v9395_v47  ;;  %5208 = vmatpush1.bf16.msra.mxu1 %v9396_v48  ;;  %v200_v46 = vld [vmem:[#allocation3 + $0x170] sm:$0xff]  ;;  %v213_v47 = vld [vmem:[#allocation3 + $0x1d8] sm:$0xff] }
 0x325   :  { %5209 = vmatprep.subr.bf16.mxu1 %v9401_v49  ;;  %v225_v48 = vld [vmem:[#allocation3 + $0x238] sm:$0xff]  ;;  %v560_v51 = vpack.c.bf16 %v200_v46, %v188_v45  ;;  %v9446_v46 = vld [vmem:[#allocation9 + $0xe4] ss:$8 sps:$4 sm:$0xff]  }
 0x326   :  { %v9405_v49 = vld [vmem:[#allocation9 + $0x10] ss:$8 sps:$4 sm:$0xff]   ;;  %v573_v52 = vpack.c.bf16 %v225_v48, %v213_v47 }
 0x327   :  { %4052 = vmatpush1.bf16.msra.mxu0 %v9393_v54  ;;  %v9413_v54 = vld [vmem:[#allocation9 + $0x34] ss:$8 sps:$4 sm:$0xff]   ;;  %v9441_v45 = vld [vmem:[#allocation9 + $0xd0] ss:$8 sps:$4 sm:$0xff]  }
 0x328   :  { %5210 = vmatpush1.bf16.msra.mxu1 %v9399_v55  ;;  %5960 = vmatprep.subr.bf16.mxu0 %v9404_v12  ;;  %v212_v55 = vld [vmem:[#allocation3 + $0x1d0] sm:$0xff] }
 0x329   :  { %3941 = vmatmul.mubr.bf16.gmra.mrb[32].mxu0 %v642_v56  ;;  %5099 = vmatmul.mubr.bf16.gmra.mrb[32].mxu1 %v642_v56  ;;  %v224_v56 = vld [vmem:[#allocation3 + $0x230] sm:$0xff] }
 0x32a   :  { %3950 = vmatprep.mubr.bf16.mxu0 %v655_v57  ;;  %5108 = vmatprep.mubr.bf16.mxu1 %v655_v57  ;;  %v237_v57 = vld [vmem:[#allocation3 + $0x298] sm:$0xff]  ;;  %v572_v61 = vpack.c.bf16 %v224_v56, %v212_v55  ;;  %v272_v12 = vld [vmem:[#allocation3 + $0x3b0] sm:$0xff] }
 0x32b   :  { %v380_v56 = vld [vmem:[#allocation3 + $0x710] sm:$0xff] }
 0x331   :  { %3951 = vmatmul.mubr.bf16.gmra.mrb[36].mxu0 %v654_v62  ;;  %5109 = vmatmul.mubr.bf16.gmra.mrb[36].mxu1 %v654_v62  ;;  %v585_v62 = vpack.c.bf16 %v249_v58, %v237_v57  ;;  %v392_v57 = vld [vmem:[#allocation3 + $0x770] sm:$0xff]  ;;  %v405_v58 = vld [vmem:[#allocation3 + $0x7d8] sm:$0xff] }
 0x332   :  { %3960 = vmatprep.mubr.bf16.mxu0 %v667_v63  ;;  %5118 = vmatprep.mubr.bf16.mxu1 %v667_v63  ;;  %v9414_v63 = vld [vmem:[#allocation9 + $0x40] ss:$8 sps:$4 sm:$0xff]  }
 0x339   :  { %3961 = vmatmul.mubr.bf16.gmra.mrb[40].mxu0 %v666_v4  ;;  %5119 = vmatmul.mubr.bf16.gmra.mrb[40].mxu1 %v666_v4  ;;  %v273_v4 = vld [vmem:[#allocation3 + $0x3b8] sm:$0xff] }
 0x33a   :  { %3970 = vmatprep.mubr.bf16.mxu0 %v679_v5  ;;  %5128 = vmatprep.mubr.bf16.mxu1 %v679_v5  ;;  %v9417_v5 = vld [vmem:[#allocation9 + $0x50] ss:$8 sps:$4 sm:$0xff]   ;;  %v597_v8 = vpack.c.bf16 %v273_v4, %v261_v3 }
 0x33b   :  { %v428_v4 = vld [vmem:[#allocation3 + $0x890] sm:$0xff] }
 0x341   :  { %3971 = vmatmul.mubr.bf16.gmra.mrb[44].mxu0 %v678_v10  ;;  %5129 = vmatmul.mubr.bf16.gmra.mrb[44].mxu1 %v678_v10  ;;  %v9425_v10 = vld [vmem:[#allocation9 + $0x74] ss:$8 sps:$4 sm:$0xff]  }
 0x342   :  { %3980 = vmatprep.mubr.bf16.mxu0 %v691_v11  ;;  %5138 = vmatprep.mubr.bf16.mxu1 %v691_v11  ;;  %v260_v11 = vld [vmem:[#allocation3 + $0x350] sm:$0xff] }
 0x349   :  { %3981 = vmatmul.mubr.bf16.gmra.mrb[48].mxu0 %v690_v17  ;;  %5139 = vmatmul.mubr.bf16.gmra.mrb[48].mxu1 %v690_v17  ;;  %v596_v17 = vpack.c.bf16 %v272_v12, %v260_v11  ;;  %v452_v11 = vld [vmem:[#allocation3 + $0x950] sm:$0xff] }
 0x34a   :  { %3990 = vmatprep.mubr.bf16.mxu0 %v703_v18  ;;  %5148 = vmatprep.mubr.bf16.mxu1 %v703_v18  ;;  %v609_v18 = vpack.c.bf16 %v297_v14, %v285_v13  ;;  %v464_v12 = vld [vmem:[#allocation3 + $0x9b0] sm:$0xff]  ;;  %v477_v14 = vld [vmem:[#allocation3 + $0xa18] sm:$0xff] }
 0x34b   :  { %v9447_v13 = vld [vmem:[#allocation9 + $0xf0] ss:$8 sps:$4 sm:$0xff]  }
 0x351   :  { %3991 = vmatmul.mubr.bf16.gmra.mrb[52].mxu0 %v702_v23  ;;  %5149 = vmatmul.mubr.bf16.gmra.mrb[52].mxu1 %v702_v23  ;;  %v309_v23 = vld [vmem:[#allocation3 + $0x4d8] sm:$0xff] }
 0x352   :  { %4000 = vmatprep.mubr.bf16.mxu0 %v715_v24  ;;  %5158 = vmatprep.mubr.bf16.mxu1 %v715_v24  ;;  %v321_v24 = vld [vmem:[#allocation3 + $0x538] sm:$0xff] }
 0x353   :  { %v621_v28 = vpack.c.bf16 %v321_v24, %v309_v23 }
 0x359   :  { %4001 = vmatmul.mubr.bf16.gmra.mrb[56].mxu0 %v714_v29  ;;  %5159 = vmatmul.mubr.bf16.gmra.mrb[56].mxu1 %v714_v29  ;;  %v9432_v29 = vld [vmem:[#allocation9 + $0xa0] ss:$8 sps:$4 sm:$0xff]  }
 0x35a   :  { %4010 = vmatprep.mubr.bf16.mxu0 %v727_v30  ;;  %5168 = vmatprep.mubr.bf16.mxu1 %v727_v30  ;;  %v9437_v30 = vld [vmem:[#allocation9 + $0xb4] ss:$8 sps:$4 sm:$0xff]  }
 0x361   :  { %4011 = vmatmul.mubr.bf16.gmra.mrb[60].mxu0 %v726_v35  ;;  %5169 = vmatmul.mubr.bf16.gmra.mrb[60].mxu1 %v726_v35  ;;  %v9435_v35 = vld [vmem:[#allocation9 + $0xb0] ss:$8 sps:$4 sm:$0xff]  }
 0x362   :  { %4053 = vmatprep.mubr.bf16.mxu0 %v549_v36  ;;  %5211 = vmatprep.mubr.bf16.mxu1 %v549_v36  ;;  %v9440_v36 = vld [vmem:[#allocation9 + $0xc4] ss:$8 sps:$4 sm:$0xff]  }
 0x369   :  { %4054 = vmatmul.mubr.bf16.vlgmr.msra.gmra.mrb[0].mxu0 %v548_v41  ;;  %5212 = vmatmul.mubr.bf16.vlgmr.msra.gmra.mrb[0].mxu1 %v548_v41  ;;  %v332_v41 = vld [vmem:[#allocation3 + $0x590] sm:$0xff] }
 0x36a   :  { %4063 = vmatprep.mubr.bf16.mxu0 %v561_v42  ;;  %5221 = vmatprep.mubr.bf16.mxu1 %v561_v42  ;;  %v344_v42 = vld [vmem:[#allocation3 + $0x5f0] sm:$0xff] }
 0x36b   :  { %5961 = vmatpush1.bf16.msra.mxu0 %v9402_v43  ;;  %v357_v43 = vld [vmem:[#allocation3 + $0x658] sm:$0xff]  ;;  %v632_v47 = vpack.c.bf16 %v344_v42, %v332_v41 }
 0x36c   :  { %5962 = vmatprep.subr.bf16.mxu0 %v9407_v44  ;;  %v369_v44 = vld [vmem:[#allocation3 + $0x6b8] sm:$0xff] }
 0x36d   :  { %v645_v48 = vpack.c.bf16 %v369_v44, %v357_v43 }
 0x36f   :  { %5963 = vmatpush1.bf16.msra.mxu0 %v9405_v49  ;;  %v9444_v49 = vld [vmem:[#allocation9 + $0xe0] ss:$8 sps:$4 sm:$0xff]  }
 0x370   :  { %5964 = vmatprep.subr.bf16.mxu0 %v9410_v50  ;;  %v356_v50 = vld [vmem:[#allocation3 + $0x650] sm:$0xff] }
 0x371   :  { %4064 = vmatmul.mubr.bf16.gmra.mrb[4].mxu0 %v560_v51  ;;  %5222 = vmatmul.mubr.bf16.gmra.mrb[4].mxu1 %v560_v51  ;;  %v368_v51 = vld [vmem:[#allocation3 + $0x6b0] sm:$0xff] }
 0x372   :  { %4073 = vmatprep.mubr.bf16.mxu0 %v573_v52  ;;  %5231 = vmatprep.mubr.bf16.mxu1 %v573_v52  ;;  %v381_v52 = vld [vmem:[#allocation3 + $0x718] sm:$0xff] }
 0x373   :  { %5965 = vmatpush1.bf16.msra.mxu0 %v9408_v53  ;;  %v393_v53 = vld [vmem:[#allocation3 + $0x778] sm:$0xff] }
 0x374   :  { %5966 = vmatprep.subr.bf16.mxu0 %v9413_v54  ;;  %v644_v54 = vpack.c.bf16 %v368_v51, %v356_v50  ;;  %v657_v55 = vpack.c.bf16 %v393_v53, %v381_v52 }
 0x377   :  { %5967 = vmatpush1.bf16.msra.mxu0 %v9411_v59  ;;  %v417_v59 = vld [vmem:[#allocation3 + $0x838] sm:$0xff] }
 0x378   :  { %5968 = vmatprep.subr.bf16.mxu0 %v9416_v60  ;;  %v656_v60 = vpack.c.bf16 %v392_v57, %v380_v56 }
 0x379   :  { %4074 = vmatmul.mubr.bf16.gmra.mrb[8].mxu0 %v572_v61  ;;  %5232 = vmatmul.mubr.bf16.gmra.mrb[8].mxu1 %v572_v61  ;;  %v669_v61 = vpack.c.bf16 %v417_v59, %v405_v58 }
 0x37a   :  { %4083 = vmatprep.mubr.bf16.mxu0 %v585_v62  ;;  %5241 = vmatprep.mubr.bf16.mxu1 %v585_v62  ;;  %v404_v62 = vld [vmem:[#allocation3 + $0x7d0] sm:$0xff] }
 0x37b   :  { %5969 = vmatpush1.bf16.msra.mxu0 %v9414_v63  ;;  %v416_v63 = vld [vmem:[#allocation3 + $0x830] sm:$0xff] }
 0x37c   :  { %5970 = vmatprep.subr.bf16.mxu0 %v9419_v0  ;;  %v429_v0 = vld [vmem:[#allocation3 + $0x898] sm:$0xff]  ;;  %v668_v2 = vpack.c.bf16 %v416_v63, %v404_v62 }
 0x37d   :  { %v681_v3 = vpack.c.bf16 %v441_v1, %v429_v0 }
 0x37f   :  { %5971 = vmatpush1.bf16.msra.mxu0 %v9417_v5  ;;  %v440_v5 = vld [vmem:[#allocation3 + $0x8f0] sm:$0xff] }
 0x380   :  { %5972 = vmatprep.subr.bf16.mxu0 %v9422_v6  ;;  %v453_v6 = vld [vmem:[#allocation3 + $0x958] sm:$0xff] }
 0x381   :  { %4084 = vmatmul.mubr.bf16.gmra.mrb[12].mxu0 %v584_v7  ;;  %5242 = vmatmul.mubr.bf16.gmra.mrb[12].mxu1 %v584_v7  ;;  %v465_v7 = vld [vmem:[#allocation3 + $0x9b8] sm:$0xff] }
 0x382   :  { %4093 = vmatprep.mubr.bf16.mxu0 %v597_v8  ;;  %5251 = vmatprep.mubr.bf16.mxu1 %v597_v8  ;;  %v680_v8 = vpack.c.bf16 %v440_v5, %v428_v4 }
 0x383   :  { %5973 = vmatpush1.bf16.msra.mxu0 %v9420_v9  ;;  %v693_v9 = vpack.c.bf16 %v465_v7, %v453_v6 }
 0x384   :  { %5974 = vmatprep.subr.bf16.mxu0 %v9425_v10  ;;  %v9449_v10 = vld [vmem:[#allocation9 + $0xf4] ss:$8 sps:$4 sm:$0xff]  }
 0x387   :  { %5975 = vmatpush1.bf16.msra.mxu0 %v9423_v15  ;;  %v489_v15 = vld [vmem:[#allocation3 + $0xa78] sm:$0xff] }
 0x388   :  { %5976 = vmatprep.subr.bf16.mxu0 %v9428_v16  ;;  %v692_v16 = vpack.c.bf16 %v464_v12, %v452_v11  ;;  %v9450_v11 = vld [vmem:[#allocation9 + $0x100] ss:$8 sps:$4 sm:$0xff]  }
 0x389   :  { %4094 = vmatmul.mubr.bf16.gmra.mrb[16].mxu0 %v596_v17  ;;  %5252 = vmatmul.mubr.bf16.gmra.mrb[16].mxu1 %v596_v17  ;;  %v705_v17 = vpack.c.bf16 %v489_v15, %v477_v14 }
 0x38a   :  { %4103 = vmatprep.mubr.bf16.mxu0 %v609_v18  ;;  %5261 = vmatprep.mubr.bf16.mxu1 %v609_v18  ;;  %v476_v18 = vld [vmem:[#allocation3 + $0xa10] sm:$0xff] }
 0x38b   :  { %5977 = vmatpush1.bf16.msra.mxu0 %v9426_v19  ;;  %v488_v19 = vld [vmem:[#allocation3 + $0xa70] sm:$0xff] }
 0x38c   :  { %5978 = vmatprep.subr.bf16.mxu0 %v9431_v20  ;;  %v501_v20 = vld [vmem:[#allocation3 + $0xad8] sm:$0xff]  ;;  %v704_v23 = vpack.c.bf16 %v488_v19, %v476_v18 }
 0x38d   :  { %v717_v24 = vpack.c.bf16 %v513_v21, %v501_v20 }
 0x38f   :  { %5979 = vmatpush1.bf16.msra.mxu0 %v9429_v25  ;;  %v500_v25 = vld [vmem:[#allocation3 + $0xad0] sm:$0xff] }
 0x390   :  { %5980 = vmatprep.subr.bf16.mxu0 %v9434_v26  ;;  %v512_v26 = vld [vmem:[#allocation3 + $0xb30] sm:$0xff] }
 0x391   :  { %4104 = vmatmul.mubr.bf16.gmra.mrb[20].mxu0 %v608_v27  ;;  %5262 = vmatmul.mubr.bf16.gmra.mrb[20].mxu1 %v608_v27  ;;  %v525_v27 = vld [vmem:[#allocation3 + $0xb98] sm:$0xff] }
 0x392   :  { %4113 = vmatprep.mubr.bf16.mxu0 %v621_v28  ;;  %5271 = vmatprep.mubr.bf16.mxu1 %v621_v28  ;;  %v537_v28 = vld [vmem:[#allocation3 + $0xbf8] sm:$0xff] }
 0x393   :  { %5981 = vmatpush1.bf16.msra.mxu0 %v9432_v29  ;;  %v716_v29 = vpack.c.bf16 %v512_v26, %v500_v25 }
 0x394   :  { %5982 = vmatprep.subr.bf16.mxu0 %v9437_v30  ;;  %v729_v30 = vpack.c.bf16 %v537_v28, %v525_v27  ;;  %v9453_v27 = vld [vmem:[#allocation9 + $0x110] ss:$8 sps:$4 sm:$0xff]  }
 0x397   :  { %5983 = vmatpush1.bf16.msra.mxu0 %v9435_v35  ;;  %v9954_v35 = vshrl.u32 %v1116_v34, 7 }
 0x398   :  { %5984 = vmatprep.subr.bf16.mxu0 %v9440_v36 }
 0x399   :  { %4114 = vmatmul.mubr.bf16.gmra.mrb[24].mxu0 %v620_v37  ;;  %5272 = vmatmul.mubr.bf16.gmra.mrb[24].mxu1 %v620_v37  ;;  %v9957_v36 = vsub.s32 0, %v9954_v35  ;;  %v1126_v37 = vsub.s32 2, %v9954_v35 }
 0x39a   :  { %4123 = vmatprep.mubr.bf16.mxu0 %v633_v38  ;;  %5281 = vmatprep.mubr.bf16.mxu1 %v633_v38  ;;  %v1114_v38 = vld [vmem:[#allocation8] sm:$0xf] }
 0x39b   :  { %5985 = vmatpush1.bf16.msra.mxu0 %v9438_v39  ;;  %v1122_v39 = vsub.s32 1, %v9954_v35  ;;  %v9963_v41 = vrot.slane %v1114_v38, %v9957_v36  ;;  %v9965_v42 = vrot.slane %v1114_v38, %v1126_v37 }
 0x39c   :  { %5986 = vmatprep.subr.bf16.mxu0 %v9443_v40  ;;  %v1130_v40 = vsub.s32 3, %v9954_v35 }
 0x39d   :  { %v9969_v43 = vrot.slane %v1114_v38, %v1122_v39 }
 0x39e   :  { %v9971_v44 = vrot.slane %v1114_v38, %v1130_v40 }
 0x39f   :  { %5987 = vmatpush1.bf16.msra.mxu0 %v9441_v45 }
 0x3a0   :  { %5988 = vmatprep.subr.bf16.mxu0 %v9446_v46 }
 0x3a1   :  { %4124 = vmatmul.mubr.bf16.gmra.mrb[28].mxu0 %v632_v47  ;;  %5282 = vmatmul.mubr.bf16.gmra.mrb[28].mxu1 %v632_v47 }
 0x3a2   :  { %4133 = vmatprep.mubr.bf16.mxu0 %v645_v48  ;;  %5291 = vmatprep.mubr.bf16.mxu1 %v645_v48 }
 0x3a3   :  { %5989 = vmatpush1.bf16.msra.mxu0 %v9444_v49 }
 0x3a4   :  { %5990 = vmatprep.subr.bf16.mxu0 %v9449_v10 }
 0x3a7   :  { %5991 = vmatpush1.bf16.msra.mxu0 %v9447_v13 }
 0x3a8   :  { %6153 = vmatprep.subr.bf16.mxu0 %v9452_v22 }
 0x3a9   :  { %4134 = vmatmul.mubr.bf16.gmra.mrb[32].mxu0 %v644_v54  ;;  %5292 = vmatmul.mubr.bf16.gmra.mrb[32].mxu1 %v644_v54 }
 0x3aa   :  { %4143 = vmatprep.mubr.bf16.mxu0 %v657_v55  ;;  %5301 = vmatprep.mubr.bf16.mxu1 %v657_v55 }
 0x3b1   :  { %4144 = vmatmul.mubr.bf16.gmra.mrb[36].mxu0 %v656_v60  ;;  %5302 = vmatmul.mubr.bf16.gmra.mrb[36].mxu1 %v656_v60 }
 0x3b2   :  { %4153 = vmatprep.mubr.bf16.mxu0 %v669_v61  ;;  %5311 = vmatprep.mubr.bf16.mxu1 %v669_v61 }
 0x3b9   :  { %4154 = vmatmul.mubr.bf16.gmra.mrb[40].mxu0 %v668_v2  ;;  %5312 = vmatmul.mubr.bf16.gmra.mrb[40].mxu1 %v668_v2 }
 0x3ba   :  { %4163 = vmatprep.mubr.bf16.mxu0 %v681_v3  ;;  %5321 = vmatprep.mubr.bf16.mxu1 %v681_v3 }
 0x3c1   :  { %4164 = vmatmul.mubr.bf16.gmra.mrb[44].mxu0 %v680_v8  ;;  %5322 = vmatmul.mubr.bf16.gmra.mrb[44].mxu1 %v680_v8 }
 0x3c2   :  { %4173 = vmatprep.mubr.bf16.mxu0 %v693_v9  ;;  %5331 = vmatprep.mubr.bf16.mxu1 %v693_v9 }
 0x3c9   :  { %4174 = vmatmul.mubr.bf16.gmra.mrb[48].mxu0 %v692_v16  ;;  %5332 = vmatmul.mubr.bf16.gmra.mrb[48].mxu1 %v692_v16  ;;  %v9455_v16 = vld [vmem:[#allocation9 + $0x114] ss:$8 sps:$4 sm:$0xff]  }
 0x3ca   :  { %4183 = vmatprep.mubr.bf16.mxu0 %v705_v17  ;;  %5341 = vmatprep.mubr.bf16.mxu1 %v705_v17 }
 0x3d1   :  { %4184 = vmatmul.mubr.bf16.gmra.mrb[52].mxu0 %v704_v23  ;;  %5342 = vmatmul.mubr.bf16.gmra.mrb[52].mxu1 %v704_v23 }
 0x3d2   :  { %4193 = vmatprep.mubr.bf16.mxu0 %v717_v24  ;;  %5351 = vmatprep.mubr.bf16.mxu1 %v717_v24 }
 0x3d9   :  { %4194 = vmatmul.mubr.bf16.gmra.mrb[56].mxu0 %v716_v29  ;;  %5352 = vmatmul.mubr.bf16.gmra.mrb[56].mxu1 %v716_v29 }
 0x3da   :  { %4203 = vmatprep.mubr.bf16.mxu0 %v729_v30  ;;  %5361 = vmatprep.mubr.bf16.mxu1 %v729_v30 }
 0x3e1   :  { %4204 = vmatmul.mubr.bf16.gmra.mrb[60].mxu0 %v728_v33  ;;  %5362 = vmatmul.mubr.bf16.gmra.mrb[60].mxu1 %v728_v33 }
 0x43c   :  { %v4055_v45 = vpop.f32.mrb[0].mxu0  ;;  %v5213_v46 = vpop.f32.mrb[0].mxu1 }
 0x43d   :  { %v7901_v47 = vadd.f32 %v4055_v45, %v9963_v41  ;;  %v7965_v48 = vadd.f32 %v5213_v46, %v9965_v42  ;;  %v4057_v49 = vpop.f32.mrb[1].mxu0  ;;  %v5215_v50 = vpop.f32.mrb[1].mxu1 }
 0x43e   :  { %v7902_v51 = vadd.f32 %v4057_v49, %v9969_v43  ;;  %v7966_v52 = vadd.f32 %v5215_v50, %v9971_v44  ;;  %v4059_v53 = vpop.f32.mrb[2].mxu0  ;;  %v5217_v54 = vpop.f32.mrb[2].mxu1 }
 0x43f   :  { %v7903_v55 = vadd.f32 %v4059_v53, %v9963_v41  ;;  %v7967_v56 = vadd.f32 %v5217_v54, %v9965_v42  ;;  %v4061_v57 = vpop.f32.mrb[3].mxu0  ;;  %v5219_v58 = vpop.f32.mrb[3].mxu1  ;;  %v5372_v61 = vmax.f32 %v7901_v47, 0.0  ;;  %v5374_v62 = vmax.f32 %v7965_v48, 0.0 }
 0x440   :  { %v7904_v59 = vadd.f32 %v4061_v57, %v9969_v43  ;;  %v7968_v60 = vadd.f32 %v5219_v58, %v9971_v44  ;;  %v5373_v1 = vmax.f32 %v7902_v51, 0.0  ;;  %v5375_v2 = vmax.f32 %v7966_v52, 0.0  ;;  %v9456_v51 = vld [vmem:[#allocation9 + $0x120] ss:$8 sps:$4 sm:$0xff]  }
 0x441   :  { %v5376_v63 = vmax.f32 %v7903_v55, 0.0  ;;  %v5378_v0 = vmax.f32 %v7967_v56, 0.0  ;;  %v9461_v56 = vld [vmem:[#allocation9 + $0x134] ss:$8 sps:$4 sm:$0xff]  }
 0x442   :  { %v5377_v3 = vmax.f32 %v7904_v59, 0.0  ;;  %v5379_v4 = vmax.f32 %v7968_v60, 0.0 }
 0x443   :  { %v5500_v5 = vpack.c.bf16 %v5376_v63, %v5372_v61  ;;  %v9981_v6 = vpack.c.bf16 %v5378_v0, %v5374_v62 }
 0x444   :  { %v5501_v7 = vpack.c.bf16 %v5377_v3, %v5373_v1  ;;  %v9983_v8 = vpack.c.bf16 %v5379_v4, %v5375_v2  ;;  %v4065_v9 = vpop.f32.mrb[4].mxu0  ;;  %v5223_v10 = vpop.f32.mrb[4].mxu1  ;;  %v9459_v3 = vld [vmem:[#allocation9 + $0x130] ss:$8 sps:$4 sm:$0xff]  }
 0x445   :  { %v7905_v12 = vadd.f32 %v4065_v9, %v9963_v41  ;;  %v7969_v13 = vadd.f32 %v5223_v10, %v9965_v42  ;;  %v4067_v14 = vpop.f32.mrb[5].mxu0  ;;  %v5225_v15 = vpop.f32.mrb[5].mxu1  ;;  %v9464_v10 = vld [vmem:[#allocation9 + $0x144] ss:$8 sps:$4 sm:$0xff]  }
 0x446   :  { %v7906_v17 = vadd.f32 %v4067_v14, %v9969_v43  ;;  %v7970_v18 = vadd.f32 %v5225_v15, %v9971_v44  ;;  %v4069_v19 = vpop.f32.mrb[6].mxu0  ;;  %v5227_v20 = vpop.f32.mrb[6].mxu1  ;;  %5992 = vmatprep.mubr.bf16.mxu0 %v5501_v7 }
 0x447   :  { %v7907_v21 = vadd.f32 %v4069_v19, %v9963_v41  ;;  %v7971_v22 = vadd.f32 %v5227_v20, %v9965_v42  ;;  %v4071_v23 = vpop.f32.mrb[7].mxu0  ;;  %v5229_v24 = vpop.f32.mrb[7].mxu1  ;;  %5993 = vmatmul.mubr.bf16.vlgmr.msra.gmra.mrb[64].mxu0 %v5500_v5  ;;  %v5380_v28 = vmax.f32 %v7905_v12, 0.0  ;;  %v5382_v29 = vmax.f32 %v7969_v13, 0.0 }
 0x448   :  { %v7908_v25 = vadd.f32 %v4071_v23, %v9969_v43  ;;  %v7972_v26 = vadd.f32 %v5229_v24, %v9971_v44  ;;  %6154 = vmatpush1.bf16.msra.mxu0 %v9450_v11  ;;  %v5381_v33 = vmax.f32 %v7906_v17, 0.0  ;;  %v5383_v37 = vmax.f32 %v7970_v18, 0.0 }
 0x449   :  { %v5384_v30 = vmax.f32 %v7907_v21, 0.0  ;;  %v5386_v31 = vmax.f32 %v7971_v22, 0.0  ;;  %6155 = vmatprep.subr.bf16.mxu0 %v9455_v16  ;;  %v9462_v21 = vld [vmem:[#allocation9 + $0x140] ss:$8 sps:$4 sm:$0xff]  }
 0x44a   :  { %v5385_v38 = vmax.f32 %v7908_v25, 0.0  ;;  %v5387_v40 = vmax.f32 %v7972_v26, 0.0  ;;  %v9467_v26 = vld [vmem:[#allocation9 + $0x154] ss:$8 sps:$4 sm:$0xff]  }
 0x44b   :  { %v5504_v45 = vpack.c.bf16 %v5384_v30, %v5380_v28  ;;  %v9993_v46 = vpack.c.bf16 %v5386_v31, %v5382_v29 }
 0x44c   :  { %v5505_v47 = vpack.c.bf16 %v5385_v38, %v5381_v33  ;;  %v9995_v48 = vpack.c.bf16 %v5387_v40, %v5383_v37  ;;  %v4075_v49 = vpop.f32.mrb[8].mxu0  ;;  %v5233_v50 = vpop.f32.mrb[8].mxu1  ;;  %6156 = vmatpush1.bf16.msra.mxu0 %v9453_v27 }
 0x44d   :  { %v7909_v52 = vadd.f32 %v4075_v49, %v9963_v41  ;;  %v7973_v53 = vadd.f32 %v5233_v50, %v9965_v42  ;;  %v4077_v54 = vpop.f32.mrb[9].mxu0  ;;  %v5235_v55 = vpop.f32.mrb[9].mxu1  ;;  %6157 = vmatprep.subr.bf16.mxu0 %v9458_v32 }
 0x44e   :  { %v7910_v57 = vadd.f32 %v4077_v54, %v9969_v43  ;;  %v7974_v58 = vadd.f32 %v5235_v55, %v9971_v44  ;;  %v4079_v59 = vpop.f32.mrb[10].mxu0  ;;  %v5237_v60 = vpop.f32.mrb[10].mxu1  ;;  %6002 = vmatprep.mubr.bf16.mxu0 %v5505_v47 }
 0x44f   :  { %v7911_v61 = vadd.f32 %v4079_v59, %v9963_v41  ;;  %v7975_v62 = vadd.f32 %v5237_v60, %v9965_v42  ;;  %v4081_v63 = vpop.f32.mrb[11].mxu0  ;;  %v5239_v0 = vpop.f32.mrb[11].mxu1  ;;  %6003 = vmatmul.mubr.bf16.gmra.mrb[68].mxu0 %v5504_v45  ;;  %v5388_v4 = vmax.f32 %v7909_v52, 0.0  ;;  %v5390_v5 = vmax.f32 %v7973_v53, 0.0  ;;  %v9465_v45 = vld [vmem:[#allocation9 + $0x150] ss:$8 sps:$4 sm:$0xff]  }
 0x450   :  { %v7912_v1 = vadd.f32 %v4081_v63, %v9969_v43  ;;  %v7976_v2 = vadd.f32 %v5239_v0, %v9971_v44  ;;  %6158 = vmatpush1.bf16.msra.mxu0 %v9456_v51  ;;  %v5389_v11 = vmax.f32 %v7910_v57, 0.0  ;;  %v5391_v12 = vmax.f32 %v7974_v58, 0.0  ;;  %v9470_v52 = vld [vmem:[#allocation9 + $0x164] ss:$8 sps:$4 sm:$0xff]   ;;  %v9468_v63 = vld [vmem:[#allocation9 + $0x160] ss:$8 sps:$4 sm:$0xff]  }
 0x451   :  { %v5392_v7 = vmax.f32 %v7911_v61, 0.0  ;;  %v5394_v9 = vmax.f32 %v7975_v62, 0.0  ;;  %6159 = vmatprep.subr.bf16.mxu0 %v9461_v56 }
 0x452   :  { %v5393_v13 = vmax.f32 %v7912_v1, 0.0  ;;  %v5395_v14 = vmax.f32 %v7976_v2, 0.0 }
 0x453   :  { %v5508_v15 = vpack.c.bf16 %v5392_v7, %v5388_v4  ;;  %v10005_v16 = vpack.c.bf16 %v5394_v9, %v5390_v5  ;;  %v9473_v4 = vld [vmem:[#allocation9 + $0x174] ss:$8 sps:$4 sm:$0xff]  }
 0x454   :  { %v5509_v17 = vpack.c.bf16 %v5393_v13, %v5389_v11  ;;  %v10007_v18 = vpack.c.bf16 %v5395_v14, %v5391_v12  ;;  %v4085_v19 = vpop.f32.mrb[12].mxu0  ;;  %v5243_v20 = vpop.f32.mrb[12].mxu1  ;;  %6160 = vmatpush1.bf16.msra.mxu0 %v9459_v3 }
 0x455   :  { %v7913_v22 = vadd.f32 %v4085_v19, %v9963_v41  ;;  %v7977_v23 = vadd.f32 %v5243_v20, %v9965_v42  ;;  %v4087_v24 = vpop.f32.mrb[13].mxu0  ;;  %v5245_v25 = vpop.f32.mrb[13].mxu1  ;;  %6161 = vmatprep.subr.bf16.mxu0 %v9464_v10  ;;  %v9471_v19 = vld [vmem:[#allocation9 + $0x170] ss:$8 sps:$4 sm:$0xff]  }
 0x456   :  { %v7914_v27 = vadd.f32 %v4087_v24, %v9969_v43  ;;  %v7978_v28 = vadd.f32 %v5245_v25, %v9971_v44  ;;  %v4089_v29 = vpop.f32.mrb[14].mxu0  ;;  %v5247_v30 = vpop.f32.mrb[14].mxu1  ;;  %6012 = vmatprep.mubr.bf16.mxu0 %v5509_v17  ;;  %v9476_v24 = vld [vmem:[#allocation9 + $0x184] ss:$8 sps:$4 sm:$0xff]  }
 0x457   :  { %v7915_v31 = vadd.f32 %v4089_v29, %v9963_v41  ;;  %v7979_v32 = vadd.f32 %v5247_v30, %v9965_v42  ;;  %v4091_v33 = vpop.f32.mrb[15].mxu0  ;;  %v5249_v37 = vpop.f32.mrb[15].mxu1  ;;  %6013 = vmatmul.mubr.bf16.gmra.mrb[72].mxu0 %v5508_v15  ;;  %v5396_v47 = vmax.f32 %v7913_v22, 0.0  ;;  %v5398_v49 = vmax.f32 %v7977_v23, 0.0 }
 0x458   :  { %v7916_v38 = vadd.f32 %v4091_v33, %v9969_v43  ;;  %v7980_v40 = vadd.f32 %v5249_v37, %v9971_v44  ;;  %6162 = vmatpush1.bf16.msra.mxu0 %v9462_v21  ;;  %v5397_v53 = vmax.f32 %v7914_v27, 0.0  ;;  %v5399_v54 = vmax.f32 %v7978_v28, 0.0 }
 0x459   :  { %v5400_v50 = vmax.f32 %v7915_v31, 0.0  ;;  %v5402_v51 = vmax.f32 %v7979_v32, 0.0  ;;  %6163 = vmatprep.subr.bf16.mxu0 %v9467_v26 }
 0x45a   :  { %v5401_v55 = vmax.f32 %v7916_v38, 0.0  ;;  %v5403_v56 = vmax.f32 %v7980_v40, 0.0  ;;  %v9474_v38 = vld [vmem:[#allocation9 + $0x180] ss:$8 sps:$4 sm:$0xff]  }
 0x45b   :  { %v5512_v57 = vpack.c.bf16 %v5400_v50, %v5396_v47  ;;  %v10017_v58 = vpack.c.bf16 %v5402_v51, %v5398_v49  ;;  %v9479_v50 = vld [vmem:[#allocation9 + $0x194] ss:$8 sps:$4 sm:$0xff]  }
 0x45c   :  { %v5513_v59 = vpack.c.bf16 %v5401_v55, %v5397_v53  ;;  %v10019_v60 = vpack.c.bf16 %v5403_v56, %v5399_v54  ;;  %v4095_v61 = vpop.f32.mrb[16].mxu0  ;;  %v5253_v62 = vpop.f32.mrb[16].mxu1  ;;  %6164 = vmatpush1.bf16.msra.mxu0 %v9465_v45 }
 0x45d   :  { %v7917_v0 = vadd.f32 %v4095_v61, %v9963_v41  ;;  %v7981_v1 = vadd.f32 %v5253_v62, %v9965_v42  ;;  %v4097_v2 = vpop.f32.mrb[17].mxu0  ;;  %v5255_v3 = vpop.f32.mrb[17].mxu1  ;;  %6165 = vmatprep.subr.bf16.mxu0 %v9470_v52 }
 0x45e   :  { %v7918_v5 = vadd.f32 %v4097_v2, %v9969_v43  ;;  %v7982_v7 = vadd.f32 %v5255_v3, %v9971_v44  ;;  %v4099_v9 = vpop.f32.mrb[18].mxu0  ;;  %v5257_v10 = vpop.f32.mrb[18].mxu1  ;;  %6022 = vmatprep.mubr.bf16.mxu0 %v5513_v59 }
 0x45f   :  { %v7919_v11 = vadd.f32 %v4099_v9, %v9963_v41  ;;  %v7983_v12 = vadd.f32 %v5257_v10, %v9965_v42  ;;  %v4101_v13 = vpop.f32.mrb[19].mxu0  ;;  %v5259_v14 = vpop.f32.mrb[19].mxu1  ;;  %6023 = vmatmul.mubr.bf16.gmra.mrb[76].mxu0 %v5512_v57  ;;  %v5404_v20 = vmax.f32 %v7917_v0, 0.0  ;;  %v5406_v21 = vmax.f32 %v7981_v1, 0.0 }
 0x460   :  { %v7920_v15 = vadd.f32 %v4101_v13, %v9969_v43  ;;  %v7984_v17 = vadd.f32 %v5259_v14, %v9971_v44  ;;  %6166 = vmatpush1.bf16.msra.mxu0 %v9468_v63  ;;  %v5405_v25 = vmax.f32 %v7918_v5, 0.0  ;;  %v5407_v26 = vmax.f32 %v7982_v7, 0.0  ;;  %v9477_v63 = vld [vmem:[#allocation9 + $0x190] ss:$8 sps:$4 sm:$0xff]  }
 0x461   :  { %v5408_v22 = vmax.f32 %v7919_v11, 0.0  ;;  %v5410_v23 = vmax.f32 %v7983_v12, 0.0  ;;  %6167 = vmatprep.subr.bf16.mxu0 %v9473_v4  ;;  %v9482_v4 = vld [vmem:[#allocation9 + $0x1a4] ss:$8 sps:$4 sm:$0xff]  }
 0x462   :  { %v5409_v27 = vmax.f32 %v7920_v15, 0.0  ;;  %v5411_v28 = vmax.f32 %v7984_v17, 0.0 }
 0x463   :  { %v5516_v29 = vpack.c.bf16 %v5408_v22, %v5404_v20  ;;  %v10029_v30 = vpack.c.bf16 %v5410_v23, %v5406_v21 }
 0x464   :  { %v5517_v31 = vpack.c.bf16 %v5409_v27, %v5405_v25  ;;  %v10031_v32 = vpack.c.bf16 %v5411_v28, %v5407_v26  ;;  %v4105_v33 = vpop.f32.mrb[20].mxu0  ;;  %v5263_v37 = vpop.f32.mrb[20].mxu1  ;;  %6168 = vmatpush1.bf16.msra.mxu0 %v9471_v19  ;;  %v9480_v19 = vld [vmem:[#allocation9 + $0x1a0] ss:$8 sps:$4 sm:$0xff]  }
 0x465   :  { %v7921_v40 = vadd.f32 %v4105_v33, %v9963_v41  ;;  %v7985_v45 = vadd.f32 %v5263_v37, %v9965_v42  ;;  %v4107_v47 = vpop.f32.mrb[21].mxu0  ;;  %v5265_v49 = vpop.f32.mrb[21].mxu1  ;;  %6169 = vmatprep.subr.bf16.mxu0 %v9476_v24  ;;  %v9485_v24 = vld [vmem:[#allocation9 + $0x1b4] ss:$8 sps:$4 sm:$0xff]  }
 0x466   :  { %v7922_v51 = vadd.f32 %v4107_v47, %v9969_v43  ;;  %v7986_v52 = vadd.f32 %v5265_v49, %v9971_v44  ;;  %v4109_v53 = vpop.f32.mrb[22].mxu0  ;;  %v5267_v54 = vpop.f32.mrb[22].mxu1  ;;  %6032 = vmatprep.mubr.bf16.mxu0 %v5517_v31 }
 0x467   :  { %v7923_v55 = vadd.f32 %v4109_v53, %v9963_v41  ;;  %v7987_v56 = vadd.f32 %v5267_v54, %v9965_v42  ;;  %v4111_v57 = vpop.f32.mrb[23].mxu0  ;;  %v5269_v59 = vpop.f32.mrb[23].mxu1  ;;  %6033 = vmatmul.mubr.bf16.gmra.mrb[80].mxu0 %v5516_v29  ;;  %v5412_v0 = vmax.f32 %v7921_v40, 0.0  ;;  %v5414_v1 = vmax.f32 %v7985_v45, 0.0  ;;  %v9483_v45 = vld [vmem:[#allocation9 + $0x1b0] ss:$8 sps:$4 sm:$0xff]  }
 0x468   :  { %v7924_v61 = vadd.f32 %v4111_v57, %v9969_v43  ;;  %v7988_v62 = vadd.f32 %v5269_v59, %v9971_v44  ;;  %6170 = vmatpush1.bf16.msra.mxu0 %v9474_v38  ;;  %v5413_v5 = vmax.f32 %v7922_v51, 0.0  ;;  %v5415_v7 = vmax.f32 %v7986_v52, 0.0  ;;  %v9488_v52 = vld [vmem:[#allocation9 + $0x1c4] ss:$8 sps:$4 sm:$0xff]  }
 0x469   :  { %v5416_v2 = vmax.f32 %v7923_v55, 0.0  ;;  %v5418_v3 = vmax.f32 %v7987_v56, 0.0  ;;  %6171 = vmatprep.subr.bf16.mxu0 %v9479_v50 }
 0x46a   :  { %v5417_v9 = vmax.f32 %v7924_v61, 0.0  ;;  %v5419_v10 = vmax.f32 %v7988_v62, 0.0 }
 0x46b   :  { %v5520_v11 = vpack.c.bf16 %v5416_v2, %v5412_v0  ;;  %v10041_v12 = vpack.c.bf16 %v5418_v3, %v5414_v1  ;;  %v9486_v1 = vld [vmem:[#allocation9 + $0x1c0] ss:$8 sps:$4 sm:$0xff]  }
 0x46c   :  { %v5521_v13 = vpack.c.bf16 %v5417_v9, %v5413_v5  ;;  %v10043_v14 = vpack.c.bf16 %v5419_v10, %v5415_v7  ;;  %v4115_v15 = vpop.f32.mrb[24].mxu0  ;;  %v5273_v17 = vpop.f32.mrb[24].mxu1  ;;  %6172 = vmatpush1.bf16.msra.mxu0 %v9477_v63  ;;  %v9491_v7 = vld [vmem:[#allocation9 + $0x1d4] ss:$8 sps:$4 sm:$0xff]  }
 0x46d   :  { %v7925_v20 = vadd.f32 %v4115_v15, %v9963_v41  ;;  %v7989_v21 = vadd.f32 %v5273_v17, %v9965_v42  ;;  %v4117_v22 = vpop.f32.mrb[25].mxu0  ;;  %v5275_v23 = vpop.f32.mrb[25].mxu1  ;;  %6173 = vmatprep.subr.bf16.mxu0 %v9482_v4 }
 0x46e   :  { %v7926_v25 = vadd.f32 %v4117_v22, %v9969_v43  ;;  %v7990_v26 = vadd.f32 %v5275_v23, %v9971_v44  ;;  %v4119_v27 = vpop.f32.mrb[26].mxu0  ;;  %v5277_v28 = vpop.f32.mrb[26].mxu1  ;;  %6042 = vmatprep.mubr.bf16.mxu0 %v5521_v13  ;;  %v9489_v23 = vld [vmem:[#allocation9 + $0x1d0] ss:$8 sps:$4 sm:$0xff]  }
 0x46f   :  { %v7927_v29 = vadd.f32 %v4119_v27, %v9963_v41  ;;  %v7991_v31 = vadd.f32 %v5277_v28, %v9965_v42  ;;  %v4121_v33 = vpop.f32.mrb[27].mxu0  ;;  %v5279_v37 = vpop.f32.mrb[27].mxu1  ;;  %6043 = vmatmul.mubr.bf16.gmra.mrb[84].mxu0 %v5520_v11  ;;  %v5420_v47 = vmax.f32 %v7925_v20, 0.0  ;;  %v5422_v49 = vmax.f32 %v7989_v21, 0.0  ;;  %v9494_v28 = vld [vmem:[#allocation9 + $0x1e4] ss:$8 sps:$4 sm:$0xff]  }
 0x470   :  { %v7928_v38 = vadd.f32 %v4121_v33, %v9969_v43  ;;  %v7992_v40 = vadd.f32 %v5279_v37, %v9971_v44  ;;  %6174 = vmatpush1.bf16.msra.mxu0 %v9480_v19  ;;  %v5421_v53 = vmax.f32 %v7926_v25, 0.0  ;;  %v5423_v54 = vmax.f32 %v7990_v26, 0.0 }
 0x471   :  { %v5424_v50 = vmax.f32 %v7927_v29, 0.0  ;;  %v5426_v51 = vmax.f32 %v7991_v31, 0.0  ;;  %6175 = vmatprep.subr.bf16.mxu0 %v9485_v24 }
 0x472   :  { %v5425_v55 = vmax.f32 %v7928_v38, 0.0  ;;  %v5427_v56 = vmax.f32 %v7992_v40, 0.0 }
 0x473   :  { %v5524_v57 = vpack.c.bf16 %v5424_v50, %v5420_v47  ;;  %v10053_v59 = vpack.c.bf16 %v5426_v51, %v5422_v49  ;;  %v9492_v51 = vld [vmem:[#allocation9 + $0x1e0] ss:$8 sps:$4 sm:$0xff]  }
 0x474   :  { %v5525_v61 = vpack.c.bf16 %v5425_v55, %v5421_v53  ;;  %v10055_v62 = vpack.c.bf16 %v5427_v56, %v5423_v54  ;;  %v4125_v63 = vpop.f32.mrb[28].mxu0  ;;  %v5283_v0 = vpop.f32.mrb[28].mxu1  ;;  %6176 = vmatpush1.bf16.msra.mxu0 %v9483_v45  ;;  %v9497_v56 = vld [vmem:[#allocation9 + $0x1f4] ss:$8 sps:$4 sm:$0xff]  }
 0x475   :  { %v7929_v2 = vadd.f32 %v4125_v63, %v9963_v41  ;;  %v7993_v3 = vadd.f32 %v5283_v0, %v9965_v42  ;;  %v4127_v4 = vpop.f32.mrb[29].mxu0  ;;  %v5285_v5 = vpop.f32.mrb[29].mxu1  ;;  %6177 = vmatprep.subr.bf16.mxu0 %v9488_v52 }
 0x476   :  { %v7930_v9 = vadd.f32 %v4127_v4, %v9969_v43  ;;  %v7994_v10 = vadd.f32 %v5285_v5, %v9971_v44  ;;  %v4129_v11 = vpop.f32.mrb[30].mxu0  ;;  %v5287_v13 = vpop.f32.mrb[30].mxu1  ;;  %6052 = vmatprep.mubr.bf16.mxu0 %v5525_v61 }
 0x477   :  { %v7931_v15 = vadd.f32 %v4129_v11, %v9963_v41  ;;  %v7995_v17 = vadd.f32 %v5287_v13, %v9965_v42  ;;  %v4131_v19 = vpop.f32.mrb[31].mxu0  ;;  %v5289_v20 = vpop.f32.mrb[31].mxu1  ;;  %6053 = vmatmul.mubr.bf16.gmra.mrb[88].mxu0 %v5524_v57  ;;  %v5428_v24 = vmax.f32 %v7929_v2, 0.0  ;;  %v5430_v25 = vmax.f32 %v7993_v3, 0.0 }
 0x478   :  { %v7932_v21 = vadd.f32 %v4131_v19, %v9969_v43  ;;  %v7996_v22 = vadd.f32 %v5289_v20, %v9971_v44  ;;  %6178 = vmatpush1.bf16.msra.mxu0 %v9486_v1  ;;  %v5429_v29 = vmax.f32 %v7930_v9, 0.0  ;;  %v5431_v31 = vmax.f32 %v7994_v10, 0.0  ;;  %v9495_v9 = vld [vmem:[#allocation9 + $0x1f0] ss:$8 sps:$4 sm:$0xff]  }
 0x479   :  { %v5432_v26 = vmax.f32 %v7931_v15, 0.0  ;;  %v5434_v27 = vmax.f32 %v7995_v17, 0.0  ;;  %6179 = vmatprep.subr.bf16.mxu0 %v9491_v7 }
 0x47a   :  { %v5433_v33 = vmax.f32 %v7932_v21, 0.0  ;;  %v5435_v37 = vmax.f32 %v7996_v22, 0.0 }
 0x47b   :  { %v5528_v38 = vpack.c.bf16 %v5432_v26, %v5428_v24  ;;  %v10065_v40 = vpack.c.bf16 %v5434_v27, %v5430_v25 }
 0x47c   :  { %v5529_v45 = vpack.c.bf16 %v5433_v33, %v5429_v29  ;;  %v10067_v47 = vpack.c.bf16 %v5435_v37, %v5431_v31  ;;  %v4135_v49 = vpop.f32.mrb[32].mxu0  ;;  %v5293_v50 = vpop.f32.mrb[32].mxu1  ;;  %6180 = vmatpush1.bf16.msra.mxu0 %v9489_v23 }
 0x47d   :  { %v7933_v52 = vadd.f32 %v4135_v49, %v9963_v41  ;;  %v7997_v53 = vadd.f32 %v5293_v50, %v9965_v42  ;;  %v4137_v54 = vpop.f32.mrb[33].mxu0  ;;  %v5295_v55 = vpop.f32.mrb[33].mxu1  ;;  %6181 = vmatprep.subr.bf16.mxu0 %v9494_v28 }
 0x47e   :  { %v7934_v57 = vadd.f32 %v4137_v54, %v9969_v43  ;;  %v7998_v61 = vadd.f32 %v5295_v55, %v9971_v44  ;;  %v4139_v63 = vpop.f32.mrb[34].mxu0  ;;  %v5297_v0 = vpop.f32.mrb[34].mxu1  ;;  %6062 = vmatprep.mubr.bf16.mxu0 %v5529_v45 }
 0x47f   :  { %v7935_v1 = vadd.f32 %v4139_v63, %v9963_v41  ;;  %v7999_v2 = vadd.f32 %v5297_v0, %v9965_v42  ;;  %v4141_v3 = vpop.f32.mrb[35].mxu0  ;;  %v5299_v4 = vpop.f32.mrb[35].mxu1  ;;  %6063 = vmatmul.mubr.bf16.gmra.mrb[92].mxu0 %v5528_v38  ;;  %v5436_v10 = vmax.f32 %v7933_v52, 0.0  ;;  %v5438_v11 = vmax.f32 %v7997_v53, 0.0 }
 0x480   :  { %v7936_v5 = vadd.f32 %v4141_v3, %v9969_v43  ;;  %v8000_v7 = vadd.f32 %v5299_v4, %v9971_v44  ;;  %6182 = vmatpush1.bf16.msra.mxu0 %v9492_v51  ;;  %v5437_v17 = vmax.f32 %v7934_v57, 0.0  ;;  %v5439_v19 = vmax.f32 %v7998_v61, 0.0 }
 0x481   :  { %v5440_v13 = vmax.f32 %v7935_v1, 0.0  ;;  %v5442_v15 = vmax.f32 %v7999_v2, 0.0  ;;  %6183 = vmatprep.subr.bf16.mxu0 %v9497_v56 }
 0x482   :  { %v5441_v20 = vmax.f32 %v7936_v5, 0.0  ;;  %v5443_v21 = vmax.f32 %v8000_v7, 0.0 }
 0x483   :  { %v5532_v22 = vpack.c.bf16 %v5440_v13, %v5436_v10  ;;  %v10077_v23 = vpack.c.bf16 %v5442_v15, %v5438_v11 }
 0x484   :  { %v5533_v24 = vpack.c.bf16 %v5441_v20, %v5437_v17  ;;  %v10079_v25 = vpack.c.bf16 %v5443_v21, %v5439_v19  ;;  %v4145_v26 = vpop.f32.mrb[36].mxu0  ;;  %v5303_v27 = vpop.f32.mrb[36].mxu1  ;;  %6184 = vmatpush1.bf16.msra.mxu0 %v9495_v9 }
 0x485   :  { %v7937_v28 = vadd.f32 %v4145_v26, %v9963_v41  ;;  %v8001_v29 = vadd.f32 %v5303_v27, %v9965_v42  ;;  %v4147_v31 = vpop.f32.mrb[37].mxu0  ;;  %v5305_v33 = vpop.f32.mrb[37].mxu1 }
 0x486   :  { %v7938_v37 = vadd.f32 %v4147_v31, %v9969_v43  ;;  %v8002_v38 = vadd.f32 %v5305_v33, %v9971_v44  ;;  %v4149_v45 = vpop.f32.mrb[38].mxu0  ;;  %v5307_v49 = vpop.f32.mrb[38].mxu1  ;;  %6072 = vmatprep.mubr.bf16.mxu0 %v5533_v24 }
 0x487   :  { %v7939_v50 = vadd.f32 %v4149_v45, %v9963_v41  ;;  %v8003_v51 = vadd.f32 %v5307_v49, %v9965_v42  ;;  %v4151_v52 = vpop.f32.mrb[39].mxu0  ;;  %v5309_v53 = vpop.f32.mrb[39].mxu1  ;;  %6073 = vmatmul.mubr.bf16.gmra.mrb[96].mxu0 %v5532_v22  ;;  %v5444_v56 = vmax.f32 %v7937_v28, 0.0  ;;  %v5446_v57 = vmax.f32 %v8001_v29, 0.0 }
 0x488   :  { %v7940_v54 = vadd.f32 %v4151_v52, %v9969_v43  ;;  %v8004_v55 = vadd.f32 %v5309_v53, %v9971_v44  ;;  %v5445_v0 = vmax.f32 %v7938_v37, 0.0  ;;  %v5447_v1 = vmax.f32 %v8002_v38, 0.0 }
 0x489   :  { %v5448_v61 = vmax.f32 %v7939_v50, 0.0  ;;  %v5450_v63 = vmax.f32 %v8003_v51, 0.0 }
 0x48a   :  { %v5449_v2 = vmax.f32 %v7940_v54, 0.0  ;;  %v5451_v3 = vmax.f32 %v8004_v55, 0.0 }
 0x48b   :  { %v5536_v4 = vpack.c.bf16 %v5448_v61, %v5444_v56  ;;  %v10089_v5 = vpack.c.bf16 %v5450_v63, %v5446_v57 }
 0x48c   :  { %v5537_v7 = vpack.c.bf16 %v5449_v2, %v5445_v0  ;;  %v10091_v9 = vpack.c.bf16 %v5451_v3, %v5447_v1  ;;  %v4155_v10 = vpop.f32.mrb[40].mxu0  ;;  %v5313_v11 = vpop.f32.mrb[40].mxu1 }
 0x48d   :  { %v7941_v13 = vadd.f32 %v4155_v10, %v9963_v41  ;;  %v8005_v15 = vadd.f32 %v5313_v11, %v9965_v42  ;;  %v4157_v17 = vpop.f32.mrb[41].mxu0  ;;  %v5315_v19 = vpop.f32.mrb[41].mxu1 }
 0x48e   :  { %v7942_v20 = vadd.f32 %v4157_v17, %v9969_v43  ;;  %v8006_v21 = vadd.f32 %v5315_v19, %v9971_v44  ;;  %v4159_v22 = vpop.f32.mrb[42].mxu0  ;;  %v5317_v24 = vpop.f32.mrb[42].mxu1  ;;  %6082 = vmatprep.mubr.bf16.mxu0 %v5537_v7 }
 0x48f   :  { %v7943_v26 = vadd.f32 %v4159_v22, %v9963_v41  ;;  %v8007_v27 = vadd.f32 %v5317_v24, %v9965_v42  ;;  %v4161_v28 = vpop.f32.mrb[43].mxu0  ;;  %v5319_v29 = vpop.f32.mrb[43].mxu1  ;;  %6083 = vmatmul.mubr.bf16.gmra.mrb[100].mxu0 %v5536_v4  ;;  %v5452_v37 = vmax.f32 %v7941_v13, 0.0  ;;  %v5454_v38 = vmax.f32 %v8005_v15, 0.0 }
 0x490   :  { %v7944_v31 = vadd.f32 %v4161_v28, %v9969_v43  ;;  %v8008_v33 = vadd.f32 %v5319_v29, %v9971_v44  ;;  %v5453_v50 = vmax.f32 %v7942_v20, 0.0  ;;  %v5455_v51 = vmax.f32 %v8006_v21, 0.0 }
 0x491   :  { %v5456_v45 = vmax.f32 %v7943_v26, 0.0  ;;  %v5458_v49 = vmax.f32 %v8007_v27, 0.0 }
 0x492   :  { %v5457_v52 = vmax.f32 %v7944_v31, 0.0  ;;  %v5459_v53 = vmax.f32 %v8008_v33, 0.0 }
 0x493   :  { %v5540_v54 = vpack.c.bf16 %v5456_v45, %v5452_v37  ;;  %v10101_v55 = vpack.c.bf16 %v5458_v49, %v5454_v38 }
 0x494   :  { %v5541_v56 = vpack.c.bf16 %v5457_v52, %v5453_v50  ;;  %v10103_v57 = vpack.c.bf16 %v5459_v53, %v5455_v51  ;;  %v4165_v61 = vpop.f32.mrb[44].mxu0  ;;  %v5323_v63 = vpop.f32.mrb[44].mxu1 }
 0x495   :  { %v7945_v0 = vadd.f32 %v4165_v61, %v9963_v41  ;;  %v8009_v1 = vadd.f32 %v5323_v63, %v9965_v42  ;;  %v4167_v2 = vpop.f32.mrb[45].mxu0  ;;  %v5325_v3 = vpop.f32.mrb[45].mxu1 }
 0x496   :  { %v7946_v4 = vadd.f32 %v4167_v2, %v9969_v43  ;;  %v8010_v7 = vadd.f32 %v5325_v3, %v9971_v44  ;;  %v4169_v10 = vpop.f32.mrb[46].mxu0  ;;  %v5327_v11 = vpop.f32.mrb[46].mxu1  ;;  %6092 = vmatprep.mubr.bf16.mxu0 %v5541_v56 }
 0x497   :  { %v7947_v13 = vadd.f32 %v4169_v10, %v9963_v41  ;;  %v8011_v15 = vadd.f32 %v5327_v11, %v9965_v42  ;;  %v4171_v17 = vpop.f32.mrb[47].mxu0  ;;  %v5329_v19 = vpop.f32.mrb[47].mxu1  ;;  %6093 = vmatmul.mubr.bf16.gmra.mrb[104].mxu0 %v5540_v54  ;;  %v5460_v22 = vmax.f32 %v7945_v0, 0.0  ;;  %v5462_v24 = vmax.f32 %v8009_v1, 0.0 }
 0x498   :  { %v7948_v20 = vadd.f32 %v4171_v17, %v9969_v43  ;;  %v8012_v21 = vadd.f32 %v5329_v19, %v9971_v44  ;;  %v5461_v28 = vmax.f32 %v7946_v4, 0.0  ;;  %v5463_v29 = vmax.f32 %v8010_v7, 0.0 }
 0x499   :  { %v5464_v26 = vmax.f32 %v7947_v13, 0.0  ;;  %v5466_v27 = vmax.f32 %v8011_v15, 0.0  ;;  %v9498_v13 = vld [vmem:[#allocation12 + $0x40] sm:$0xff]  }
 0x49a   :  { %v5465_v31 = vmax.f32 %v7948_v20, 0.0  ;;  %v5467_v33 = vmax.f32 %v8012_v21, 0.0  ;;  %v9499_v15 = vld [vmem:[#allocation12] sm:$0xff]   ;;  %7699 = vmatprep.subr.bf16.mxu1 %v9498_v13 }
 0x49b   :  { %v5544_v37 = vpack.c.bf16 %v5464_v26, %v5460_v22  ;;  %v10113_v38 = vpack.c.bf16 %v5466_v27, %v5462_v24  ;;  %7700 = vmatpush3.bf16.msra.mxu1 %v9499_v15 }
 0x49c   :  { %v5545_v45 = vpack.c.bf16 %v5465_v31, %v5461_v28  ;;  %v10115_v49 = vpack.c.bf16 %v5467_v33, %v5463_v29  ;;  %v4175_v50 = vpop.f32.mrb[48].mxu0  ;;  %v5333_v51 = vpop.f32.mrb[48].mxu1 }
 0x49d   :  { %v7949_v52 = vadd.f32 %v4175_v50, %v9963_v41  ;;  %v8013_v53 = vadd.f32 %v5333_v51, %v9965_v42  ;;  %v4177_v54 = vpop.f32.mrb[49].mxu0  ;;  %v5335_v56 = vpop.f32.mrb[49].mxu1 }
 0x49e   :  { %v7950_v61 = vadd.f32 %v4177_v54, %v9969_v43  ;;  %v8014_v63 = vadd.f32 %v5335_v56, %v9971_v44  ;;  %v4179_v0 = vpop.f32.mrb[50].mxu0  ;;  %v5337_v1 = vpop.f32.mrb[50].mxu1  ;;  %6102 = vmatprep.mubr.bf16.mxu0 %v5545_v45 }
 0x49f   :  { %v7951_v2 = vadd.f32 %v4179_v0, %v9963_v41  ;;  %v8015_v3 = vadd.f32 %v5337_v1, %v9965_v42  ;;  %v4181_v4 = vpop.f32.mrb[51].mxu0  ;;  %v5339_v7 = vpop.f32.mrb[51].mxu1  ;;  %6103 = vmatmul.mubr.bf16.gmra.mrb[108].mxu0 %v5544_v37  ;;  %v5468_v17 = vmax.f32 %v7949_v52, 0.0  ;;  %v5470_v19 = vmax.f32 %v8013_v53, 0.0 }
 0x4a0   :  { %v7952_v10 = vadd.f32 %v4181_v4, %v9969_v43  ;;  %v8016_v11 = vadd.f32 %v5339_v7, %v9971_v44  ;;  %v5469_v22 = vmax.f32 %v7950_v61, 0.0  ;;  %v5471_v24 = vmax.f32 %v8014_v63, 0.0 }
 0x4a1   :  { %v5472_v20 = vmax.f32 %v7951_v2, 0.0  ;;  %v5474_v21 = vmax.f32 %v8015_v3, 0.0 }
 0x4a2   :  { %v5473_v26 = vmax.f32 %v7952_v10, 0.0  ;;  %v5475_v27 = vmax.f32 %v8016_v11, 0.0 }
 0x4a3   :  { %v5548_v28 = vpack.c.bf16 %v5472_v20, %v5468_v17  ;;  %v10125_v29 = vpack.c.bf16 %v5474_v21, %v5470_v19 }
 0x4a4   :  { %v5549_v31 = vpack.c.bf16 %v5473_v26, %v5469_v22  ;;  %v10127_v33 = vpack.c.bf16 %v5475_v27, %v5471_v24  ;;  %v4185_v37 = vpop.f32.mrb[52].mxu0  ;;  %v5343_v45 = vpop.f32.mrb[52].mxu1 }
 0x4a5   :  { %v7953_v50 = vadd.f32 %v4185_v37, %v9963_v41  ;;  %v8017_v51 = vadd.f32 %v5343_v45, %v9965_v42  ;;  %v4187_v52 = vpop.f32.mrb[53].mxu0  ;;  %v5345_v53 = vpop.f32.mrb[53].mxu1 }
 0x4a6   :  { %v7954_v54 = vadd.f32 %v4187_v52, %v9969_v43  ;;  %v8018_v56 = vadd.f32 %v5345_v53, %v9971_v44  ;;  %v4189_v61 = vpop.f32.mrb[54].mxu0  ;;  %v5347_v63 = vpop.f32.mrb[54].mxu1  ;;  %6112 = vmatprep.mubr.bf16.mxu0 %v5549_v31 }
 0x4a7   :  { %v7955_v0 = vadd.f32 %v4189_v61, %v9963_v41  ;;  %v8019_v1 = vadd.f32 %v5347_v63, %v9965_v42  ;;  %v4191_v2 = vpop.f32.mrb[55].mxu0  ;;  %v5349_v3 = vpop.f32.mrb[55].mxu1  ;;  %6113 = vmatmul.mubr.bf16.gmra.mrb[112].mxu0 %v5548_v28  ;;  %v5476_v10 = vmax.f32 %v7953_v50, 0.0  ;;  %v5478_v11 = vmax.f32 %v8017_v51, 0.0 }
 0x4a8   :  { %v7956_v4 = vadd.f32 %v4191_v2, %v9969_v43  ;;  %v8020_v7 = vadd.f32 %v5349_v3, %v9971_v44  ;;  %v5477_v17 = vmax.f32 %v7954_v54, 0.0  ;;  %v5479_v19 = vmax.f32 %v8018_v56, 0.0 }
 0x4a9   :  { %v5480_v13 = vmax.f32 %v7955_v0, 0.0  ;;  %v5482_v15 = vmax.f32 %v8019_v1, 0.0 }
 0x4aa   :  { %v5481_v20 = vmax.f32 %v7956_v4, 0.0  ;;  %v5483_v21 = vmax.f32 %v8020_v7, 0.0  ;;  %v9500_v4 = vld [vmem:[#allocation12 + $0x48] sm:$0xff]  }
 0x4ab   :  { %v5552_v22 = vpack.c.bf16 %v5480_v13, %v5476_v10  ;;  %v10137_v24 = vpack.c.bf16 %v5482_v15, %v5478_v11  ;;  %v9501_v7 = vld [vmem:[#allocation12 + $0x8] sm:$0xff]   ;;  %7701 = vmatprep.subr.bf16.mxu1 %v9500_v4 }
 0x4ac   :  { %v5553_v26 = vpack.c.bf16 %v5481_v20, %v5477_v17  ;;  %v10139_v27 = vpack.c.bf16 %v5483_v21, %v5479_v19  ;;  %v4195_v31 = vpop.f32.mrb[56].mxu0  ;;  %v5353_v28 = vpop.f32.mrb[56].mxu1  ;;  %7702 = vmatpush3.bf16.msra.mxu1 %v9501_v7 }
 0x4ad   :  { %v7957_v37 = vadd.f32 %v4195_v31, %v9963_v41  ;;  %v8021_v45 = vadd.f32 %v5353_v28, %v9965_v42  ;;  %v4197_v50 = vpop.f32.mrb[57].mxu0  ;;  %v5355_v51 = vpop.f32.mrb[57].mxu1 }
 0x4ae   :  { %v7958_v52 = vadd.f32 %v4197_v50, %v9969_v43  ;;  %v8022_v53 = vadd.f32 %v5355_v51, %v9971_v44  ;;  %v4199_v54 = vpop.f32.mrb[58].mxu0  ;;  %v5357_v56 = vpop.f32.mrb[58].mxu1  ;;  %6122 = vmatprep.mubr.bf16.mxu0 %v5553_v26 }
 0x4af   :  { %v7959_v61 = vadd.f32 %v4199_v54, %v9963_v41  ;;  %v8023_v63 = vadd.f32 %v5357_v56, %v9965_v42  ;;  %v4201_v0 = vpop.f32.mrb[59].mxu0  ;;  %v5359_v1 = vpop.f32.mrb[59].mxu1  ;;  %6123 = vmatmul.mubr.bf16.gmra.mrb[116].mxu0 %v5552_v22  ;;  %v5484_v10 = vmax.f32 %v7957_v37, 0.0  ;;  %v5486_v11 = vmax.f32 %v8021_v45, 0.0 }
 0x4b0   :  { %v7960_v2 = vadd.f32 %v4201_v0, %v9969_v43  ;;  %v8024_v3 = vadd.f32 %v5359_v1, %v9971_v44  ;;  %v5485_v17 = vmax.f32 %v7958_v52, 0.0  ;;  %v5487_v19 = vmax.f32 %v8022_v53, 0.0 }
 0x4b1   :  { %v5488_v13 = vmax.f32 %v7959_v61, 0.0  ;;  %v5490_v15 = vmax.f32 %v8023_v63, 0.0 }
 0x4b2   :  { %v5489_v20 = vmax.f32 %v7960_v2, 0.0  ;;  %v5491_v21 = vmax.f32 %v8024_v3, 0.0 }
 0x4b3   :  { %v5556_v26 = vpack.c.bf16 %v5488_v13, %v5484_v10  ;;  %v10149_v31 = vpack.c.bf16 %v5490_v15, %v5486_v11 }
 0x4b4   :  { %v5557_v22 = vpack.c.bf16 %v5489_v20, %v5485_v17  ;;  %v10151_v28 = vpack.c.bf16 %v5491_v21, %v5487_v19  ;;  %v4205_v50 = vpop.f32.mrb[60].mxu0  ;;  %v5363_v51 = vpop.f32.mrb[60].mxu1 }
 0x4b5   :  { %v7961_v54 = vadd.f32 %v4205_v50, %v9963_v41  ;;  %v8025_v37 = vadd.f32 %v5363_v51, %v9965_v42  ;;  %v4207_v45 = vpop.f32.mrb[61].mxu0  ;;  %v5365_v56 = vpop.f32.mrb[61].mxu1 }
 0x4b6   :  { %v7962_v52 = vadd.f32 %v4207_v45, %v9969_v43  ;;  %v8026_v53 = vadd.f32 %v5365_v56, %v9971_v44  ;;  %v4209_v61 = vpop.f32.mrb[62].mxu0  ;;  %v5367_v63 = vpop.f32.mrb[62].mxu1  ;;  %6132 = vmatprep.mubr.bf16.mxu0 %v5557_v22  ;;  %v9504_v45 = vld [vmem:[#allocation12 + $0x58] sm:$0xff]   ;;  %v9509_v56 = vld [vmem:[#allocation12 + $0x28] sm:$0xff]  }
 0x4b7   :  { %v7963_v0 = vadd.f32 %v4209_v61, %v9963_v41  ;;  %v8027_v1 = vadd.f32 %v5367_v63, %v9965_v42  ;;  %v4211_v2 = vpop.f32.mrb[63].mxu0  ;;  %v5369_v3 = vpop.f32.mrb[63].mxu1  ;;  %6133 = vmatmul.mubr.bf16.gmra.mrb[120].mxu0 %v5556_v26  ;;  %v5492_v10 = vmax.f32 %v7961_v54, 0.0  ;;  %v5494_v11 = vmax.f32 %v8025_v37, 0.0  ;;  %v9502_v42 = vld [vmem:[#allocation12 + $0x50] sm:$0xff]   ;;  %v9507_v54 = vld [vmem:[#allocation12 + $0x20] sm:$0xff]  }
 0x4b8   :  { %v7964_v4 = vadd.f32 %v4211_v2, %v9969_v43  ;;  %v8028_v7 = vadd.f32 %v5369_v3, %v9971_v44  ;;  %v5493_v17 = vmax.f32 %v7962_v52, 0.0  ;;  %v5495_v19 = vmax.f32 %v8026_v53, 0.0  ;;  %v9503_v26 = vld [vmem:[#allocation12 + $0x10] sm:$0xff]   ;;  %7703 = vmatprep.subr.bf16.mxu1 %v9502_v42  ;;  %v9505_v43 = vld [vmem:[#allocation12 + $0x18] sm:$0xff]   ;;  %v9506_v44 = vld [vmem:[#allocation12 + $0x60] sm:$0xff]  }
 0x4b9   :  { %v5496_v13 = vmax.f32 %v7963_v0, 0.0  ;;  %v5498_v15 = vmax.f32 %v8027_v1, 0.0  ;;  %7704 = vmatpush3.bf16.msra.mxu1 %v9503_v26  ;;  %v9508_v37 = vld [vmem:[#allocation12 + $0x68] sm:$0xff]   ;;  %v9510_v52 = vld [vmem:[#allocation12 + $0x70] sm:$0xff]   ;;  %v9513_v61 = vld [vmem:[#allocation12 + $0x38] sm:$0xff]  }
 0x4ba   :  { %v5497_v20 = vmax.f32 %v7964_v4, 0.0  ;;  %v5499_v21 = vmax.f32 %v8028_v7, 0.0  ;;  %7705 = vmatprep.subr.bf16.mxu1 %v9504_v45  ;;  %v9511_v53 = vld [vmem:[#allocation12 + $0x30] sm:$0xff]  }
 0x4bb   :  { %v5560_v22 = vpack.c.bf16 %v5496_v13, %v5492_v10  ;;  %v5562_v50 = vpack.c.bf16 %v5498_v15, %v5494_v11  ;;  %v9517_v10 = vld [vmem:[%s10419_s7 + $0x18] sm:$0xff]  }
 0x4bc   :  { %v5561_v41 = vpack.c.bf16 %v5497_v20, %v5493_v17  ;;  %v5563_v51 = vpack.c.bf16 %v5499_v21, %v5495_v19 }
 0x4bd   :  { %7706 = vmatpush3.bf16.msra.mxu1 %v9505_v43 }
 0x4be   :  { %6142 = vmatprep.mubr.bf16.mxu0 %v5561_v41  ;;  %7707 = vmatprep.subr.bf16.mxu1 %v9506_v44 }
 0x4bf   :  { %6143 = vmatmul.mubr.bf16.gmra.mrb[124].mxu0 %v5560_v22  ;;  %v9518_v22 = vld [vmem:[%s10419_s7 + $0x20] sm:$0xff]  }
 0x4c0   :  { %6185 = vmatprep.mubr.bf16.mxu0 %v9983_v8  ;;  %v9512_v8 = vld [vmem:[#allocation12 + $0x78] sm:$0xff]  }
 0x4c1   :  { %7708 = vmatpush3.bf16.msra.mxu1 %v9507_v54 }
 0x4c2   :  { %7709 = vmatprep.subr.bf16.mxu1 %v9508_v37 }
 0x4c5   :  { %7710 = vmatpush3.bf16.msra.mxu1 %v9509_v56 }
 0x4c6   :  { %7711 = vmatprep.subr.bf16.mxu1 %v9510_v52 }
 0x4c7   :  { %6186 = vmatmul.mubr.bf16.vlgmr.msra.gmra.mrb[64].mxu0 %v9981_v6  ;;  %v5628_v6 = vld [vmem:[#allocation11] sm:$0x3] }
 0x4c8   :  { %6195 = vmatprep.mubr.bf16.mxu0 %v9995_v48  ;;  %v10196_v48 = vrot.slane %v5628_v6, %v1122_v39 }
 0x4c9   :  { %7712 = vmatpush3.bf16.msra.mxu1 %v9511_v53 }
 0x4ca   :  { %7713 = vmatprep.subr.bf16.mxu1 %v9512_v8 }
 0x4cd   :  { %7714 = vmatpush3.bf16.msra.mxu1 %v9513_v61 }
 0x4cf   :  { %6196 = vmatmul.mubr.bf16.gmra.mrb[68].mxu0 %v9993_v46  ;;  %v10192_v46 = vrot.slane %v5628_v6, %v9957_v36 }
 0x4d0   :  { %6205 = vmatprep.mubr.bf16.mxu0 %v10007_v18 }
 0x4d7   :  { %6206 = vmatmul.mubr.bf16.gmra.mrb[72].mxu0 %v10005_v16 }
 0x4d8   :  { %6215 = vmatprep.mubr.bf16.mxu0 %v10019_v60 }
 0x4df   :  { %6216 = vmatmul.mubr.bf16.gmra.mrb[76].mxu0 %v10017_v58 }
 0x4e0   :  { %6225 = vmatprep.mubr.bf16.mxu0 %v10031_v32 }
 0x4e7   :  { %6226 = vmatmul.mubr.bf16.gmra.mrb[80].mxu0 %v10029_v30 }
 0x4e8   :  { %6235 = vmatprep.mubr.bf16.mxu0 %v10043_v14  ;;  %v9514_v14 = vld [vmem:[%s10419_s7] sm:$0xff]  }
 0x4e9   :  { %7853 = vmatprep.subr.bf16.mxu1 %v9514_v14 }
 0x4ef   :  { %6236 = vmatmul.mubr.bf16.gmra.mrb[84].mxu0 %v10041_v12 }
 0x4f0   :  { %6245 = vmatprep.mubr.bf16.mxu0 %v10055_v62 }
 0x4f7   :  { %6246 = vmatmul.mubr.bf16.gmra.mrb[88].mxu0 %v10053_v59 }
 0x4f8   :  { %6255 = vmatprep.mubr.bf16.mxu0 %v10067_v47 }
 0x4ff   :  { %6256 = vmatmul.mubr.bf16.gmra.mrb[92].mxu0 %v10065_v40 }
 0x500   :  { %6265 = vmatprep.mubr.bf16.mxu0 %v10079_v25 }
 0x507   :  { %6266 = vmatmul.mubr.bf16.gmra.mrb[96].mxu0 %v10077_v23 }
 0x508   :  { %6275 = vmatprep.mubr.bf16.mxu0 %v10091_v9 }
 0x50f   :  { %6276 = vmatmul.mubr.bf16.gmra.mrb[100].mxu0 %v10089_v5 }
 0x510   :  { %6285 = vmatprep.mubr.bf16.mxu0 %v10103_v57  ;;  %v9515_v57 = vld [vmem:[%s10419_s7 + $0x8] sm:$0xff]  }
 0x517   :  { %6286 = vmatmul.mubr.bf16.gmra.mrb[104].mxu0 %v10101_v55 }
 0x518   :  { %6295 = vmatprep.mubr.bf16.mxu0 %v10115_v49 }
 0x51f   :  { %6296 = vmatmul.mubr.bf16.gmra.mrb[108].mxu0 %v10113_v38 }
 0x520   :  { %6305 = vmatprep.mubr.bf16.mxu0 %v10127_v33 }
 0x527   :  { %6306 = vmatmul.mubr.bf16.gmra.mrb[112].mxu0 %v10125_v29 }
 0x528   :  { %6315 = vmatprep.mubr.bf16.mxu0 %v10139_v27 }
 0x52f   :  { %6316 = vmatmul.mubr.bf16.gmra.mrb[116].mxu0 %v10137_v24 }
 0x530   :  { %6325 = vmatprep.mubr.bf16.mxu0 %v10151_v28  ;;  %v9516_v28 = vld [vmem:[%s10419_s7 + $0x10] sm:$0xff]  }
 0x537   :  { %6326 = vmatmul.mubr.bf16.gmra.mrb[120].mxu0 %v10149_v31 }
 0x538   :  { %6335 = vmatprep.mubr.bf16.mxu0 %v5563_v51 }
 0x53f   :  { %6336 = vmatmul.mubr.bf16.gmra.mrb[124].mxu0 %v5562_v50 }
 0x59a   :  { %v6187_v16 = vpop.f32.mrb[64].mxu0 }
 0x59b   :  { %v8029_v18 = vadd.f32 %v6187_v16, %v10192_v46  ;;  %v6189_v58 = vpop.f32.mrb[65].mxu0 }
 0x59c   :  { %v8030_v60 = vadd.f32 %v6189_v58, %v10196_v48  ;;  %v6191_v30 = vpop.f32.mrb[66].mxu0 }
 0x59d   :  { %v8031_v32 = vadd.f32 %v6191_v30, %v10192_v46  ;;  %v6193_v12 = vpop.f32.mrb[67].mxu0  ;;  %v6346_v62 = vmax.f32 %v8029_v18, 0.0 }
 0x59e   :  { %v8032_v59 = vadd.f32 %v6193_v12, %v10196_v48  ;;  %v6347_v39 = vmax.f32 %v8030_v60, 0.0 }
 0x59f   :  { %v6348_v40 = vmax.f32 %v8031_v32, 0.0 }
 0x5a0   :  { %v6349_v47 = vmax.f32 %v8032_v59, 0.0 }
 0x5a1   :  { %v6410_v23 = vpack.c.bf16 %v6348_v40, %v6346_v62 }
 0x5a2   :  { %v6411_v25 = vpack.c.bf16 %v6349_v47, %v6347_v39  ;;  %v6197_v5 = vpop.f32.mrb[68].mxu0 }
 0x5a3   :  { %v8033_v9 = vadd.f32 %v6197_v5, %v10192_v46  ;;  %v6199_v55 = vpop.f32.mrb[69].mxu0 }
 0x5a4   :  { %v8034_v38 = vadd.f32 %v6199_v55, %v10196_v48  ;;  %v6201_v49 = vpop.f32.mrb[70].mxu0  ;;  %6609 = vmatprep.mubr.bf16.mxu1 %v6411_v25 }
 0x5a5   :  { %v8035_v29 = vadd.f32 %v6201_v49, %v10192_v46  ;;  %v6203_v33 = vpop.f32.mrb[71].mxu0  ;;  %6610 = vmatmul.mubr.bf16.vlgmr.msra.gmra.mrb[64].mxu1 %v6410_v23  ;;  %v6350_v27 = vmax.f32 %v8033_v9, 0.0 }
 0x5a6   :  { %v8036_v24 = vadd.f32 %v6203_v33, %v10196_v48  ;;  %7854 = vmatpush3.bf16.msra.mxu1 %v9514_v14  ;;  %v6351_v63 = vmax.f32 %v8034_v38, 0.0 }
 0x5a7   :  { %v6352_v31 = vmax.f32 %v8035_v29, 0.0  ;;  %7855 = vmatprep.subr.bf16.mxu1 %v9515_v57 }
 0x5a8   :  { %v6353_v0 = vmax.f32 %v8036_v24, 0.0 }
 0x5a9   :  { %v6412_v1 = vpack.c.bf16 %v6352_v31, %v6350_v27 }
 0x5aa   :  { %v6413_v2 = vpack.c.bf16 %v6353_v0, %v6351_v63  ;;  %v6207_v3 = vpop.f32.mrb[72].mxu0  ;;  %7856 = vmatpush3.bf16.msra.mxu1 %v9515_v57 }
 0x5ab   :  { %v8037_v4 = vadd.f32 %v6207_v3, %v10192_v46  ;;  %v6209_v7 = vpop.f32.mrb[73].mxu0  ;;  %7857 = vmatprep.subr.bf16.mxu1 %v9516_v28 }
 0x5ac   :  { %v8038_v11 = vadd.f32 %v6209_v7, %v10196_v48  ;;  %v6211_v13 = vpop.f32.mrb[74].mxu0  ;;  %6617 = vmatprep.mubr.bf16.mxu1 %v6413_v2 }
 0x5ad   :  { %v8039_v15 = vadd.f32 %v6211_v13, %v10192_v46  ;;  %v6213_v17 = vpop.f32.mrb[75].mxu0  ;;  %6618 = vmatmul.mubr.bf16.gmra.mrb[68].mxu1 %v6412_v1  ;;  %v6354_v20 = vmax.f32 %v8037_v4, 0.0 }
 0x5ae   :  { %v8040_v19 = vadd.f32 %v6213_v17, %v10196_v48  ;;  %7858 = vmatpush3.bf16.msra.mxu1 %v9516_v28  ;;  %v6355_v50 = vmax.f32 %v8038_v11, 0.0 }
 0x5af   :  { %v6356_v21 = vmax.f32 %v8039_v15, 0.0  ;;  %7859 = vmatprep.subr.bf16.mxu1 %v9517_v10 }
 0x5b0   :  { %v6357_v41 = vmax.f32 %v8040_v19, 0.0 }
 0x5b1   :  { %v6414_v51 = vpack.c.bf16 %v6356_v21, %v6354_v20 }
 0x5b2   :  { %v6415_v42 = vpack.c.bf16 %v6357_v41, %v6355_v50  ;;  %v6217_v26 = vpop.f32.mrb[76].mxu0  ;;  %7860 = vmatpush3.bf16.msra.mxu1 %v9517_v10 }
 0x5b3   :  { %v8041_v45 = vadd.f32 %v6217_v26, %v10192_v46  ;;  %v6219_v43 = vpop.f32.mrb[77].mxu0  ;;  %7861 = vmatprep.subr.bf16.mxu1 %v9518_v22 }
 0x5b4   :  { %v8042_v44 = vadd.f32 %v6219_v43, %v10196_v48  ;;  %v6221_v54 = vpop.f32.mrb[78].mxu0  ;;  %6625 = vmatprep.mubr.bf16.mxu1 %v6415_v42 }
 0x5b5   :  { %v8043_v37 = vadd.f32 %v6221_v54, %v10192_v46  ;;  %v6223_v56 = vpop.f32.mrb[79].mxu0  ;;  %6626 = vmatmul.mubr.bf16.gmra.mrb[72].mxu1 %v6414_v51  ;;  %v6358_v53 = vmax.f32 %v8041_v45, 0.0 }
 0x5b6   :  { %v8044_v52 = vadd.f32 %v6223_v56, %v10196_v48  ;;  %7862 = vmatpush3.bf16.msra.mxu1 %v9518_v22  ;;  %v6359_v61 = vmax.f32 %v8042_v44, 0.0 }
 0x5b7   :  { %v6360_v8 = vmax.f32 %v8043_v37, 0.0 }
 0x5b8   :  { %v6361_v6 = vmax.f32 %v8044_v52, 0.0 }
 0x5b9   :  { %v6416_v16 = vpack.c.bf16 %v6360_v8, %v6358_v53 }
 0x5ba   :  { %v6417_v18 = vpack.c.bf16 %v6361_v6, %v6359_v61  ;;  %v6227_v58 = vpop.f32.mrb[80].mxu0 }
 0x5bb   :  { %v8045_v60 = vadd.f32 %v6227_v58, %v10192_v46  ;;  %v6229_v30 = vpop.f32.mrb[81].mxu0 }
 0x5bc   :  { %v8046_v32 = vadd.f32 %v6229_v30, %v10196_v48  ;;  %v6231_v12 = vpop.f32.mrb[82].mxu0  ;;  %6633 = vmatprep.mubr.bf16.mxu1 %v6417_v18 }
 0x5bd   :  { %v8047_v14 = vadd.f32 %v6231_v12, %v10192_v46  ;;  %v6233_v59 = vpop.f32.mrb[83].mxu0  ;;  %6634 = vmatmul.mubr.bf16.gmra.mrb[76].mxu1 %v6416_v16  ;;  %v6362_v40 = vmax.f32 %v8045_v60, 0.0 }
 0x5be   :  { %v8048_v62 = vadd.f32 %v6233_v59, %v10196_v48  ;;  %v6363_v47 = vmax.f32 %v8046_v32, 0.0 }
 0x5bf   :  { %v6364_v39 = vmax.f32 %v8047_v14, 0.0 }
 0x5c0   :  { %v6365_v23 = vmax.f32 %v8048_v62, 0.0 }
 0x5c1   :  { %v6418_v25 = vpack.c.bf16 %v6364_v39, %v6362_v40 }
 0x5c2   :  { %v6419_v5 = vpack.c.bf16 %v6365_v23, %v6363_v47  ;;  %v6237_v9 = vpop.f32.mrb[84].mxu0 }
 0x5c3   :  { %v8049_v55 = vadd.f32 %v6237_v9, %v10192_v46  ;;  %v6239_v57 = vpop.f32.mrb[85].mxu0 }
 0x5c4   :  { %v8050_v38 = vadd.f32 %v6239_v57, %v10196_v48  ;;  %v6241_v49 = vpop.f32.mrb[86].mxu0  ;;  %6641 = vmatprep.mubr.bf16.mxu1 %v6419_v5 }
 0x5c5   :  { %v8051_v29 = vadd.f32 %v6241_v49, %v10192_v46  ;;  %v6243_v33 = vpop.f32.mrb[87].mxu0  ;;  %6642 = vmatmul.mubr.bf16.gmra.mrb[80].mxu1 %v6418_v25  ;;  %v6366_v27 = vmax.f32 %v8049_v55, 0.0 }
 0x5c6   :  { %v8052_v24 = vadd.f32 %v6243_v33, %v10196_v48  ;;  %v6367_v28 = vmax.f32 %v8050_v38, 0.0 }
 0x5c7   :  { %v6368_v31 = vmax.f32 %v8051_v29, 0.0 }
 0x5c8   :  { %v6369_v63 = vmax.f32 %v8052_v24, 0.0 }
 0x5c9   :  { %v6420_v0 = vpack.c.bf16 %v6368_v31, %v6366_v27 }
 0x5ca   :  { %v6421_v1 = vpack.c.bf16 %v6369_v63, %v6367_v28  ;;  %v6247_v2 = vpop.f32.mrb[88].mxu0 }
 0x5cb   :  { %v8053_v3 = vadd.f32 %v6247_v2, %v10192_v46  ;;  %v6249_v4 = vpop.f32.mrb[89].mxu0 }
 0x5cc   :  { %v8054_v7 = vadd.f32 %v6249_v4, %v10196_v48  ;;  %v6251_v10 = vpop.f32.mrb[90].mxu0  ;;  %6649 = vmatprep.mubr.bf16.mxu1 %v6421_v1 }
 0x5cd   :  { %v8055_v11 = vadd.f32 %v6251_v10, %v10192_v46  ;;  %v6253_v13 = vpop.f32.mrb[91].mxu0  ;;  %6650 = vmatmul.mubr.bf16.gmra.mrb[84].mxu1 %v6420_v0  ;;  %v6370_v17 = vmax.f32 %v8053_v3, 0.0 }
 0x5ce   :  { %v8056_v15 = vadd.f32 %v6253_v13, %v10196_v48  ;;  %v6371_v20 = vmax.f32 %v8054_v7, 0.0 }
 0x5cf   :  { %v6372_v19 = vmax.f32 %v8055_v11, 0.0 }
 0x5d0   :  { %v6373_v21 = vmax.f32 %v8056_v15, 0.0 }
 0x5d1   :  { %v6422_v22 = vpack.c.bf16 %v6372_v19, %v6370_v17 }
 0x5d2   :  { %v6423_v50 = vpack.c.bf16 %v6373_v21, %v6371_v20  ;;  %v6257_v41 = vpop.f32.mrb[92].mxu0 }
 0x5d3   :  { %v8057_v51 = vadd.f32 %v6257_v41, %v10192_v46  ;;  %v6259_v42 = vpop.f32.mrb[93].mxu0 }
 0x5d4   :  { %v8058_v26 = vadd.f32 %v6259_v42, %v10196_v48  ;;  %v6261_v45 = vpop.f32.mrb[94].mxu0  ;;  %6657 = vmatprep.mubr.bf16.mxu1 %v6423_v50 }
 0x5d5   :  { %v8059_v43 = vadd.f32 %v6261_v45, %v10192_v46  ;;  %v6263_v44 = vpop.f32.mrb[95].mxu0  ;;  %6658 = vmatmul.mubr.bf16.gmra.mrb[88].mxu1 %v6422_v22  ;;  %v6374_v37 = vmax.f32 %v8057_v51, 0.0 }
 0x5d6   :  { %v8060_v54 = vadd.f32 %v6263_v44, %v10196_v48  ;;  %v6375_v52 = vmax.f32 %v8058_v26, 0.0 }
 0x5d7   :  { %v6376_v56 = vmax.f32 %v8059_v43, 0.0 }
 0x5d8   :  { %v6377_v53 = vmax.f32 %v8060_v54, 0.0 }
 0x5d9   :  { %v6424_v8 = vpack.c.bf16 %v6376_v56, %v6374_v37 }
 0x5da   :  { %v6425_v61 = vpack.c.bf16 %v6377_v53, %v6375_v52  ;;  %v6267_v6 = vpop.f32.mrb[96].mxu0 }
 0x5db   :  { %v8061_v16 = vadd.f32 %v6267_v6, %v10192_v46  ;;  %v6269_v18 = vpop.f32.mrb[97].mxu0 }
 0x5dc   :  { %v8062_v58 = vadd.f32 %v6269_v18, %v10196_v48  ;;  %v6271_v60 = vpop.f32.mrb[98].mxu0  ;;  %6665 = vmatprep.mubr.bf16.mxu1 %v6425_v61 }
 0x5dd   :  { %v8063_v30 = vadd.f32 %v6271_v60, %v10192_v46  ;;  %v6273_v32 = vpop.f32.mrb[99].mxu0  ;;  %6666 = vmatmul.mubr.bf16.gmra.mrb[92].mxu1 %v6424_v8  ;;  %v6378_v14 = vmax.f32 %v8061_v16, 0.0 }
 0x5de   :  { %v8064_v12 = vadd.f32 %v6273_v32, %v10196_v48  ;;  %v6379_v62 = vmax.f32 %v8062_v58, 0.0 }
 0x5df   :  { %v6380_v59 = vmax.f32 %v8063_v30, 0.0  ;;  %v9519_v30 = vld [vmem:[%s10419_s7 + $0x28] sm:$0xff]  }
 0x5e0   :  { %v6381_v40 = vmax.f32 %v8064_v12, 0.0  ;;  %7863 = vmatprep.subr.bf16.mxu1 %v9519_v30 }
 0x5e1   :  { %v6426_v39 = vpack.c.bf16 %v6380_v59, %v6378_v14  ;;  %7864 = vmatpush3.bf16.msra.mxu1 %v9519_v30 }
 0x5e2   :  { %v6427_v47 = vpack.c.bf16 %v6381_v40, %v6379_v62  ;;  %v6277_v23 = vpop.f32.mrb[100].mxu0 }
 0x5e3   :  { %v8065_v25 = vadd.f32 %v6277_v23, %v10192_v46  ;;  %v6279_v5 = vpop.f32.mrb[101].mxu0 }
 0x5e4   :  { %v8066_v9 = vadd.f32 %v6279_v5, %v10196_v48  ;;  %v6281_v55 = vpop.f32.mrb[102].mxu0  ;;  %6673 = vmatprep.mubr.bf16.mxu1 %v6427_v47  ;;  %v9520_v47 = vld [vmem:[%s10419_s7 + $0x30] sm:$0xff]  }
 0x5e5   :  { %v8067_v57 = vadd.f32 %v6281_v55, %v10192_v46  ;;  %v6283_v38 = vpop.f32.mrb[103].mxu0  ;;  %6674 = vmatmul.mubr.bf16.gmra.mrb[96].mxu1 %v6426_v39  ;;  %v6382_v29 = vmax.f32 %v8065_v25, 0.0  ;;  %7865 = vmatprep.subr.bf16.mxu1 %v9520_v47 }
 0x5e6   :  { %v8068_v49 = vadd.f32 %v6283_v38, %v10196_v48  ;;  %v6383_v24 = vmax.f32 %v8066_v9, 0.0  ;;  %7866 = vmatpush3.bf16.msra.mxu1 %v9520_v47 }
 0x5e7   :  { %v6384_v33 = vmax.f32 %v8067_v57, 0.0 }
 0x5e8   :  { %v6385_v27 = vmax.f32 %v8068_v49, 0.0  ;;  %v9521_v49 = vld [vmem:[%s10419_s7 + $0x38] sm:$0xff]   ;;  %s9781_s7 = smov [#allocation18]  }
 0x5e9   :  { %v6428_v31 = vpack.c.bf16 %v6384_v33, %v6382_v29  ;;  %7867 = vmatprep.subr.bf16.mxu1 %v9521_v49  ;;  %s7211_s30 = sshll.u32 %s9781_s7, 4  ;;  %s7212_s30 = int_to_ptr.vmem [resolvable:$true] %s7211_s30 }
 0x5ea   :  { %v6429_v28 = vpack.c.bf16 %v6385_v27, %v6383_v24  ;;  %v6287_v63 = vpop.f32.mrb[104].mxu0  ;;  %7868 = vmatpush3.bf16.msra.mxu1 %v9521_v49  ;;  %s9728_s0 = scalar_lea.vmem %s7212_s30, 32  ;;  %p9733_p3 = scmp.lt.s32.totalorder %s7212_s30, %s7212_s30 }
 0x5eb   :  { %v8069_v0 = vadd.f32 %v6287_v63, %v10192_v46  ;;  %v6289_v1 = vpop.f32.mrb[105].mxu0  ;;  %p9729_p2 = scmp.ne.s32.totalorder %s7212_s30, %s9728_s0  ;;  %p9734_p4 = scmp.lt.s32.totalorder %s9728_s0, %s9728_s0 }
 0x5ec   :  { %v8070_v2 = vadd.f32 %v6289_v1, %v10196_v48  ;;  %v6291_v3 = vpop.f32.mrb[106].mxu0  ;;  %6681 = vmatprep.mubr.bf16.mxu1 %v6429_v28 }
 0x5ed   :  { %v8071_v4 = vadd.f32 %v6291_v3, %v10192_v46  ;;  %v6293_v7 = vpop.f32.mrb[107].mxu0  ;;  %6682 = vmatmul.mubr.bf16.gmra.mrb[100].mxu1 %v6428_v31  ;;  %v6386_v11 = vmax.f32 %v8069_v0, 0.0  ;;  %p9735_p5 = por %p9734_p4, %p9733_p3 }
 0x5ee   :  { %v8072_v10 = vadd.f32 %v6293_v7, %v10196_v48  ;;  %v6387_v15 = vmax.f32 %v8070_v2, 0.0 }
 0x5ef   :  { %v6388_v13 = vmax.f32 %v8071_v4, 0.0  ;;  %p9736_p6 = pnand %p9735_p5, %p9729_p2 }
 0x5f0   :  { %v6389_v17 = vmax.f32 %v8072_v10, 0.0 }
 0x5f1   :  { %v6430_v19 = vpack.c.bf16 %v6388_v13, %v6386_v11 }
 0x5f2   :  { %v6431_v20 = vpack.c.bf16 %v6389_v17, %v6387_v15  ;;  %v6297_v21 = vpop.f32.mrb[108].mxu0 }
 0x5f3   :  { %v8073_v22 = vadd.f32 %v6297_v21, %v10192_v46  ;;  %v6299_v50 = vpop.f32.mrb[109].mxu0 }
 0x5f4   :  { %v8074_v41 = vadd.f32 %v6299_v50, %v10196_v48  ;;  %v6301_v51 = vpop.f32.mrb[110].mxu0  ;;  %6689 = vmatprep.mubr.bf16.mxu1 %v6431_v20 }
 0x5f5   :  { %v8075_v42 = vadd.f32 %v6301_v51, %v10192_v46  ;;  %v6303_v26 = vpop.f32.mrb[111].mxu0  ;;  %6690 = vmatmul.mubr.bf16.gmra.mrb[104].mxu1 %v6430_v19  ;;  %v6390_v43 = vmax.f32 %v8073_v22, 0.0 }
 0x5f6   :  { %v8076_v45 = vadd.f32 %v6303_v26, %v10196_v48  ;;  %v6391_v54 = vmax.f32 %v8074_v41, 0.0 }
 0x5f7   :  { %v6392_v44 = vmax.f32 %v8075_v42, 0.0 }
 0x5f8   :  { %v6393_v37 = vmax.f32 %v8076_v45, 0.0 }
 0x5f9   :  { %v6432_v56 = vpack.c.bf16 %v6392_v44, %v6390_v43 }
 0x5fa   :  { %v6433_v52 = vpack.c.bf16 %v6393_v37, %v6391_v54  ;;  %v6307_v53 = vpop.f32.mrb[112].mxu0 }
 0x5fb   :  { %v8077_v8 = vadd.f32 %v6307_v53, %v10192_v46  ;;  %v6309_v61 = vpop.f32.mrb[113].mxu0 }
 0x5fc   :  { %v8078_v6 = vadd.f32 %v6309_v61, %v10196_v48  ;;  %v6311_v16 = vpop.f32.mrb[114].mxu0  ;;  %6697 = vmatprep.mubr.bf16.mxu1 %v6433_v52 }
 0x5fd   :  { %v8079_v18 = vadd.f32 %v6311_v16, %v10192_v46  ;;  %v6313_v58 = vpop.f32.mrb[115].mxu0  ;;  %6698 = vmatmul.mubr.bf16.gmra.mrb[108].mxu1 %v6432_v56  ;;  %v6394_v32 = vmax.f32 %v8077_v8, 0.0  ;;  %v10286_v8 = vld [vmem:[#allocation14] ss:$0 sm:$0xff] }
 0x5fe   :  { %v8080_v60 = vadd.f32 %v6313_v58, %v10196_v48  ;;  %v6395_v14 = vmax.f32 %v8078_v6, 0.0 }
 0x5ff   :  { %v6396_v12 = vmax.f32 %v8079_v18, 0.0 }
 0x600   :  { %v6397_v59 = vmax.f32 %v8080_v60, 0.0 }
 0x601   :  { %v6434_v62 = vpack.c.bf16 %v6396_v12, %v6394_v32 }
 0x602   :  { %v6435_v40 = vpack.c.bf16 %v6397_v59, %v6395_v14  ;;  %v6317_v39 = vpop.f32.mrb[116].mxu0 }
 0x603   :  { %v8081_v23 = vadd.f32 %v6317_v39, %v10192_v46  ;;  %v6319_v25 = vpop.f32.mrb[117].mxu0 }
 0x604   :  { %v8082_v5 = vadd.f32 %v6319_v25, %v10196_v48  ;;  %v6321_v9 = vpop.f32.mrb[118].mxu0  ;;  %6705 = vmatprep.mubr.bf16.mxu1 %v6435_v40 }
 0x605   :  { %v8083_v55 = vadd.f32 %v6321_v9, %v10192_v46  ;;  %v6323_v57 = vpop.f32.mrb[119].mxu0  ;;  %6706 = vmatmul.mubr.bf16.gmra.mrb[112].mxu1 %v6434_v62  ;;  %v6398_v29 = vmax.f32 %v8081_v23, 0.0 }
 0x606   :  { %v8084_v38 = vadd.f32 %v6323_v57, %v10196_v48  ;;  %v6399_v24 = vmax.f32 %v8082_v5, 0.0 }
 0x607   :  { %v6400_v33 = vmax.f32 %v8083_v55, 0.0 }
 0x608   :  { %v6401_v27 = vmax.f32 %v8084_v38, 0.0 }
 0x609   :  { %v6436_v31 = vpack.c.bf16 %v6400_v33, %v6398_v29 }
 0x60a   :  { %v6437_v28 = vpack.c.bf16 %v6401_v27, %v6399_v24  ;;  %v6327_v63 = vpop.f32.mrb[120].mxu0 }
 0x60b   :  { %v8085_v0 = vadd.f32 %v6327_v63, %v10192_v46  ;;  %v6329_v1 = vpop.f32.mrb[121].mxu0 }
 0x60c   :  { %v8086_v2 = vadd.f32 %v6329_v1, %v10196_v48  ;;  %v6331_v3 = vpop.f32.mrb[122].mxu0  ;;  %6713 = vmatprep.mubr.bf16.mxu1 %v6437_v28 }
 0x60d   :  { %v8087_v4 = vadd.f32 %v6331_v3, %v10192_v46  ;;  %v6333_v7 = vpop.f32.mrb[123].mxu0  ;;  %6714 = vmatmul.mubr.bf16.gmra.mrb[116].mxu1 %v6436_v31  ;;  %v6402_v11 = vmax.f32 %v8085_v0, 0.0 }
 0x60e   :  { %v8088_v10 = vadd.f32 %v6333_v7, %v10196_v48  ;;  %v6403_v15 = vmax.f32 %v8086_v2, 0.0 }
 0x60f   :  { %v6404_v13 = vmax.f32 %v8087_v4, 0.0 }
 0x610   :  { %v6405_v17 = vmax.f32 %v8088_v10, 0.0 }
 0x611   :  { %v6438_v19 = vpack.c.bf16 %v6404_v13, %v6402_v11 }
 0x612   :  { %v6439_v20 = vpack.c.bf16 %v6405_v17, %v6403_v15  ;;  %v6337_v21 = vpop.f32.mrb[124].mxu0 }
 0x613   :  { %v8089_v22 = vadd.f32 %v6337_v21, %v10192_v46  ;;  %v6339_v50 = vpop.f32.mrb[125].mxu0 }
 0x614   :  { %v8090_v41 = vadd.f32 %v6339_v50, %v10196_v48  ;;  %v6341_v51 = vpop.f32.mrb[126].mxu0  ;;  %6721 = vmatprep.mubr.bf16.mxu1 %v6439_v20 }
 0x615   :  { %v8091_v42 = vadd.f32 %v6341_v51, %v10192_v46  ;;  %v6343_v26 = vpop.f32.mrb[127].mxu0  ;;  %6722 = vmatmul.mubr.bf16.gmra.mrb[120].mxu1 %v6438_v19  ;;  %v6406_v43 = vmax.f32 %v8089_v22, 0.0 }
 0x616   :  { %v8092_v45 = vadd.f32 %v6343_v26, %v10196_v48  ;;  %v6407_v54 = vmax.f32 %v8090_v41, 0.0 }
 0x617   :  { %v6408_v44 = vmax.f32 %v8091_v42, 0.0 }
 0x618   :  { %v6409_v37 = vmax.f32 %v8092_v45, 0.0 }
 0x619   :  { %v6440_v56 = vpack.c.bf16 %v6408_v44, %v6406_v43 }
 0x61a   :  { %v6441_v52 = vpack.c.bf16 %v6409_v37, %v6407_v54 }
 0x61c   :  { %6729 = vmatprep.mubr.bf16.mxu1 %v6441_v52 }
 0x61d   :  { %6730 = vmatmul.mubr.bf16.gmra.mrb[124].mxu1 %v6440_v56 }
 0x678   :  { %v7715_v53 = vpop.f32.mrb[64].mxu1 }
 0x679   :  { %v7716_v61 = vpop.f32.mrb[65].mxu1 }
 0x67a   :  { %v7717_v6 = vadd.f32 %v7716_v61, %v7715_v53  ;;  %v7718_v16 = vpop.f32.mrb[66].mxu1 }
 0x67b   :  { %v7719_v18 = vpop.f32.mrb[67].mxu1 }
 0x67c   :  { %v6612_v46 = vadd.f32 %v7717_v6, %v10286_v8  ;;  %v7720_v58 = vadd.f32 %v7719_v18, %v7718_v16 }
 0x67e   :  { %v6615_v48 = vadd.f32 %v7720_v58, %v10286_v8  ;;  %v6738_v60 = vmax.f32 %v6612_v46, 0.0 }
 0x680   :  { %v6739_v30 = vmax.f32 %v6615_v48, 0.0  ;;  %v7721_v32 = vpop.f32.mrb[68].mxu1 }
 0x681   :  { %v7722_v12 = vpop.f32.mrb[69].mxu1 }
 0x682   :  { %v7723_v14 = vadd.f32 %v7722_v12, %v7721_v32  ;;  %v7724_v59 = vpop.f32.mrb[70].mxu1  ;;  %v6770_v62 = vpack.c.bf16 %v6739_v30, %v6738_v60 }
 0x683   :  { %v7725_v40 = vpop.f32.mrb[71].mxu1 }
 0x684   :  { %v6620_v39 = vadd.f32 %v7723_v14, %v10286_v8  ;;  %v7726_v47 = vadd.f32 %v7725_v40, %v7724_v59  ;;  %7869 = vmatprep.mubr.bf16.mxu1 %v6770_v62 }
 0x686   :  { %v6623_v23 = vadd.f32 %v7726_v47, %v10286_v8  ;;  %v6740_v25 = vmax.f32 %v6620_v39, 0.0 }
 0x688   :  { %v6741_v5 = vmax.f32 %v6623_v23, 0.0  ;;  %v7727_v9 = vpop.f32.mrb[72].mxu1 }
 0x689   :  { %v7728_v55 = vpop.f32.mrb[73].mxu1 }
 0x68a   :  { %v6771_v57 = vpack.c.bf16 %v6741_v5, %v6740_v25  ;;  %v7729_v38 = vadd.f32 %v7728_v55, %v7727_v9  ;;  %v7730_v49 = vpop.f32.mrb[74].mxu1 }
 0x68b   :  { %v7731_v29 = vpop.f32.mrb[75].mxu1 }
 0x68c   :  { %v6628_v33 = vadd.f32 %v7729_v38, %v10286_v8  ;;  %v7732_v24 = vadd.f32 %v7731_v29, %v7730_v49  ;;  %7870 = vmatmul.mubr.bf16.vlgmr.msra.gmra.mrb[128].mxu1 %v6771_v57 }
 0x68e   :  { %v6631_v27 = vadd.f32 %v7732_v24, %v10286_v8  ;;  %v6742_v31 = vmax.f32 %v6628_v33, 0.0 }
 0x690   :  { %v6743_v28 = vmax.f32 %v6631_v27, 0.0  ;;  %v7733_v63 = vpop.f32.mrb[76].mxu1 }
 0x691   :  { %v7734_v0 = vpop.f32.mrb[77].mxu1 }
 0x692   :  { %v7735_v1 = vadd.f32 %v7734_v0, %v7733_v63  ;;  %v7736_v2 = vpop.f32.mrb[78].mxu1  ;;  %v6772_v3 = vpack.c.bf16 %v6743_v28, %v6742_v31 }
 0x693   :  { %v7737_v4 = vpop.f32.mrb[79].mxu1 }
 0x694   :  { %v6636_v7 = vadd.f32 %v7735_v1, %v10286_v8  ;;  %v7738_v10 = vadd.f32 %v7737_v4, %v7736_v2  ;;  %7873 = vmatprep.mubr.bf16.mxu1 %v6772_v3 }
 0x696   :  { %v6639_v11 = vadd.f32 %v7738_v10, %v10286_v8  ;;  %v6744_v13 = vmax.f32 %v6636_v7, 0.0 }
 0x698   :  { %v6745_v15 = vmax.f32 %v6639_v11, 0.0  ;;  %v7739_v17 = vpop.f32.mrb[80].mxu1 }
 0x699   :  { %v7740_v19 = vpop.f32.mrb[81].mxu1 }
 0x69a   :  { %v7741_v20 = vadd.f32 %v7740_v19, %v7739_v17  ;;  %v7742_v21 = vpop.f32.mrb[82].mxu1  ;;  %v6773_v22 = vpack.c.bf16 %v6745_v15, %v6744_v13 }
 0x69b   :  { %v7743_v50 = vpop.f32.mrb[83].mxu1 }
 0x69c   :  { %v6644_v41 = vadd.f32 %v7741_v20, %v10286_v8  ;;  %v7744_v51 = vadd.f32 %v7743_v50, %v7742_v21  ;;  %7874 = vmatmul.mubr.bf16.gmra.mrb[132].mxu1 %v6773_v22 }
 0x69e   :  { %v6647_v42 = vadd.f32 %v7744_v51, %v10286_v8  ;;  %v6746_v26 = vmax.f32 %v6644_v41, 0.0 }
 0x6a0   :  { %v6747_v45 = vmax.f32 %v6647_v42, 0.0  ;;  %v7745_v43 = vpop.f32.mrb[84].mxu1 }
 0x6a1   :  { %v7746_v44 = vpop.f32.mrb[85].mxu1 }
 0x6a2   :  { %v7747_v54 = vadd.f32 %v7746_v44, %v7745_v43  ;;  %v7748_v37 = vpop.f32.mrb[86].mxu1  ;;  %v6774_v56 = vpack.c.bf16 %v6747_v45, %v6746_v26 }
 0x6a3   :  { %v7749_v52 = vpop.f32.mrb[87].mxu1 }
 0x6a4   :  { %v6652_v53 = vadd.f32 %v7747_v54, %v10286_v8  ;;  %v7750_v61 = vadd.f32 %v7749_v52, %v7748_v37  ;;  %7877 = vmatprep.mubr.bf16.mxu1 %v6774_v56 }
 0x6a6   :  { %v6655_v6 = vadd.f32 %v7750_v61, %v10286_v8  ;;  %v6748_v16 = vmax.f32 %v6652_v53, 0.0 }
 0x6a8   :  { %v6749_v18 = vmax.f32 %v6655_v6, 0.0  ;;  %v7751_v46 = vpop.f32.mrb[88].mxu1 }
 0x6a9   :  { %v7752_v58 = vpop.f32.mrb[89].mxu1 }
 0x6aa   :  { %v7753_v48 = vadd.f32 %v7752_v58, %v7751_v46  ;;  %v7754_v60 = vpop.f32.mrb[90].mxu1  ;;  %v6775_v30 = vpack.c.bf16 %v6749_v18, %v6748_v16 }
 0x6ab   :  { %v7755_v32 = vpop.f32.mrb[91].mxu1 }
 0x6ac   :  { %v6660_v12 = vadd.f32 %v7753_v48, %v10286_v8  ;;  %v7756_v14 = vadd.f32 %v7755_v32, %v7754_v60  ;;  %7878 = vmatmul.mubr.bf16.gmra.mrb[136].mxu1 %v6775_v30 }
 0x6ae   :  { %v6663_v59 = vadd.f32 %v7756_v14, %v10286_v8  ;;  %v6750_v62 = vmax.f32 %v6660_v12, 0.0 }
 0x6b0   :  { %v6751_v40 = vmax.f32 %v6663_v59, 0.0  ;;  %v7757_v39 = vpop.f32.mrb[92].mxu1 }
 0x6b1   :  { %v7758_v47 = vpop.f32.mrb[93].mxu1 }
 0x6b2   :  { %v7759_v23 = vadd.f32 %v7758_v47, %v7757_v39  ;;  %v7760_v25 = vpop.f32.mrb[94].mxu1  ;;  %v6776_v5 = vpack.c.bf16 %v6751_v40, %v6750_v62 }
 0x6b3   :  { %v7761_v9 = vpop.f32.mrb[95].mxu1 }
 0x6b4   :  { %v6668_v55 = vadd.f32 %v7759_v23, %v10286_v8  ;;  %v7762_v57 = vadd.f32 %v7761_v9, %v7760_v25  ;;  %7881 = vmatprep.mubr.bf16.mxu1 %v6776_v5 }
 0x6b6   :  { %v6671_v38 = vadd.f32 %v7762_v57, %v10286_v8  ;;  %v6752_v49 = vmax.f32 %v6668_v55, 0.0 }
 0x6b8   :  { %v6753_v29 = vmax.f32 %v6671_v38, 0.0  ;;  %v7763_v33 = vpop.f32.mrb[96].mxu1 }
 0x6b9   :  { %v7764_v24 = vpop.f32.mrb[97].mxu1 }
 0x6ba   :  { %v7765_v27 = vadd.f32 %v7764_v24, %v7763_v33  ;;  %v7766_v31 = vpop.f32.mrb[98].mxu1  ;;  %v6777_v28 = vpack.c.bf16 %v6753_v29, %v6752_v49 }
 0x6bb   :  { %v7767_v63 = vpop.f32.mrb[99].mxu1 }
 0x6bc   :  { %v6676_v0 = vadd.f32 %v7765_v27, %v10286_v8  ;;  %v7768_v1 = vadd.f32 %v7767_v63, %v7766_v31  ;;  %7882 = vmatmul.mubr.bf16.gmra.mrb[140].mxu1 %v6777_v28 }
 0x6be   :  { %v6679_v2 = vadd.f32 %v7768_v1, %v10286_v8  ;;  %v6754_v3 = vmax.f32 %v6676_v0, 0.0 }
 0x6c0   :  { %v6755_v4 = vmax.f32 %v6679_v2, 0.0  ;;  %v7769_v7 = vpop.f32.mrb[100].mxu1 }
 0x6c1   :  { %v7770_v10 = vpop.f32.mrb[101].mxu1 }
 0x6c2   :  { %v7771_v11 = vadd.f32 %v7770_v10, %v7769_v7  ;;  %v7772_v13 = vpop.f32.mrb[102].mxu1  ;;  %v6778_v15 = vpack.c.bf16 %v6755_v4, %v6754_v3 }
 0x6c3   :  { %v7773_v17 = vpop.f32.mrb[103].mxu1 }
 0x6c4   :  { %v6684_v19 = vadd.f32 %v7771_v11, %v10286_v8  ;;  %v7774_v20 = vadd.f32 %v7773_v17, %v7772_v13  ;;  %7885 = vmatprep.mubr.bf16.mxu1 %v6778_v15 }
 0x6c6   :  { %v6687_v21 = vadd.f32 %v7774_v20, %v10286_v8  ;;  %v6756_v22 = vmax.f32 %v6684_v19, 0.0 }
 0x6c8   :  { %v6757_v50 = vmax.f32 %v6687_v21, 0.0  ;;  %v7775_v41 = vpop.f32.mrb[104].mxu1 }
 0x6c9   :  { %v7776_v51 = vpop.f32.mrb[105].mxu1 }
 0x6ca   :  { %v7777_v42 = vadd.f32 %v7776_v51, %v7775_v41  ;;  %v7778_v26 = vpop.f32.mrb[106].mxu1  ;;  %v6779_v45 = vpack.c.bf16 %v6757_v50, %v6756_v22 }
 0x6cb   :  { %v7779_v43 = vpop.f32.mrb[107].mxu1 }
 0x6cc   :  { %v6692_v44 = vadd.f32 %v7777_v42, %v10286_v8  ;;  %v7780_v54 = vadd.f32 %v7779_v43, %v7778_v26  ;;  %7886 = vmatmul.mubr.bf16.gmra.mrb[144].mxu1 %v6779_v45 }
 0x6ce   :  { %v6695_v37 = vadd.f32 %v7780_v54, %v10286_v8  ;;  %v6758_v56 = vmax.f32 %v6692_v44, 0.0  ;;  %v10320_v54 = vld [vmem:[#allocation15] ss:$0 sm:$0xff] }
 0x6d0   :  { %v6759_v52 = vmax.f32 %v6695_v37, 0.0  ;;  %v7781_v53 = vpop.f32.mrb[108].mxu1 }
 0x6d1   :  { %v7782_v61 = vpop.f32.mrb[109].mxu1 }
 0x6d2   :  { %v7783_v6 = vadd.f32 %v7782_v61, %v7781_v53  ;;  %v7784_v16 = vpop.f32.mrb[110].mxu1  ;;  %v6780_v18 = vpack.c.bf16 %v6759_v52, %v6758_v56 }
 0x6d3   :  { %v7785_v46 = vpop.f32.mrb[111].mxu1 }
 0x6d4   :  { %v6700_v58 = vadd.f32 %v7783_v6, %v10286_v8  ;;  %v7786_v48 = vadd.f32 %v7785_v46, %v7784_v16  ;;  %7889 = vmatprep.mubr.bf16.mxu1 %v6780_v18  ;;  %v10325_v18 = vld [vmem:[#allocation17] sm:$0x1] }
 0x6d6   :  { %v6703_v60 = vadd.f32 %v7786_v48, %v10286_v8  ;;  %v6760_v30 = vmax.f32 %v6700_v58, 0.0 }
 0x6d8   :  { %v6761_v32 = vmax.f32 %v6703_v60, 0.0  ;;  %v7787_v12 = vpop.f32.mrb[112].mxu1 }
 0x6d9   :  { %v7788_v14 = vpop.f32.mrb[113].mxu1 }
 0x6da   :  { %v7789_v59 = vadd.f32 %v7788_v14, %v7787_v12  ;;  %v7790_v62 = vpop.f32.mrb[114].mxu1  ;;  %v6781_v40 = vpack.c.bf16 %v6761_v32, %v6760_v30  ;;  %v7067_v12 = vld [vmem:[#allocation2] sm:$0x1]  ;;  %v9779_v14 = vmov 0  }
 0x6db   :  { %v7791_v39 = vpop.f32.mrb[115].mxu1  ;;  %8825 = vset.pattern.permute.xlu0 %v9779_v14 }
 0x6dc   :  { %v6708_v47 = vadd.f32 %v7789_v59, %v10286_v8  ;;  %v7792_v23 = vadd.f32 %v7791_v39, %v7790_v62  ;;  %7890 = vmatmul.mubr.bf16.gmra.mrb[148].mxu1 %v6781_v40  ;;  %7070 = vperm.xlu0 %8825, %v7067_v12  }
 0x6de   :  { %v6711_v25 = vadd.f32 %v7792_v23, %v10286_v8  ;;  %v6762_v5 = vmax.f32 %v6708_v47, 0.0 }
 0x6e0   :  { %v6763_v9 = vmax.f32 %v6711_v25, 0.0  ;;  %v7793_v55 = vpop.f32.mrb[116].mxu1 }
 0x6e1   :  { %v7794_v57 = vpop.f32.mrb[117].mxu1 }
 0x6e2   :  { %v7795_v38 = vadd.f32 %v7794_v57, %v7793_v55  ;;  %v7796_v49 = vpop.f32.mrb[118].mxu1  ;;  %v6782_v29 = vpack.c.bf16 %v6763_v9, %v6762_v5 }
 0x6e3   :  { %v7797_v33 = vpop.f32.mrb[119].mxu1 }
 0x6e4   :  { %v6716_v24 = vadd.f32 %v7795_v38, %v10286_v8  ;;  %v7798_v27 = vadd.f32 %v7797_v33, %v7796_v49  ;;  %7893 = vmatprep.mubr.bf16.mxu1 %v6782_v29 }
 0x6e6   :  { %v6719_v31 = vadd.f32 %v7798_v27, %v10286_v8  ;;  %v6764_v28 = vmax.f32 %v6716_v24, 0.0 }
 0x6e8   :  { %v6765_v63 = vmax.f32 %v6719_v31, 0.0  ;;  %v7799_v0 = vpop.f32.mrb[120].mxu1 }
 0x6e9   :  { %v7800_v1 = vpop.f32.mrb[121].mxu1 }
 0x6ea   :  { %v7801_v2 = vadd.f32 %v7800_v1, %v7799_v0  ;;  %v7802_v3 = vpop.f32.mrb[122].mxu1  ;;  %v6783_v4 = vpack.c.bf16 %v6765_v63, %v6764_v28 }
 0x6eb   :  { %v7803_v7 = vpop.f32.mrb[123].mxu1 }
 0x6ec   :  { %v6724_v10 = vadd.f32 %v7801_v2, %v10286_v8  ;;  %v7804_v11 = vadd.f32 %v7803_v7, %v7802_v3  ;;  %7894 = vmatmul.mubr.bf16.gmra.mrb[152].mxu1 %v6783_v4 }
 0x6ee   :  { %v6727_v13 = vadd.f32 %v7804_v11, %v10286_v8  ;;  %v6766_v15 = vmax.f32 %v6724_v10, 0.0 }
 0x6f0   :  { %v6767_v17 = vmax.f32 %v6727_v13, 0.0  ;;  %v7805_v19 = vpop.f32.mrb[124].mxu1 }
 0x6f1   :  { %v7806_v20 = vpop.f32.mrb[125].mxu1 }
 0x6f2   :  { %v7807_v21 = vadd.f32 %v7806_v20, %v7805_v19  ;;  %v7808_v22 = vpop.f32.mrb[126].mxu1  ;;  %v6784_v50 = vpack.c.bf16 %v6767_v17, %v6766_v15 }
 0x6f3   :  { %v7809_v41 = vpop.f32.mrb[127].mxu1 }
 0x6f4   :  { %v6732_v51 = vadd.f32 %v7807_v21, %v10286_v8  ;;  %v7810_v42 = vadd.f32 %v7809_v41, %v7808_v22  ;;  %7897 = vmatprep.mubr.bf16.mxu1 %v6784_v50 }
 0x6f6   :  { %v6735_v26 = vadd.f32 %v7810_v42, %v10286_v8  ;;  %v6768_v45 = vmax.f32 %v6732_v51, 0.0 }
 0x6f8   :  { %v6769_v43 = vmax.f32 %v6735_v26, 0.0 }
 0x6fa   :  { %v6785_v44 = vpack.c.bf16 %v6769_v43, %v6768_v45 }
 0x6fc   :  { %7898 = vmatmul.mubr.bf16.gmra.mrb[156].mxu1 %v6785_v44 }
 0x6fd   :  { %7851 = vmatprep.mubr.msk.bf16.mxu1 %vm7077_vm0, %v10325_v18 }
 0x75f   :  { %v7871_v37 = vpop.f32.mrb[128].mxu1 }
 0x760   :  { %v6900_v56 = vadd.f32 %v7871_v37, %v10320_v54  ;;  %v6891_v52 = vpop.f32.mrb[129].mxu1 }
 0x761   :  { %v6892_v53 = vadd.f32 %v10320_v54, %v6891_v52  ;;  %v7872_v61 = vpop.f32.mrb[130].mxu1 }
 0x762   :  { %v6903_v6 = vadd.f32 %v7872_v61, %v10320_v54  ;;  %v6894_v16 = vpop.f32.mrb[131].mxu1  ;;  %v7020_v46 = vmax.f32 %v6900_v56, 0.0 }
 0x763   :  { %v6895_v8 = vadd.f32 %v10320_v54, %v6894_v16  ;;  %v7018_v48 = vmax.f32 %v6892_v53, 0.0 }
 0x764   :  { %v7021_v58 = vmax.f32 %v6903_v6, 0.0 }
 0x765   :  { %v7019_v60 = vmax.f32 %v6895_v8, 0.0 }
 0x766   :  { %v10330_v30 = vpack.c.bf16 %v7021_v58, %v7020_v46 }
 0x767   :  { %v7051_v32 = vpack.c.bf16 %v7019_v60, %v7018_v48 }
 0x769   :  { %v7082_v14 = vsel %vm7077_vm0, %v7051_v32, 0 }
 0x76f   :  { %v7875_v59 = vpop.f32.mrb[132].mxu1 }
 0x770   :  { %v6916_v62 = vadd.f32 %v7875_v59, %v10320_v54  ;;  %v6907_v40 = vpop.f32.mrb[133].mxu1 }
 0x771   :  { %v6908_v39 = vadd.f32 %v10320_v54, %v6907_v40  ;;  %v7876_v47 = vpop.f32.mrb[134].mxu1 }
 0x772   :  { %v6919_v23 = vadd.f32 %v7876_v47, %v10320_v54  ;;  %v6910_v25 = vpop.f32.mrb[135].mxu1  ;;  %v7024_v9 = vmax.f32 %v6916_v62, 0.0 }
 0x773   :  { %v6911_v5 = vadd.f32 %v10320_v54, %v6910_v25  ;;  %v7022_v57 = vmax.f32 %v6908_v39, 0.0 }
 0x774   :  { %v7025_v55 = vmax.f32 %v6919_v23, 0.0  ;;  %v7085_v23 = vsel %vm7077_vm0, %v10330_v30, 0 }
 0x775   :  { %v7023_v38 = vmax.f32 %v6911_v5, 0.0 }
 0x776   :  { %v10336_v49 = vpack.c.bf16 %v7025_v55, %v7024_v9 }
 0x777   :  { %v10338_v29 = vpack.c.bf16 %v7023_v38, %v7022_v57 }
 0x77f   :  { %v7879_v33 = vpop.f32.mrb[136].mxu1 }
 0x780   :  { %v6932_v24 = vadd.f32 %v7879_v33, %v10320_v54  ;;  %v6923_v27 = vpop.f32.mrb[137].mxu1 }
 0x781   :  { %v6924_v31 = vadd.f32 %v10320_v54, %v6923_v27  ;;  %v7880_v28 = vpop.f32.mrb[138].mxu1  ;;  %v7088_v27 = vsel %vm7077_vm0, %v10338_v29, 0 }
 0x782   :  { %v6935_v63 = vadd.f32 %v7880_v28, %v10320_v54  ;;  %v6926_v0 = vpop.f32.mrb[139].mxu1  ;;  %v7028_v2 = vmax.f32 %v6932_v24, 0.0 }
 0x783   :  { %v6927_v1 = vadd.f32 %v10320_v54, %v6926_v0  ;;  %v7026_v4 = vmax.f32 %v6924_v31, 0.0 }
 0x784   :  { %v7029_v3 = vmax.f32 %v6935_v63, 0.0 }
 0x785   :  { %v7027_v7 = vmax.f32 %v6927_v1, 0.0  ;;  %v7091_v1 = vsel %vm7077_vm0, %v10336_v49, 0 }
 0x786   :  { %v10344_v10 = vpack.c.bf16 %v7029_v3, %v7028_v2 }
 0x787   :  { %v10346_v11 = vpack.c.bf16 %v7027_v7, %v7026_v4 }
 0x78f   :  { %v7883_v13 = vpop.f32.mrb[140].mxu1 }
 0x790   :  { %v6948_v15 = vadd.f32 %v7883_v13, %v10320_v54  ;;  %v6939_v17 = vpop.f32.mrb[141].mxu1 }
 0x791   :  { %v6940_v19 = vadd.f32 %v10320_v54, %v6939_v17  ;;  %v7884_v20 = vpop.f32.mrb[142].mxu1 }
 0x792   :  { %v6951_v21 = vadd.f32 %v7884_v20, %v10320_v54  ;;  %v6942_v22 = vpop.f32.mrb[143].mxu1  ;;  %v7032_v41 = vmax.f32 %v6948_v15, 0.0  ;;  %v7094_v20 = vsel %vm7077_vm0, %v10346_v11, 0 }
 0x793   :  { %v6943_v50 = vadd.f32 %v10320_v54, %v6942_v22  ;;  %v7030_v42 = vmax.f32 %v6940_v19, 0.0 }
 0x794   :  { %v7033_v51 = vmax.f32 %v6951_v21, 0.0 }
 0x795   :  { %v7031_v26 = vmax.f32 %v6943_v50, 0.0 }
 0x796   :  { %v10352_v45 = vpack.c.bf16 %v7033_v51, %v7032_v41  ;;  %v7097_v51 = vsel %vm7077_vm0, %v10344_v10, 0 }
 0x797   :  { %v10354_v43 = vpack.c.bf16 %v7031_v26, %v7030_v42 }
 0x798   :  { %v7103_v10 = vsel %vm7077_vm0, %v10352_v45, 0 }
 0x79f   :  { %v7887_v44 = vpop.f32.mrb[144].mxu1 }
 0x7a0   :  { %v6964_v37 = vadd.f32 %v7887_v44, %v10320_v54  ;;  %v6955_v56 = vpop.f32.mrb[145].mxu1 }
 0x7a1   :  { %v6956_v52 = vadd.f32 %v10320_v54, %v6955_v56  ;;  %v7888_v53 = vpop.f32.mrb[146].mxu1 }
 0x7a2   :  { %v6967_v61 = vadd.f32 %v7888_v53, %v10320_v54  ;;  %v6958_v6 = vpop.f32.mrb[147].mxu1  ;;  %v7036_v8 = vmax.f32 %v6964_v37, 0.0 }
 0x7a3   :  { %v6959_v16 = vadd.f32 %v10320_v54, %v6958_v6  ;;  %v7034_v58 = vmax.f32 %v6956_v52, 0.0  ;;  %v7100_v6 = vsel %vm7077_vm0, %v10354_v43, 0 }
 0x7a4   :  { %v7037_v46 = vmax.f32 %v6967_v61, 0.0 }
 0x7a5   :  { %v7035_v48 = vmax.f32 %v6959_v16, 0.0 }
 0x7a6   :  { %v7060_v60 = vpack.c.bf16 %v7037_v46, %v7036_v8 }
 0x7a7   :  { %v7059_v12 = vpack.c.bf16 %v7035_v48, %v7034_v58 }
 0x7a9   :  { %8797 = vmatprep.subr.msk.bf16.mxu1 %vm7077_vm0, %v7059_v12 }
 0x7aa   :  { %7836 = vmatpush3.bf16.xpose.msra.mxu1 %v7082_v14 }
 0x7ab   :  { %8798 = vmatprep.subr.msk.bf16.mxu1 %vm7077_vm0, %v7060_v60 }
 0x7af   :  { %v7891_v59 = vpop.f32.mrb[148].mxu1 }
 0x7b0   :  { %v6980_v62 = vadd.f32 %v7891_v59, %v10320_v54  ;;  %v6971_v40 = vpop.f32.mrb[149].mxu1 }
 0x7b1   :  { %v6972_v39 = vadd.f32 %v10320_v54, %v6971_v40  ;;  %v7892_v47 = vpop.f32.mrb[150].mxu1 }
 0x7b2   :  { %v6983_v25 = vadd.f32 %v7892_v47, %v10320_v54  ;;  %v6974_v5 = vpop.f32.mrb[151].mxu1  ;;  %7838 = vmatpush3.bf16.xpose.msra.mxu1 %v7085_v23  ;;  %v7040_v32 = vmax.f32 %v6980_v62, 0.0 }
 0x7b3   :  { %v6975_v9 = vadd.f32 %v10320_v54, %v6974_v5  ;;  %v7038_v57 = vmax.f32 %v6972_v39, 0.0 }
 0x7b4   :  { %v7041_v55 = vmax.f32 %v6983_v25, 0.0 }
 0x7b5   :  { %v7039_v38 = vmax.f32 %v6975_v9, 0.0 }
 0x7b6   :  { %v7062_v33 = vpack.c.bf16 %v7041_v55, %v7040_v32 }
 0x7b7   :  { %v7061_v24 = vpack.c.bf16 %v7039_v38, %v7038_v57 }
 0x7b9   :  { %8799 = vmatprep.subr.msk.bf16.mxu1 %vm7077_vm0, %v7061_v24 }
 0x7ba   :  { %7840 = vmatpush3.bf16.xpose.msra.mxu1 %v7088_v27 }
 0x7bb   :  { %8800 = vmatprep.subr.msk.bf16.mxu1 %vm7077_vm0, %v7062_v33 }
 0x7bf   :  { %v7895_v30 = vpop.f32.mrb[152].mxu1 }
 0x7c0   :  { %v6996_v31 = vadd.f32 %v7895_v30, %v10320_v54  ;;  %v6987_v28 = vpop.f32.mrb[153].mxu1 }
 0x7c1   :  { %v6988_v63 = vadd.f32 %v10320_v54, %v6987_v28  ;;  %v7896_v0 = vpop.f32.mrb[154].mxu1 }
 0x7c2   :  { %v6999_v2 = vadd.f32 %v7896_v0, %v10320_v54  ;;  %v6990_v3 = vpop.f32.mrb[155].mxu1  ;;  %7842 = vmatpush3.bf16.xpose.msra.mxu1 %v7091_v1  ;;  %v7044_v29 = vmax.f32 %v6996_v31, 0.0 }
 0x7c3   :  { %v6991_v4 = vadd.f32 %v10320_v54, %v6990_v3  ;;  %v7042_v13 = vmax.f32 %v6988_v63, 0.0 }
 0x7c4   :  { %v7045_v7 = vmax.f32 %v6999_v2, 0.0 }
 0x7c5   :  { %v7043_v15 = vmax.f32 %v6991_v4, 0.0 }
 0x7c6   :  { %v7064_v17 = vpack.c.bf16 %v7045_v7, %v7044_v29 }
 0x7c7   :  { %v7063_v19 = vpack.c.bf16 %v7043_v15, %v7042_v13 }
 0x7c9   :  { %8801 = vmatprep.subr.msk.bf16.mxu1 %vm7077_vm0, %v7063_v19 }
 0x7ca   :  { %7844 = vmatpush3.bf16.xpose.msra.mxu1 %v7094_v20 }
 0x7cb   :  { %8802 = vmatprep.subr.msk.bf16.mxu1 %vm7077_vm0, %v7064_v17 }
 0x7cf   :  { %v7899_v49 = vpop.f32.mrb[156].mxu1 }
 0x7d0   :  { %v7012_v21 = vadd.f32 %v7899_v49, %v10320_v54  ;;  %v7003_v22 = vpop.f32.mrb[157].mxu1 }
 0x7d1   :  { %v7004_v50 = vadd.f32 %v10320_v54, %v7003_v22  ;;  %v7900_v41 = vpop.f32.mrb[158].mxu1 }
 0x7d2   :  { %v7015_v42 = vadd.f32 %v7900_v41, %v10320_v54  ;;  %v7006_v26 = vpop.f32.mrb[159].mxu1  ;;  %7846 = vmatpush3.bf16.xpose.msra.mxu1 %v7097_v51  ;;  %v7048_v11 = vmax.f32 %v7012_v21, 0.0 }
 0x7d3   :  { %v7007_v44 = vadd.f32 %v10320_v54, %v7006_v26  ;;  %v7046_v56 = vmax.f32 %v7004_v50, 0.0  ;;  %v7071_v54 = vpop.permute.xlu0 %7070 }
 0x7d4   :  { %v7049_v37 = vmax.f32 %v7015_v42, 0.0  ;;  %v7076_v16 = vrot.slane %v7071_v54, %v9957_v36 }
 0x7d5   :  { %v7047_v52 = vmax.f32 %v7007_v44, 0.0 }
 0x7d6   :  { %v7066_v53 = vpack.c.bf16 %v7049_v37, %v7048_v11 }
 0x7d7   :  { %v7065_v61 = vpack.c.bf16 %v7047_v52, %v7046_v56 }
 0x7d9   :  { %8803 = vmatprep.subr.msk.bf16.mxu1 %vm7077_vm0, %v7065_v61 }
 0x7da   :  { %7848 = vmatpush3.bf16.xpose.msra.mxu1 %v7100_v6 }
 0x7db   :  { %8804 = vmatprep.subr.msk.bf16.mxu1 %vm7077_vm0, %v7066_v53 }
 0x7e2   :  { %7850 = vmatpush3.bf16.xpose.msra.mxu1 %v7103_v10 }
 0x7e9   :  { %7852 = vmatmul.mubr.msk.bf16.vlgmr.msra.gmra.mrb[160].mxu1 %vm7077_vm0, %v10325_v18  ;;  %v9780_v18 = vmov 1966171168  }
 0x7ea   :  { %v7186_v36 = vunpack.c.l.s4 %v9780_v18 }
 0x7ec   :  { %v7187_v23 = vunpack.c.0.s8 %v7186_v36 }
 0x7ee   :  { %v7190_v5 = vsub.s32 %v7187_v23, %v9954_v35 }
 0x8bc   :  { %v7163_v8 = vpop.f32.mrb[160].mxu1 }
 0x8bd   :  { %v7164_v46 = vadd.f32 %v7163_v8, %v7076_v16  ;;  %v7165_v58 = vpop.f32.mrb[161].mxu1 }
 0x8be   :  { %v7166_v48 = vadd.f32 %v7165_v58, %v7076_v16  ;;  %v7167_v60 = vpop.f32.mrb[162].mxu1 }
 0x8bf   :  { %v7170_v12 = vsub.f32 0.0, %v7164_v46  ;;  %v7168_v43 = vpop.f32.mrb[163].mxu1 }
 0x8c0   :  { %v7171_v14 = vsub.f32 0.0, %v7166_v48 }
 0x8c1   :  { %v7172_v59 = vmul.f32 1.442695, %v7170_v12 }
 0x8c2   :  { %v7174_v62 = vmul.f32 1.442695, %v7171_v14 }
 0x8c3   :  { %9522 = vpow2.f32 %v7172_v59 }
 0x8c4   :  { %9524 = vpow2.f32 %v7174_v62 }
 0x8cd   :  { %v9523_v45 = vpop.eup %9522 }
 0x8ce   :  { %v9525_v40 = vpop.eup %9524  ;;  %v7176_v39 = vadd.f32 1.0, %v9523_v45 }
 0x8cf   :  { %v7177_v47 = vadd.f32 1.0, %v9525_v40 }
 0x8d0   :  { %9526 = vrcp.f32 %v7176_v39 }
 0x8d1   :  { %9528 = vrcp.f32 %v7177_v47 }
 0x8da   :  { %v9527_v25 = vpop.eup %9526 }
 0x8db   :  { %v9529_v9 = vpop.eup %9528 }
 0x8dc   :  { %v7184_v32 = vcombine.low %v9527_v25, %v9529_v9 }
 0x8de   :  { %v7191_v55 = vrot.slane %v7184_v32, %v7190_v5 }
 0x8e0   :  { %v7198_v57 = vrot.slane %v7191_v55, %v7190_v5 }
 0x8e2   :  { %7204 = vst.msk [vmem:[#allocation18] sm:$0x3] %vm7202_vm1, %v7198_v57 }
 0x8e3   :  { %9739 = shalt.err (!%p9736_p6)
}
 0x8e4   :  { %s9740_s13 = scalar_lea.hbm %s10423_s11, 32 }
 0x8e5   :  { %p9741_p7 = scmp.ne.s32.totalorder %s10423_s11, %s9740_s13  ;;  %p9744_p8 = scmp.lt.u32.totalorder %s9740_s13, %s10423_s11 }
 0x8e7   :  { %p9746_p9 = pnand %p9744_p8, %p9741_p7 }
 0x8e9   :  { %9749 = shalt.err (!%p9746_p9)
}
 0x8ea   :  { %7214 = dma.vmem_to_hbm [thread:$0]  %s7212_s30, 32, %s10423_s11, [#allocation5]  }
 0x8eb   :  { %9760 = dma.done.wait [#allocation5], 32  }
 0x8ec   :  { %9761 = vsyncadd [#allocation5], 4294967264 }
 0x8ed   :  { %7218 = vsyncpa [#allocation4], 1 }
 0x8ee   :  { %7219 = vsyncpa [#allocation7], 1 }
 0x8ef   :  { %7220 = vsyncpa [#allocation10], 1 }
 0x8f0   :  { %7221 = vsyncpa [#allocation13], 1 }
 0x8f1   :  { %7222 = vsyncpa [#allocation16], 1 }
 0x8f2   :  { %7223 = vsyncpa [#allocation5], 1 }

</bundles_post_ra>
